<compile_context>
chip_gen: v6e
topology: v6e:2x2x1
jax: 0.10.0
libtpu: 0.0.40
codegen_flags: <defaults>
</compile_context>

<pallas_src>
import jax
import jax.numpy as jnp
from jax.experimental import pallas as pl
from jax.experimental.pallas import tpu as pltpu

# ----------------------------- model config ---------------------------------
NUM_ELEMENTS = 8      # num_elements (also the feature dim of the input state)
HIDDEN = 32           # hidden_dim
NUM_HEADS = 4
NUM_LAYERS = 3
BATCH = 2
HEAD_DIM = HIDDEN // NUM_HEADS
LN_EPS = 1e-5
ROWS = BATCH * NUM_ELEMENTS          # stacked token rows, b-major: r = b*N + n


def _layernorm(v, w, b):
    mu = jnp.mean(v, axis=-1, keepdims=True)
    var = jnp.mean((v - mu) ** 2, axis=-1, keepdims=True)
    return (v - mu) * jax.lax.rsqrt(var + LN_EPS) * w + b


# ------------------------------- kernel -------------------------------------
def gflownet_kernel(
    x_ref, w_emb_ref, b_emb_ref, ln_e_w_ref, ln_e_b_ref,
    rep_ref, pos_ref, mask_ref,
    wq_ref, wk_ref, wv_ref, wo_ref,
    bq_ref, bk_ref, bv_ref, bo_ref,
    ln_w_ref, ln_b_ref,
    wwide_ref, hmask_ref, collapse_ref, rsum_ref,
    bf1_ref, wf2_ref, bf2_ref,
    flows_ref, weights_ref,
):
    # ---- feature_embedding: Linear + LayerNorm + ReLU (dropout = identity) ----
    h = jnp.dot(x_ref[...], w_emb_ref[...],
                preferred_element_type=jnp.float32) + b_emb_ref[...]
    h = jnp.maximum(_layernorm(h, ln_e_w_ref[...], ln_e_b_ref[...]), 0.0)   # (B, E)

    # ---- broadcast over num_elements via selector matmul + positional enc ----
    # rows r = b*N + n :  s[r, :] = h[b, :] + pos[n, :]
    s = jnp.dot(rep_ref[...], h, preferred_element_type=jnp.float32) + pos_ref[...]

    mask = mask_ref[...]                       # (ROWS, ROWS) additive cross-n mask
    scale = 1.0 / float(HEAD_DIM) ** 0.5
    inv_heads = 1.0 / float(NUM_HEADS)

    # ---- FeatureAttention stack (block-diagonal attention on the stacked tile) ----
    for l in range(NUM_LAYERS):
        attn = None
        p_sum = None
        for hd in range(NUM_HEADS):
            i = l * NUM_HEADS + hd
            qh = jnp.dot(s, wq_ref[i], preferred_element_type=jnp.float32) + bq_ref[i]
            kh = jnp.dot(s, wk_ref[i], preferred_element_type=jnp.float32) + bk_ref[i]
            vh = jnp.dot(s, wv_ref[i], preferred_element_type=jnp.float32) + bv_ref[i]
            sc = jnp.einsum('ld,sd->ls', qh, kh,
                            preferred_element_type=jnp.float32) * scale + mask
            m = jnp.max(sc, axis=-1, keepdims=True)
            e = jnp.exp(sc - m)
            p = e * pl.reciprocal(jnp.sum(e, axis=-1, keepdims=True), approx=True)
            ctx = jnp.dot(p, vh, preferred_element_type=jnp.float32)        # (ROWS, dh)
            oh = jnp.dot(ctx, wo_ref[i], preferred_element_type=jnp.float32)  # (ROWS, E)
            attn = oh if attn is None else attn + oh
            p_sum = p if p_sum is None else p_sum + p
        weights_ref[l] = p_sum * inv_heads                    # one dense store per layer
        s = _layernorm(s + attn + bo_ref[l], ln_w_ref[l], ln_b_ref[l])

    # ---- final head: flat(B, N*E) @ wf1^T without any in-kernel reshape ----
    u = jnp.dot(s, wwide_ref[...], preferred_element_type=jnp.float32) * hmask_ref[...]
    v = jnp.dot(u, collapse_ref[...], preferred_element_type=jnp.float32)   # (ROWS, E)
    y = jnp.dot(rsum_ref[...], v, preferred_element_type=jnp.float32) + bf1_ref[...]
    y = jnp.maximum(y, 0.0)
    z = jnp.dot(y, wf2_ref[...], preferred_element_type=jnp.float32) + bf2_ref[...]
    flows_ref[...] = jax.nn.sigmoid(z)                         # (B, 1)


# ------------------------------- wrapper -------------------------------------
def gflownet_forward(x, params):
    E, N, L, H, dh = HIDDEN, NUM_ELEMENTS, NUM_LAYERS, NUM_HEADS, HEAD_DIM
    B = x.shape[0]
    R = B * N
    f32 = jnp.float32

    # ---- per-head weight prep (trace-time; kills runtime lane slicing) ----
    wq_h = params['wq'].reshape(L, H, dh, E).transpose(0, 1, 3, 2).reshape(L * H, E, dh)
    wk_h = params['wk'].reshape(L, H, dh, E).transpose(0, 1, 3, 2).reshape(L * H, E, dh)
    wv_h = params['wv'].reshape(L, H, dh, E).transpose(0, 1, 3, 2).reshape(L * H, E, dh)
    wo_h = params['wo'].reshape(L, E, H, dh).transpose(0, 2, 3, 1).reshape(L * H, dh, E)
    bq_h = params['bq'].reshape(L, 1, H, dh).transpose(0, 2, 1, 3).reshape(L * H, 1, dh)
    bk_h = params['bk'].reshape(L, 1, H, dh).transpose(0, 2, 1, 3).reshape(L * H, 1, dh)
    bv_h = params['bv'].reshape(L, 1, H, dh).transpose(0, 2, 1, 3).reshape(L * H, 1, dh)

    # ---- stacking / masking constants (b-major rows: r = b*N + n) ----
    rep = jnp.repeat(jnp.eye(B, dtype=f32), N, axis=0)           # (R, B): r -> b
    rsum = jnp.repeat(jnp.eye(B, dtype=f32), N, axis=1)          # (B, R): sum over n
    pos_rep = jnp.tile(params['pos'], (B, 1)).astype(f32)        # (R, E): r -> pos[n]
    ridx = jnp.arange(R)
    attn_mask = jnp.where((ridx[:, None] % N) == (ridx[None, :] % N),
                          0.0, -1e30).astype(f32)                # (R, R)

    # ---- final-head constants: y = rsum @ ((s @ w_wide) * head_mask) @ collapse ----
    # w_wide[e, n*E + o] = wf1[o, n*E + e]
    w_wide = params['wf1'].reshape(E, N, E).transpose(2, 1, 0).reshape(E, N * E)
    head_mask = ((ridx[:, None] % N) ==
                 (jnp.arange(N * E)[None, :] // E)).astype(f32)  # (R, N*E)
    collapse = jnp.tile(jnp.eye(E, dtype=f32), (N, 1))           # (N*E, E)

    inputs = [
        x.astype(f32),
        params['w_emb'].T,                  # (N, E)
        params['b_emb'], params['ln_e_w'], params['ln_e_b'],
        rep, pos_rep, attn_mask,
        wq_h, wk_h, wv_h, wo_h,
        bq_h, bk_h, bv_h, params['bo'],
        params['ln_w'], params['ln_b'],
        w_wide, head_mask, collapse, rsum,
        params['bf1'],
        params['wf2'].T,                    # (E, 1)
        params['bf2'],
    ]

    out_shape = (
        jax.ShapeDtypeStruct((B, 1), f32),
        jax.ShapeDtypeStruct((L, R, R), f32),   # head-averaged masked softmax per layer
    )
    vmem = pl.BlockSpec(memory_space=pltpu.MemorySpace.VMEM)
    fn = pl.pallas_call(
        gflownet_kernel,
        out_shape=out_shape,
        in_specs=[vmem] * len(inputs),
        out_specs=(vmem, vmem),
        cost_estimate=pl.CostEstimate(flops=1_100_000,
                                      transcendentals=3_400,
                                      bytes_accessed=150_000),
    )
    flows, w_raw = fn(*inputs)

    # Extract per-element (N, B, B) head-averaged weights from the dense (R, R)
    # block-structured softmax (cross-n entries are exactly zero).
    n_idx = jnp.arange(N)
    attn_weights = []
    for l in range(L):
        P = w_raw[l].reshape(B, N, B, N)
        attn_weights.append(P[:, n_idx, :, n_idx])               # (N, B, B)
    return flows, attn_weights


# ---------------------- pure-JAX reference (torch math) ----------------------
def reference_forward(x, params):
    E, N, L, H, dh = HIDDEN, NUM_ELEMENTS, NUM_LAYERS, NUM_HEADS, HEAD_DIM
    B = x.shape[0]

    h = x @ params['w_emb'].T + params['b_emb']
    h = jnp.maximum(_layernorm(h, params['ln_e_w'], params['ln_e_b']), 0.0)
    s = h[:, None, :] + params['pos'][None, :, :]                # (L=B, N, E)

    weights_all = []
    scale = dh ** -0.5
    for l in range(L):
        q = s @ params['wq'][l].T + params['bq'][l]
        k = s @ params['wk'][l].T + params['bk'][l]
        v = s @ params['wv'][l].T + params['bv'][l]
        qh = q.reshape(B, N, H, dh)
        kh = k.reshape(B, N, H, dh)
        vh = v.reshape(B, N, H, dh)
        sc = jnp.einsum('lnhd,snhd->nhls', qh, kh) * scale
        p = jax.nn.softmax(sc, axis=-1)                          # (N, H, L, S)
        ctx = jnp.einsum('nhls,snhd->lnhd', p, vh).reshape(B, N, E)
        attn = ctx @ params['wo'][l].T + params['bo'][l]
        s = _layernorm(s + attn, params['ln_w'][l], params['ln_b'][l])
        weights_all.append(p.mean(axis=1))                       # (N, L, S)

    flat = s.reshape(B, N * E)
    y = jnp.maximum(flat @ params['wf1'].T + params['bf1'], 0.0)
    z = y @ params['wf2'].T + params['bf2']
    return jax.nn.sigmoid(z), weights_all


# ------------------------------ param init -----------------------------------
def build_params(key):
    E, N, L = HIDDEN, NUM_ELEMENTS, NUM_LAYERS
    ks = jax.random.split(key, 16)
    w = lambda k, shape, s=0.05: jax.random.normal(k, shape, jnp.float32) * s
    return dict(
        w_emb=w(ks[0], (E, N)),
        b_emb=w(ks[1], (1, E)),
        ln_e_w=jnp.ones((1, E), jnp.float32),
        ln_e_b=jnp.zeros((1, E), jnp.float32),
        pos=jax.random.normal(ks[2], (N, E), jnp.float32),
        wq=w(ks[3], (L, E, E)), wk=w(ks[4], (L, E, E)),
        wv=w(ks[5], (L, E, E)), wo=w(ks[6], (L, E, E)),
        bq=w(ks[7], (L, 1, E)), bk=w(ks[8], (L, 1, E)),
        bv=w(ks[9], (L, 1, E)), bo=w(ks[10], (L, 1, E)),
        ln_w=jnp.ones((L, 1, E), jnp.float32),
        ln_b=jnp.zeros((L, 1, E), jnp.float32),
        wf1=w(ks[11], (E, N * E)),
        bf1=w(ks[12], (1, E)),
        wf2=w(ks[13], (1, E)),
        bf2=w(ks[14], (1, 1)),
    )


if __name__ == "__main__":
    key = jax.random.PRNGKey(0)
    pkey, xkey = jax.random.split(key)
    params = build_params(pkey)
    # binary "state" inputs, as the module's forward receives selection masks
    x = jax.random.bernoulli(xkey, 0.5, (BATCH, NUM_ELEMENTS)).astype(jnp.float32)

    flows, attn_weights = gflownet_forward(x, params)
    flows = jax.block_until_ready(flows)
    attn_weights = [jax.block_until_ready(w) for w in attn_weights]

    ref_flows, ref_weights = reference_forward(x, params)

    assert flows.shape == (BATCH, 1)
    assert all(w.shape == (NUM_ELEMENTS, BATCH, BATCH) for w in attn_weights)
    assert jnp.allclose(flows, ref_flows, atol=2e-3, rtol=2e-3), "flows mismatch"
    for wk_, wr in zip(attn_weights, ref_weights):
        assert jnp.allclose(wk_, wr, atol=2e-3, rtol=2e-3), "attention weights mismatch"

    print("KERNEL_OK")
</pallas_src>

<mosaic_0001>
module attributes {stable_mosaic.version = 11 : i64} {
  func.func @gflownet_kernel(%arg0: memref<2x8xf32, #tpu.memory_space<vmem>>, %arg1: memref<8x32xf32, #tpu.memory_space<vmem>>, %arg2: memref<1x32xf32, #tpu.memory_space<vmem>>, %arg3: memref<1x32xf32, #tpu.memory_space<vmem>>, %arg4: memref<1x32xf32, #tpu.memory_space<vmem>>, %arg5: memref<16x2xf32, #tpu.memory_space<vmem>>, %arg6: memref<16x32xf32, #tpu.memory_space<vmem>>, %arg7: memref<16x16xf32, #tpu.memory_space<vmem>>, %arg8: memref<12x32x8xf32, #tpu.memory_space<vmem>>, %arg9: memref<12x32x8xf32, #tpu.memory_space<vmem>>, %arg10: memref<12x32x8xf32, #tpu.memory_space<vmem>>, %arg11: memref<12x8x32xf32, #tpu.memory_space<vmem>>, %arg12: memref<12x1x8xf32, #tpu.memory_space<vmem>>, %arg13: memref<12x1x8xf32, #tpu.memory_space<vmem>>, %arg14: memref<12x1x8xf32, #tpu.memory_space<vmem>>, %arg15: memref<3x1x32xf32, #tpu.memory_space<vmem>>, %arg16: memref<3x1x32xf32, #tpu.memory_space<vmem>>, %arg17: memref<3x1x32xf32, #tpu.memory_space<vmem>>, %arg18: memref<32x256xf32, #tpu.memory_space<vmem>>, %arg19: memref<16x256xf32, #tpu.memory_space<vmem>>, %arg20: memref<256x32xf32, #tpu.memory_space<vmem>>, %arg21: memref<2x16xf32, #tpu.memory_space<vmem>>, %arg22: memref<1x32xf32, #tpu.memory_space<vmem>>, %arg23: memref<32x1xf32, #tpu.memory_space<vmem>>, %arg24: memref<1x1xf32, #tpu.memory_space<vmem>>, %arg25: memref<2x1xf32, #tpu.memory_space<vmem>>, %arg26: memref<3x16x16xf32, #tpu.memory_space<vmem>>) attributes {dimension_semantics = [], scalar_prefetch = 0 : i64, scratch_operands = 0 : i64, tpu.core_type = #tpu.core_type<tc>} {
    %c0 = arith.constant 0 : index
    %c0_0 = arith.constant 0 : index
    %0 = vector.load %arg0[%c0, %c0_0] : memref<2x8xf32, #tpu.memory_space<vmem>>, vector<2x8xf32>
    %c0_1 = arith.constant 0 : index
    %c0_2 = arith.constant 0 : index
    %1 = vector.load %arg1[%c0_1, %c0_2] : memref<8x32xf32, #tpu.memory_space<vmem>>, vector<8x32xf32>
    %cst = arith.constant dense<0.000000e+00> : vector<2x32xf32>
    %2 = tpu.matmul %0, %1, %cst {dimension_numbers = #tpu.dot_dimension_numbers<[1], [0], [0], [1], [0, 0, 1, 1], [], []>} : vector<2x8xf32>, vector<8x32xf32>, vector<2x32xf32> -> vector<2x32xf32>
    %c0_3 = arith.constant 0 : index
    %c0_4 = arith.constant 0 : index
    %3 = vector.load %arg2[%c0_3, %c0_4] : memref<1x32xf32, #tpu.memory_space<vmem>>, vector<1x32xf32>
    %4 = vector.broadcast %3 : vector<1x32xf32> to vector<2x32xf32>
    %5 = arith.addf %2, %4 : vector<2x32xf32>
    %c0_5 = arith.constant 0 : index
    %c0_6 = arith.constant 0 : index
    %6 = vector.load %arg3[%c0_5, %c0_6] : memref<1x32xf32, #tpu.memory_space<vmem>>, vector<1x32xf32>
    %c0_7 = arith.constant 0 : index
    %c0_8 = arith.constant 0 : index
    %7 = vector.load %arg4[%c0_7, %c0_8] : memref<1x32xf32, #tpu.memory_space<vmem>>, vector<1x32xf32>
    %cst_9 = arith.constant dense<0.000000e+00> : vector<2xf32>
    %8 = vector.multi_reduction <add>, %5, %cst_9 [1] : vector<2x32xf32> to vector<2xf32>
    %9 = vector.shape_cast %8 : vector<2xf32> to vector<2x1xf32>
    %cst_10 = arith.constant 3.200000e+01 : f32
    %10 = vector.broadcast %cst_10 : f32 to vector<2x1xf32>
    %11 = arith.divf %9, %10 : vector<2x1xf32>
    %12 = vector.broadcast %11 : vector<2x1xf32> to vector<2x32xf32>
    %13 = arith.subf %5, %12 : vector<2x32xf32>
    %14 = arith.mulf %13, %13 : vector<2x32xf32>
    %cst_11 = arith.constant dense<0.000000e+00> : vector<2xf32>
    %15 = vector.multi_reduction <add>, %14, %cst_11 [1] : vector<2x32xf32> to vector<2xf32>
    %16 = vector.shape_cast %15 : vector<2xf32> to vector<2x1xf32>
    %cst_12 = arith.constant 3.200000e+01 : f32
    %17 = vector.broadcast %cst_12 : f32 to vector<2x1xf32>
    %18 = arith.divf %16, %17 : vector<2x1xf32>
    %19 = vector.broadcast %11 : vector<2x1xf32> to vector<2x32xf32>
    %20 = arith.subf %5, %19 : vector<2x32xf32>
    %cst_13 = arith.constant 9.99999974E-6 : f32
    %21 = vector.broadcast %cst_13 : f32 to vector<2x1xf32>
    %22 = arith.addf %18, %21 : vector<2x1xf32>
    %23 = math.rsqrt %22 : vector<2x1xf32>
    %24 = vector.broadcast %23 : vector<2x1xf32> to vector<2x32xf32>
    %25 = arith.mulf %20, %24 : vector<2x32xf32>
    %26 = vector.broadcast %6 : vector<1x32xf32> to vector<2x32xf32>
    %27 = arith.mulf %25, %26 : vector<2x32xf32>
    %28 = vector.broadcast %7 : vector<1x32xf32> to vector<2x32xf32>
    %29 = arith.addf %27, %28 : vector<2x32xf32>
    %cst_14 = arith.constant 0.000000e+00 : f32
    %30 = vector.broadcast %cst_14 : f32 to vector<2x32xf32>
    %31 = arith.maximumf %29, %30 : vector<2x32xf32>
    %c0_15 = arith.constant 0 : index
    %c0_16 = arith.constant 0 : index
    %32 = vector.load %arg5[%c0_15, %c0_16] : memref<16x2xf32, #tpu.memory_space<vmem>>, vector<16x2xf32>
    %cst_17 = arith.constant dense<0.000000e+00> : vector<16x32xf32>
    %33 = tpu.matmul %32, %31, %cst_17 {dimension_numbers = #tpu.dot_dimension_numbers<[1], [0], [0], [1], [0, 0, 1, 1], [], []>} : vector<16x2xf32>, vector<2x32xf32>, vector<16x32xf32> -> vector<16x32xf32>
    %c0_18 = arith.constant 0 : index
    %c0_19 = arith.constant 0 : index
    %34 = vector.load %arg6[%c0_18, %c0_19] : memref<16x32xf32, #tpu.memory_space<vmem>>, vector<16x32xf32>
    %35 = arith.addf %33, %34 : vector<16x32xf32>
    %c0_20 = arith.constant 0 : index
    %c0_21 = arith.constant 0 : index
    %36 = vector.load %arg7[%c0_20, %c0_21] : memref<16x16xf32, #tpu.memory_space<vmem>>, vector<16x16xf32>
    %c0_22 = arith.constant 0 : index
    %c0_23 = arith.constant 0 : index
    %c0_24 = arith.constant 0 : index
    %37 = vector.load %arg8[%c0_22, %c0_23, %c0_24] : memref<12x32x8xf32, #tpu.memory_space<vmem>>, vector<1x32x8xf32>
    %38 = vector.shape_cast %37 : vector<1x32x8xf32> to vector<32x8xf32>
    %cst_25 = arith.constant dense<0.000000e+00> : vector<16x8xf32>
    %39 = tpu.matmul %35, %38, %cst_25 {dimension_numbers = #tpu.dot_dimension_numbers<[1], [0], [0], [1], [0, 0, 1, 1], [], []>} : vector<16x32xf32>, vector<32x8xf32>, vector<16x8xf32> -> vector<16x8xf32>
    %c0_26 = arith.constant 0 : index
    %c0_27 = arith.constant 0 : index
    %c0_28 = arith.constant 0 : index
    %40 = vector.load %arg12[%c0_26, %c0_27, %c0_28] : memref<12x1x8xf32, #tpu.memory_space<vmem>>, vector<1x1x8xf32>
    %41 = vector.shape_cast %40 : vector<1x1x8xf32> to vector<1x8xf32>
    %42 = vector.broadcast %41 : vector<1x8xf32> to vector<16x8xf32>
    %43 = arith.addf %39, %42 : vector<16x8xf32>
    %c0_29 = arith.constant 0 : index
    %c0_30 = arith.constant 0 : index
    %c0_31 = arith.constant 0 : index
    %44 = vector.load %arg9[%c0_29, %c0_30, %c0_31] : memref<12x32x8xf32, #tpu.memory_space<vmem>>, vector<1x32x8xf32>
    %45 = vector.shape_cast %44 : vector<1x32x8xf32> to vector<32x8xf32>
    %cst_32 = arith.constant dense<0.000000e+00> : vector<16x8xf32>
    %46 = tpu.matmul %35, %45, %cst_32 {dimension_numbers = #tpu.dot_dimension_numbers<[1], [0], [0], [1], [0, 0, 1, 1], [], []>} : vector<16x32xf32>, vector<32x8xf32>, vector<16x8xf32> -> vector<16x8xf32>
    %c0_33 = arith.constant 0 : index
    %c0_34 = arith.constant 0 : index
    %c0_35 = arith.constant 0 : index
    %47 = vector.load %arg13[%c0_33, %c0_34, %c0_35] : memref<12x1x8xf32, #tpu.memory_space<vmem>>, vector<1x1x8xf32>
    %48 = vector.shape_cast %47 : vector<1x1x8xf32> to vector<1x8xf32>
    %49 = vector.broadcast %48 : vector<1x8xf32> to vector<16x8xf32>
    %50 = arith.addf %46, %49 : vector<16x8xf32>
    %c0_36 = arith.constant 0 : index
    %c0_37 = arith.constant 0 : index
    %c0_38 = arith.constant 0 : index
    %51 = vector.load %arg10[%c0_36, %c0_37, %c0_38] : memref<12x32x8xf32, #tpu.memory_space<vmem>>, vector<1x32x8xf32>
    %52 = vector.shape_cast %51 : vector<1x32x8xf32> to vector<32x8xf32>
    %cst_39 = arith.constant dense<0.000000e+00> : vector<16x8xf32>
    %53 = tpu.matmul %35, %52, %cst_39 {dimension_numbers = #tpu.dot_dimension_numbers<[1], [0], [0], [1], [0, 0, 1, 1], [], []>} : vector<16x32xf32>, vector<32x8xf32>, vector<16x8xf32> -> vector<16x8xf32>
    %c0_40 = arith.constant 0 : index
    %c0_41 = arith.constant 0 : index
    %c0_42 = arith.constant 0 : index
    %54 = vector.load %arg14[%c0_40, %c0_41, %c0_42] : memref<12x1x8xf32, #tpu.memory_space<vmem>>, vector<1x1x8xf32>
    %55 = vector.shape_cast %54 : vector<1x1x8xf32> to vector<1x8xf32>
    %56 = vector.broadcast %55 : vector<1x8xf32> to vector<16x8xf32>
    %57 = arith.addf %53, %56 : vector<16x8xf32>
    "tpu.trace_start"() <{level = 10 : i32, message = "ld,sd->ls"}> : () -> ()
    %cst_43 = arith.constant dense<0.000000e+00> : vector<16x16xf32>
    %58 = tpu.matmul %43, %50, %cst_43 {dimension_numbers = #tpu.dot_dimension_numbers<[1], [1], [0], [0], [0, 0, 1, 0], [], []>} : vector<16x8xf32>, vector<16x8xf32>, vector<16x16xf32> -> vector<16x16xf32>
    "tpu.trace_stop"() : () -> ()
    %cst_44 = arith.constant 0.353553385 : f32
    %59 = vector.broadcast %cst_44 : f32 to vector<16x16xf32>
    %60 = arith.mulf %58, %59 : vector<16x16xf32>
    %61 = arith.addf %60, %36 : vector<16x16xf32>
    %cst_45 = arith.constant dense<0xFF800000> : vector<16xf32>
    %62 = vector.multi_reduction <maximumf>, %61, %cst_45 [1] : vector<16x16xf32> to vector<16xf32>
    %63 = vector.shape_cast %62 : vector<16xf32> to vector<16x1xf32>
    %64 = vector.broadcast %63 : vector<16x1xf32> to vector<16x16xf32>
    %65 = arith.subf %61, %64 : vector<16x16xf32>
    %66 = math.exp %65 : vector<16x16xf32>
    %cst_46 = arith.constant dense<0.000000e+00> : vector<16xf32>
    %67 = vector.multi_reduction <add>, %66, %cst_46 [1] : vector<16x16xf32> to vector<16xf32>
    %68 = vector.shape_cast %67 : vector<16xf32> to vector<16x1xf32>
    %69 = tpu.reciprocal %68 {approx = true} : vector<16x1xf32> -> vector<16x1xf32>
    %70 = vector.broadcast %69 : vector<16x1xf32> to vector<16x16xf32>
    %71 = arith.mulf %66, %70 : vector<16x16xf32>
    %cst_47 = arith.constant dense<0.000000e+00> : vector<16x8xf32>
    %72 = tpu.matmul %71, %57, %cst_47 {dimension_numbers = #tpu.dot_dimension_numbers<[1], [0], [0], [1], [0, 0, 1, 1], [], []>} : vector<16x16xf32>, vector<16x8xf32>, vector<16x8xf32> -> vector<16x8xf32>
    %c0_48 = arith.constant 0 : index
    %c0_49 = arith.constant 0 : index
    %c0_50 = arith.constant 0 : index
    %73 = vector.load %arg11[%c0_48, %c0_49, %c0_50] : memref<12x8x32xf32, #tpu.memory_space<vmem>>, vector<1x8x32xf32>
    %74 = vector.shape_cast %73 : vector<1x8x32xf32> to vector<8x32xf32>
    %cst_51 = arith.constant dense<0.000000e+00> : vector<16x32xf32>
    %75 = tpu.matmul %72, %74, %cst_51 {dimension_numbers = #tpu.dot_dimension_numbers<[1], [0], [0], [1], [0, 0, 1, 1], [], []>} : vector<16x8xf32>, vector<8x32xf32>, vector<16x32xf32> -> vector<16x32xf32>
    %c1 = arith.constant 1 : index
    %c0_52 = arith.constant 0 : index
    %c0_53 = arith.constant 0 : index
    %76 = vector.load %arg8[%c1, %c0_52, %c0_53] : memref<12x32x8xf32, #tpu.memory_space<vmem>>, vector<1x32x8xf32>
    %77 = vector.shape_cast %76 : vector<1x32x8xf32> to vector<32x8xf32>
    %cst_54 = arith.constant dense<0.000000e+00> : vector<16x8xf32>
    %78 = tpu.matmul %35, %77, %cst_54 {dimension_numbers = #tpu.dot_dimension_numbers<[1], [0], [0], [1], [0, 0, 1, 1], [], []>} : vector<16x32xf32>, vector<32x8xf32>, vector<16x8xf32> -> vector<16x8xf32>
    %c1_55 = arith.constant 1 : index
    %c0_56 = arith.constant 0 : index
    %c0_57 = arith.constant 0 : index
    %79 = vector.load %arg12[%c1_55, %c0_56, %c0_57] : memref<12x1x8xf32, #tpu.memory_space<vmem>>, vector<1x1x8xf32>
    %80 = vector.shape_cast %79 : vector<1x1x8xf32> to vector<1x8xf32>
    %81 = vector.broadcast %80 : vector<1x8xf32> to vector<16x8xf32>
    %82 = arith.addf %78, %81 : vector<16x8xf32>
    %c1_58 = arith.constant 1 : index
    %c0_59 = arith.constant 0 : index
    %c0_60 = arith.constant 0 : index
    %83 = vector.load %arg9[%c1_58, %c0_59, %c0_60] : memref<12x32x8xf32, #tpu.memory_space<vmem>>, vector<1x32x8xf32>
    %84 = vector.shape_cast %83 : vector<1x32x8xf32> to vector<32x8xf32>
    %cst_61 = arith.constant dense<0.000000e+00> : vector<16x8xf32>
    %85 = tpu.matmul %35, %84, %cst_61 {dimension_numbers = #tpu.dot_dimension_numbers<[1], [0], [0], [1], [0, 0, 1, 1], [], []>} : vector<16x32xf32>, vector<32x8xf32>, vector<16x8xf32> -> vector<16x8xf32>
    %c1_62 = arith.constant 1 : index
    %c0_63 = arith.constant 0 : index
    %c0_64 = arith.constant 0 : index
    %86 = vector.load %arg13[%c1_62, %c0_63, %c0_64] : memref<12x1x8xf32, #tpu.memory_space<vmem>>, vector<1x1x8xf32>
    %87 = vector.shape_cast %86 : vector<1x1x8xf32> to vector<1x8xf32>
    %88 = vector.broadcast %87 : vector<1x8xf32> to vector<16x8xf32>
    %89 = arith.addf %85, %88 : vector<16x8xf32>
    %c1_65 = arith.constant 1 : index
    %c0_66 = arith.constant 0 : index
    %c0_67 = arith.constant 0 : index
    %90 = vector.load %arg10[%c1_65, %c0_66, %c0_67] : memref<12x32x8xf32, #tpu.memory_space<vmem>>, vector<1x32x8xf32>
    %91 = vector.shape_cast %90 : vector<1x32x8xf32> to vector<32x8xf32>
    %cst_68 = arith.constant dense<0.000000e+00> : vector<16x8xf32>
    %92 = tpu.matmul %35, %91, %cst_68 {dimension_numbers = #tpu.dot_dimension_numbers<[1], [0], [0], [1], [0, 0, 1, 1], [], []>} : vector<16x32xf32>, vector<32x8xf32>, vector<16x8xf32> -> vector<16x8xf32>
    %c1_69 = arith.constant 1 : index
    %c0_70 = arith.constant 0 : index
    %c0_71 = arith.constant 0 : index
    %93 = vector.load %arg14[%c1_69, %c0_70, %c0_71] : memref<12x1x8xf32, #tpu.memory_space<vmem>>, vector<1x1x8xf32>
    %94 = vector.shape_cast %93 : vector<1x1x8xf32> to vector<1x8xf32>
    %95 = vector.broadcast %94 : vector<1x8xf32> to vector<16x8xf32>
    %96 = arith.addf %92, %95 : vector<16x8xf32>
    "tpu.trace_start"() <{level = 10 : i32, message = "ld,sd->ls"}> : () -> ()
    %cst_72 = arith.constant dense<0.000000e+00> : vector<16x16xf32>
    %97 = tpu.matmul %82, %89, %cst_72 {dimension_numbers = #tpu.dot_dimension_numbers<[1], [1], [0], [0], [0, 0, 1, 0], [], []>} : vector<16x8xf32>, vector<16x8xf32>, vector<16x16xf32> -> vector<16x16xf32>
    "tpu.trace_stop"() : () -> ()
    %cst_73 = arith.constant 0.353553385 : f32
    %98 = vector.broadcast %cst_73 : f32 to vector<16x16xf32>
    %99 = arith.mulf %97, %98 : vector<16x16xf32>
    %100 = arith.addf %99, %36 : vector<16x16xf32>
    %cst_74 = arith.constant dense<0xFF800000> : vector<16xf32>
    %101 = vector.multi_reduction <maximumf>, %100, %cst_74 [1] : vector<16x16xf32> to vector<16xf32>
    %102 = vector.shape_cast %101 : vector<16xf32> to vector<16x1xf32>
    %103 = vector.broadcast %102 : vector<16x1xf32> to vector<16x16xf32>
    %104 = arith.subf %100, %103 : vector<16x16xf32>
    %105 = math.exp %104 : vector<16x16xf32>
    %cst_75 = arith.constant dense<0.000000e+00> : vector<16xf32>
    %106 = vector.multi_reduction <add>, %105, %cst_75 [1] : vector<16x16xf32> to vector<16xf32>
    %107 = vector.shape_cast %106 : vector<16xf32> to vector<16x1xf32>
    %108 = tpu.reciprocal %107 {approx = true} : vector<16x1xf32> -> vector<16x1xf32>
    %109 = vector.broadcast %108 : vector<16x1xf32> to vector<16x16xf32>
    %110 = arith.mulf %105, %109 : vector<16x16xf32>
    %cst_76 = arith.constant dense<0.000000e+00> : vector<16x8xf32>
    %111 = tpu.matmul %110, %96, %cst_76 {dimension_numbers = #tpu.dot_dimension_numbers<[1], [0], [0], [1], [0, 0, 1, 1], [], []>} : vector<16x16xf32>, vector<16x8xf32>, vector<16x8xf32> -> vector<16x8xf32>
    %c1_77 = arith.constant 1 : index
    %c0_78 = arith.constant 0 : index
    %c0_79 = arith.constant 0 : index
    %112 = vector.load %arg11[%c1_77, %c0_78, %c0_79] : memref<12x8x32xf32, #tpu.memory_space<vmem>>, vector<1x8x32xf32>
    %113 = vector.shape_cast %112 : vector<1x8x32xf32> to vector<8x32xf32>
    %cst_80 = arith.constant dense<0.000000e+00> : vector<16x32xf32>
    %114 = tpu.matmul %111, %113, %cst_80 {dimension_numbers = #tpu.dot_dimension_numbers<[1], [0], [0], [1], [0, 0, 1, 1], [], []>} : vector<16x8xf32>, vector<8x32xf32>, vector<16x32xf32> -> vector<16x32xf32>
    %115 = arith.addf %75, %114 : vector<16x32xf32>
    %116 = arith.addf %71, %110 : vector<16x16xf32>
    %c2 = arith.constant 2 : index
    %c0_81 = arith.constant 0 : index
    %c0_82 = arith.constant 0 : index
    %117 = vector.load %arg8[%c2, %c0_81, %c0_82] : memref<12x32x8xf32, #tpu.memory_space<vmem>>, vector<1x32x8xf32>
    %118 = vector.shape_cast %117 : vector<1x32x8xf32> to vector<32x8xf32>
    %cst_83 = arith.constant dense<0.000000e+00> : vector<16x8xf32>
    %119 = tpu.matmul %35, %118, %cst_83 {dimension_numbers = #tpu.dot_dimension_numbers<[1], [0], [0], [1], [0, 0, 1, 1], [], []>} : vector<16x32xf32>, vector<32x8xf32>, vector<16x8xf32> -> vector<16x8xf32>
    %c2_84 = arith.constant 2 : index
    %c0_85 = arith.constant 0 : index
    %c0_86 = arith.constant 0 : index
    %120 = vector.load %arg12[%c2_84, %c0_85, %c0_86] : memref<12x1x8xf32, #tpu.memory_space<vmem>>, vector<1x1x8xf32>
    %121 = vector.shape_cast %120 : vector<1x1x8xf32> to vector<1x8xf32>
    %122 = vector.broadcast %121 : vector<1x8xf32> to vector<16x8xf32>
    %123 = arith.addf %119, %122 : vector<16x8xf32>
    %c2_87 = arith.constant 2 : index
    %c0_88 = arith.constant 0 : index
    %c0_89 = arith.constant 0 : index
    %124 = vector.load %arg9[%c2_87, %c0_88, %c0_89] : memref<12x32x8xf32, #tpu.memory_space<vmem>>, vector<1x32x8xf32>
    %125 = vector.shape_cast %124 : vector<1x32x8xf32> to vector<32x8xf32>
    %cst_90 = arith.constant dense<0.000000e+00> : vector<16x8xf32>
    %126 = tpu.matmul %35, %125, %cst_90 {dimension_numbers = #tpu.dot_dimension_numbers<[1], [0], [0], [1], [0, 0, 1, 1], [], []>} : vector<16x32xf32>, vector<32x8xf32>, vector<16x8xf32> -> vector<16x8xf32>
    %c2_91 = arith.constant 2 : index
    %c0_92 = arith.constant 0 : index
    %c0_93 = arith.constant 0 : index
    %127 = vector.load %arg13[%c2_91, %c0_92, %c0_93] : memref<12x1x8xf32, #tpu.memory_space<vmem>>, vector<1x1x8xf32>
    %128 = vector.shape_cast %127 : vector<1x1x8xf32> to vector<1x8xf32>
    %129 = vector.broadcast %128 : vector<1x8xf32> to vector<16x8xf32>
    %130 = arith.addf %126, %129 : vector<16x8xf32>
    %c2_94 = arith.constant 2 : index
    %c0_95 = arith.constant 0 : index
    %c0_96 = arith.constant 0 : index
    %131 = vector.load %arg10[%c2_94, %c0_95, %c0_96] : memref<12x32x8xf32, #tpu.memory_space<vmem>>, vector<1x32x8xf32>
    %132 = vector.shape_cast %131 : vector<1x32x8xf32> to vector<32x8xf32>
    %cst_97 = arith.constant dense<0.000000e+00> : vector<16x8xf32>
    %133 = tpu.matmul %35, %132, %cst_97 {dimension_numbers = #tpu.dot_dimension_numbers<[1], [0], [0], [1], [0, 0, 1, 1], [], []>} : vector<16x32xf32>, vector<32x8xf32>, vector<16x8xf32> -> vector<16x8xf32>
    %c2_98 = arith.constant 2 : index
    %c0_99 = arith.constant 0 : index
    %c0_100 = arith.constant 0 : index
    %134 = vector.load %arg14[%c2_98, %c0_99, %c0_100] : memref<12x1x8xf32, #tpu.memory_space<vmem>>, vector<1x1x8xf32>
    %135 = vector.shape_cast %134 : vector<1x1x8xf32> to vector<1x8xf32>
    %136 = vector.broadcast %135 : vector<1x8xf32> to vector<16x8xf32>
    %137 = arith.addf %133, %136 : vector<16x8xf32>
    "tpu.trace_start"() <{level = 10 : i32, message = "ld,sd->ls"}> : () -> ()
    %cst_101 = arith.constant dense<0.000000e+00> : vector<16x16xf32>
    %138 = tpu.matmul %123, %130, %cst_101 {dimension_numbers = #tpu.dot_dimension_numbers<[1], [1], [0], [0], [0, 0, 1, 0], [], []>} : vector<16x8xf32>, vector<16x8xf32>, vector<16x16xf32> -> vector<16x16xf32>
    "tpu.trace_stop"() : () -> ()
    %cst_102 = arith.constant 0.353553385 : f32
    %139 = vector.broadcast %cst_102 : f32 to vector<16x16xf32>
    %140 = arith.mulf %138, %139 : vector<16x16xf32>
    %141 = arith.addf %140, %36 : vector<16x16xf32>
    %cst_103 = arith.constant dense<0xFF800000> : vector<16xf32>
    %142 = vector.multi_reduction <maximumf>, %141, %cst_103 [1] : vector<16x16xf32> to vector<16xf32>
    %143 = vector.shape_cast %142 : vector<16xf32> to vector<16x1xf32>
    %144 = vector.broadcast %143 : vector<16x1xf32> to vector<16x16xf32>
    %145 = arith.subf %141, %144 : vector<16x16xf32>
    %146 = math.exp %145 : vector<16x16xf32>
    %cst_104 = arith.constant dense<0.000000e+00> : vector<16xf32>
    %147 = vector.multi_reduction <add>, %146, %cst_104 [1] : vector<16x16xf32> to vector<16xf32>
    %148 = vector.shape_cast %147 : vector<16xf32> to vector<16x1xf32>
    %149 = tpu.reciprocal %148 {approx = true} : vector<16x1xf32> -> vector<16x1xf32>
    %150 = vector.broadcast %149 : vector<16x1xf32> to vector<16x16xf32>
    %151 = arith.mulf %146, %150 : vector<16x16xf32>
    %cst_105 = arith.constant dense<0.000000e+00> : vector<16x8xf32>
    %152 = tpu.matmul %151, %137, %cst_105 {dimension_numbers = #tpu.dot_dimension_numbers<[1], [0], [0], [1], [0, 0, 1, 1], [], []>} : vector<16x16xf32>, vector<16x8xf32>, vector<16x8xf32> -> vector<16x8xf32>
    %c2_106 = arith.constant 2 : index
    %c0_107 = arith.constant 0 : index
    %c0_108 = arith.constant 0 : index
    %153 = vector.load %arg11[%c2_106, %c0_107, %c0_108] : memref<12x8x32xf32, #tpu.memory_space<vmem>>, vector<1x8x32xf32>
    %154 = vector.shape_cast %153 : vector<1x8x32xf32> to vector<8x32xf32>
    %cst_109 = arith.constant dense<0.000000e+00> : vector<16x32xf32>
    %155 = tpu.matmul %152, %154, %cst_109 {dimension_numbers = #tpu.dot_dimension_numbers<[1], [0], [0], [1], [0, 0, 1, 1], [], []>} : vector<16x8xf32>, vector<8x32xf32>, vector<16x32xf32> -> vector<16x32xf32>
    %156 = arith.addf %115, %155 : vector<16x32xf32>
    %157 = arith.addf %116, %151 : vector<16x16xf32>
    %c3 = arith.constant 3 : index
    %c0_110 = arith.constant 0 : index
    %c0_111 = arith.constant 0 : index
    %158 = vector.load %arg8[%c3, %c0_110, %c0_111] : memref<12x32x8xf32, #tpu.memory_space<vmem>>, vector<1x32x8xf32>
    %159 = vector.shape_cast %158 : vector<1x32x8xf32> to vector<32x8xf32>
    %cst_112 = arith.constant dense<0.000000e+00> : vector<16x8xf32>
    %160 = tpu.matmul %35, %159, %cst_112 {dimension_numbers = #tpu.dot_dimension_numbers<[1], [0], [0], [1], [0, 0, 1, 1], [], []>} : vector<16x32xf32>, vector<32x8xf32>, vector<16x8xf32> -> vector<16x8xf32>
    %c3_113 = arith.constant 3 : index
    %c0_114 = arith.constant 0 : index
    %c0_115 = arith.constant 0 : index
    %161 = vector.load %arg12[%c3_113, %c0_114, %c0_115] : memref<12x1x8xf32, #tpu.memory_space<vmem>>, vector<1x1x8xf32>
    %162 = vector.shape_cast %161 : vector<1x1x8xf32> to vector<1x8xf32>
    %163 = vector.broadcast %162 : vector<1x8xf32> to vector<16x8xf32>
    %164 = arith.addf %160, %163 : vector<16x8xf32>
    %c3_116 = arith.constant 3 : index
    %c0_117 = arith.constant 0 : index
    %c0_118 = arith.constant 0 : index
    %165 = vector.load %arg9[%c3_116, %c0_117, %c0_118] : memref<12x32x8xf32, #tpu.memory_space<vmem>>, vector<1x32x8xf32>
    %166 = vector.shape_cast %165 : vector<1x32x8xf32> to vector<32x8xf32>
    %cst_119 = arith.constant dense<0.000000e+00> : vector<16x8xf32>
    %167 = tpu.matmul %35, %166, %cst_119 {dimension_numbers = #tpu.dot_dimension_numbers<[1], [0], [0], [1], [0, 0, 1, 1], [], []>} : vector<16x32xf32>, vector<32x8xf32>, vector<16x8xf32> -> vector<16x8xf32>
    %c3_120 = arith.constant 3 : index
    %c0_121 = arith.constant 0 : index
    %c0_122 = arith.constant 0 : index
    %168 = vector.load %arg13[%c3_120, %c0_121, %c0_122] : memref<12x1x8xf32, #tpu.memory_space<vmem>>, vector<1x1x8xf32>
    %169 = vector.shape_cast %168 : vector<1x1x8xf32> to vector<1x8xf32>
    %170 = vector.broadcast %169 : vector<1x8xf32> to vector<16x8xf32>
    %171 = arith.addf %167, %170 : vector<16x8xf32>
    %c3_123 = arith.constant 3 : index
    %c0_124 = arith.constant 0 : index
    %c0_125 = arith.constant 0 : index
    %172 = vector.load %arg10[%c3_123, %c0_124, %c0_125] : memref<12x32x8xf32, #tpu.memory_space<vmem>>, vector<1x32x8xf32>
    %173 = vector.shape_cast %172 : vector<1x32x8xf32> to vector<32x8xf32>
    %cst_126 = arith.constant dense<0.000000e+00> : vector<16x8xf32>
    %174 = tpu.matmul %35, %173, %cst_126 {dimension_numbers = #tpu.dot_dimension_numbers<[1], [0], [0], [1], [0, 0, 1, 1], [], []>} : vector<16x32xf32>, vector<32x8xf32>, vector<16x8xf32> -> vector<16x8xf32>
    %c3_127 = arith.constant 3 : index
    %c0_128 = arith.constant 0 : index
    %c0_129 = arith.constant 0 : index
    %175 = vector.load %arg14[%c3_127, %c0_128, %c0_129] : memref<12x1x8xf32, #tpu.memory_space<vmem>>, vector<1x1x8xf32>
    %176 = vector.shape_cast %175 : vector<1x1x8xf32> to vector<1x8xf32>
    %177 = vector.broadcast %176 : vector<1x8xf32> to vector<16x8xf32>
    %178 = arith.addf %174, %177 : vector<16x8xf32>
    "tpu.trace_start"() <{level = 10 : i32, message = "ld,sd->ls"}> : () -> ()
    %cst_130 = arith.constant dense<0.000000e+00> : vector<16x16xf32>
    %179 = tpu.matmul %164, %171, %cst_130 {dimension_numbers = #tpu.dot_dimension_numbers<[1], [1], [0], [0], [0, 0, 1, 0], [], []>} : vector<16x8xf32>, vector<16x8xf32>, vector<16x16xf32> -> vector<16x16xf32>
    "tpu.trace_stop"() : () -> ()
    %cst_131 = arith.constant 0.353553385 : f32
    %180 = vector.broadcast %cst_131 : f32 to vector<16x16xf32>
    %181 = arith.mulf %179, %180 : vector<16x16xf32>
    %182 = arith.addf %181, %36 : vector<16x16xf32>
    %cst_132 = arith.constant dense<0xFF800000> : vector<16xf32>
    %183 = vector.multi_reduction <maximumf>, %182, %cst_132 [1] : vector<16x16xf32> to vector<16xf32>
    %184 = vector.shape_cast %183 : vector<16xf32> to vector<16x1xf32>
    %185 = vector.broadcast %184 : vector<16x1xf32> to vector<16x16xf32>
    %186 = arith.subf %182, %185 : vector<16x16xf32>
    %187 = math.exp %186 : vector<16x16xf32>
    %cst_133 = arith.constant dense<0.000000e+00> : vector<16xf32>
    %188 = vector.multi_reduction <add>, %187, %cst_133 [1] : vector<16x16xf32> to vector<16xf32>
    %189 = vector.shape_cast %188 : vector<16xf32> to vector<16x1xf32>
    %190 = tpu.reciprocal %189 {approx = true} : vector<16x1xf32> -> vector<16x1xf32>
    %191 = vector.broadcast %190 : vector<16x1xf32> to vector<16x16xf32>
    %192 = arith.mulf %187, %191 : vector<16x16xf32>
    %cst_134 = arith.constant dense<0.000000e+00> : vector<16x8xf32>
    %193 = tpu.matmul %192, %178, %cst_134 {dimension_numbers = #tpu.dot_dimension_numbers<[1], [0], [0], [1], [0, 0, 1, 1], [], []>} : vector<16x16xf32>, vector<16x8xf32>, vector<16x8xf32> -> vector<16x8xf32>
    %c3_135 = arith.constant 3 : index
    %c0_136 = arith.constant 0 : index
    %c0_137 = arith.constant 0 : index
    %194 = vector.load %arg11[%c3_135, %c0_136, %c0_137] : memref<12x8x32xf32, #tpu.memory_space<vmem>>, vector<1x8x32xf32>
    %195 = vector.shape_cast %194 : vector<1x8x32xf32> to vector<8x32xf32>
    %cst_138 = arith.constant dense<0.000000e+00> : vector<16x32xf32>
    %196 = tpu.matmul %193, %195, %cst_138 {dimension_numbers = #tpu.dot_dimension_numbers<[1], [0], [0], [1], [0, 0, 1, 1], [], []>} : vector<16x8xf32>, vector<8x32xf32>, vector<16x32xf32> -> vector<16x32xf32>
    %197 = arith.addf %156, %196 : vector<16x32xf32>
    %198 = arith.addf %157, %192 : vector<16x16xf32>
    %cst_139 = arith.constant 2.500000e-01 : f32
    %199 = vector.broadcast %cst_139 : f32 to vector<16x16xf32>
    %200 = arith.mulf %198, %199 : vector<16x16xf32>
    %c0_140 = arith.constant 0 : index
    %c0_141 = arith.constant 0 : index
    %c0_142 = arith.constant 0 : index
    %201 = vector.load %arg26[%c0_140, %c0_141, %c0_142] : memref<3x16x16xf32, #tpu.memory_space<vmem>>, vector<1x16x16xf32>
    %202 = vector.shape_cast %201 : vector<1x16x16xf32> to vector<16x16xf32>
    %203 = vector.shape_cast %200 : vector<16x16xf32> to vector<1x16x16xf32>
    tpu.vector_store %arg26[%c0_140, %c0_141, %c0_142], %203 {strides = array<i32>} : memref<3x16x16xf32, #tpu.memory_space<vmem>>, vector<1x16x16xf32>,
    %204 = arith.addf %35, %197 : vector<16x32xf32>
    %c0_143 = arith.constant 0 : index
    %c0_144 = arith.constant 0 : index
    %c0_145 = arith.constant 0 : index
    %205 = vector.load %arg15[%c0_143, %c0_144, %c0_145] : memref<3x1x32xf32, #tpu.memory_space<vmem>>, vector<1x1x32xf32>
    %206 = vector.shape_cast %205 : vector<1x1x32xf32> to vector<1x32xf32>
    %207 = vector.broadcast %206 : vector<1x32xf32> to vector<16x32xf32>
    %208 = arith.addf %204, %207 : vector<16x32xf32>
    %c0_146 = arith.constant 0 : index
    %c0_147 = arith.constant 0 : index
    %c0_148 = arith.constant 0 : index
    %209 = vector.load %arg16[%c0_146, %c0_147, %c0_148] : memref<3x1x32xf32, #tpu.memory_space<vmem>>, vector<1x1x32xf32>
    %210 = vector.shape_cast %209 : vector<1x1x32xf32> to vector<1x32xf32>
    %c0_149 = arith.constant 0 : index
    %c0_150 = arith.constant 0 : index
    %c0_151 = arith.constant 0 : index
    %211 = vector.load %arg17[%c0_149, %c0_150, %c0_151] : memref<3x1x32xf32, #tpu.memory_space<vmem>>, vector<1x1x32xf32>
    %212 = vector.shape_cast %211 : vector<1x1x32xf32> to vector<1x32xf32>
    %cst_152 = arith.constant dense<0.000000e+00> : vector<16xf32>
    %213 = vector.multi_reduction <add>, %208, %cst_152 [1] : vector<16x32xf32> to vector<16xf32>
    %214 = vector.shape_cast %213 : vector<16xf32> to vector<16x1xf32>
    %cst_153 = arith.constant 3.200000e+01 : f32
    %215 = vector.broadcast %cst_153 : f32 to vector<16x1xf32>
    %216 = arith.divf %214, %215 : vector<16x1xf32>
    %217 = vector.broadcast %216 : vector<16x1xf32> to vector<16x32xf32>
    %218 = arith.subf %208, %217 : vector<16x32xf32>
    %219 = arith.mulf %218, %218 : vector<16x32xf32>
    %cst_154 = arith.constant dense<0.000000e+00> : vector<16xf32>
    %220 = vector.multi_reduction <add>, %219, %cst_154 [1] : vector<16x32xf32> to vector<16xf32>
    %221 = vector.shape_cast %220 : vector<16xf32> to vector<16x1xf32>
    %cst_155 = arith.constant 3.200000e+01 : f32
    %222 = vector.broadcast %cst_155 : f32 to vector<16x1xf32>
    %223 = arith.divf %221, %222 : vector<16x1xf32>
    %224 = vector.broadcast %216 : vector<16x1xf32> to vector<16x32xf32>
    %225 = arith.subf %208, %224 : vector<16x32xf32>
    %cst_156 = arith.constant 9.99999974E-6 : f32
    %226 = vector.broadcast %cst_156 : f32 to vector<16x1xf32>
    %227 = arith.addf %223, %226 : vector<16x1xf32>
    %228 = math.rsqrt %227 : vector<16x1xf32>
    %229 = vector.broadcast %228 : vector<16x1xf32> to vector<16x32xf32>
    %230 = arith.mulf %225, %229 : vector<16x32xf32>
    %231 = vector.broadcast %210 : vector<1x32xf32> to vector<16x32xf32>
    %232 = arith.mulf %230, %231 : vector<16x32xf32>
    %233 = vector.broadcast %212 : vector<1x32xf32> to vector<16x32xf32>
    %234 = arith.addf %232, %233 : vector<16x32xf32>
    %c4 = arith.constant 4 : index
    %c0_157 = arith.constant 0 : index
    %c0_158 = arith.constant 0 : index
    %235 = vector.load %arg8[%c4, %c0_157, %c0_158] : memref<12x32x8xf32, #tpu.memory_space<vmem>>, vector<1x32x8xf32>
    %236 = vector.shape_cast %235 : vector<1x32x8xf32> to vector<32x8xf32>
    %cst_159 = arith.constant dense<0.000000e+00> : vector<16x8xf32>
    %237 = tpu.matmul %234, %236, %cst_159 {dimension_numbers = #tpu.dot_dimension_numbers<[1], [0], [0], [1], [0, 0, 1, 1], [], []>} : vector<16x32xf32>, vector<32x8xf32>, vector<16x8xf32> -> vector<16x8xf32>
    %c4_160 = arith.constant 4 : index
    %c0_161 = arith.constant 0 : index
    %c0_162 = arith.constant 0 : index
    %238 = vector.load %arg12[%c4_160, %c0_161, %c0_162] : memref<12x1x8xf32, #tpu.memory_space<vmem>>, vector<1x1x8xf32>
    %239 = vector.shape_cast %238 : vector<1x1x8xf32> to vector<1x8xf32>
    %240 = vector.broadcast %239 : vector<1x8xf32> to vector<16x8xf32>
    %241 = arith.addf %237, %240 : vector<16x8xf32>
    %c4_163 = arith.constant 4 : index
    %c0_164 = arith.constant 0 : index
    %c0_165 = arith.constant 0 : index
    %242 = vector.load %arg9[%c4_163, %c0_164, %c0_165] : memref<12x32x8xf32, #tpu.memory_space<vmem>>, vector<1x32x8xf32>
    %243 = vector.shape_cast %242 : vector<1x32x8xf32> to vector<32x8xf32>
    %cst_166 = arith.constant dense<0.000000e+00> : vector<16x8xf32>
    %244 = tpu.matmul %234, %243, %cst_166 {dimension_numbers = #tpu.dot_dimension_numbers<[1], [0], [0], [1], [0, 0, 1, 1], [], []>} : vector<16x32xf32>, vector<32x8xf32>, vector<16x8xf32> -> vector<16x8xf32>
    %c4_167 = arith.constant 4 : index
    %c0_168 = arith.constant 0 : index
    %c0_169 = arith.constant 0 : index
    %245 = vector.load %arg13[%c4_167, %c0_168, %c0_169] : memref<12x1x8xf32, #tpu.memory_space<vmem>>, vector<1x1x8xf32>
    %246 = vector.shape_cast %245 : vector<1x1x8xf32> to vector<1x8xf32>
    %247 = vector.broadcast %246 : vector<1x8xf32> to vector<16x8xf32>
    %248 = arith.addf %244, %247 : vector<16x8xf32>
    %c4_170 = arith.constant 4 : index
    %c0_171 = arith.constant 0 : index
    %c0_172 = arith.constant 0 : index
    %249 = vector.load %arg10[%c4_170, %c0_171, %c0_172] : memref<12x32x8xf32, #tpu.memory_space<vmem>>, vector<1x32x8xf32>
    %250 = vector.shape_cast %249 : vector<1x32x8xf32> to vector<32x8xf32>
    %cst_173 = arith.constant dense<0.000000e+00> : vector<16x8xf32>
    %251 = tpu.matmul %234, %250, %cst_173 {dimension_numbers = #tpu.dot_dimension_numbers<[1], [0], [0], [1], [0, 0, 1, 1], [], []>} : vector<16x32xf32>, vector<32x8xf32>, vector<16x8xf32> -> vector<16x8xf32>
    %c4_174 = arith.constant 4 : index
    %c0_175 = arith.constant 0 : index
    %c0_176 = arith.constant 0 : index
    %252 = vector.load %arg14[%c4_174, %c0_175, %c0_176] : memref<12x1x8xf32, #tpu.memory_space<vmem>>, vector<1x1x8xf32>
    %253 = vector.shape_cast %252 : vector<1x1x8xf32> to vector<1x8xf32>
    %254 = vector.broadcast %253 : vector<1x8xf32> to vector<16x8xf32>
    %255 = arith.addf %251, %254 : vector<16x8xf32>
    "tpu.trace_start"() <{level = 10 : i32, message = "ld,sd->ls"}> : () -> ()
    %cst_177 = arith.constant dense<0.000000e+00> : vector<16x16xf32>
    %256 = tpu.matmul %241, %248, %cst_177 {dimension_numbers = #tpu.dot_dimension_numbers<[1], [1], [0], [0], [0, 0, 1, 0], [], []>} : vector<16x8xf32>, vector<16x8xf32>, vector<16x16xf32> -> vector<16x16xf32>
    "tpu.trace_stop"() : () -> ()
    %cst_178 = arith.constant 0.353553385 : f32
    %257 = vector.broadcast %cst_178 : f32 to vector<16x16xf32>
    %258 = arith.mulf %256, %257 : vector<16x16xf32>
    %259 = arith.addf %258, %36 : vector<16x16xf32>
    %cst_179 = arith.constant dense<0xFF800000> : vector<16xf32>
    %260 = vector.multi_reduction <maximumf>, %259, %cst_179 [1] : vector<16x16xf32> to vector<16xf32>
    %261 = vector.shape_cast %260 : vector<16xf32> to vector<16x1xf32>
    %262 = vector.broadcast %261 : vector<16x1xf32> to vector<16x16xf32>
    %263 = arith.subf %259, %262 : vector<16x16xf32>
    %264 = math.exp %263 : vector<16x16xf32>
    %cst_180 = arith.constant dense<0.000000e+00> : vector<16xf32>
    %265 = vector.multi_reduction <add>, %264, %cst_180 [1] : vector<16x16xf32> to vector<16xf32>
    %266 = vector.shape_cast %265 : vector<16xf32> to vector<16x1xf32>
    %267 = tpu.reciprocal %266 {approx = true} : vector<16x1xf32> -> vector<16x1xf32>
    %268 = vector.broadcast %267 : vector<16x1xf32> to vector<16x16xf32>
    %269 = arith.mulf %264, %268 : vector<16x16xf32>
    %cst_181 = arith.constant dense<0.000000e+00> : vector<16x8xf32>
    %270 = tpu.matmul %269, %255, %cst_181 {dimension_numbers = #tpu.dot_dimension_numbers<[1], [0], [0], [1], [0, 0, 1, 1], [], []>} : vector<16x16xf32>, vector<16x8xf32>, vector<16x8xf32> -> vector<16x8xf32>
    %c4_182 = arith.constant 4 : index
    %c0_183 = arith.constant 0 : index
    %c0_184 = arith.constant 0 : index
    %271 = vector.load %arg11[%c4_182, %c0_183, %c0_184] : memref<12x8x32xf32, #tpu.memory_space<vmem>>, vector<1x8x32xf32>
    %272 = vector.shape_cast %271 : vector<1x8x32xf32> to vector<8x32xf32>
    %cst_185 = arith.constant dense<0.000000e+00> : vector<16x32xf32>
    %273 = tpu.matmul %270, %272, %cst_185 {dimension_numbers = #tpu.dot_dimension_numbers<[1], [0], [0], [1], [0, 0, 1, 1], [], []>} : vector<16x8xf32>, vector<8x32xf32>, vector<16x32xf32> -> vector<16x32xf32>
    %c5 = arith.constant 5 : index
    %c0_186 = arith.constant 0 : index
    %c0_187 = arith.constant 0 : index
    %274 = vector.load %arg8[%c5, %c0_186, %c0_187] : memref<12x32x8xf32, #tpu.memory_space<vmem>>, vector<1x32x8xf32>
    %275 = vector.shape_cast %274 : vector<1x32x8xf32> to vector<32x8xf32>
    %cst_188 = arith.constant dense<0.000000e+00> : vector<16x8xf32>
    %276 = tpu.matmul %234, %275, %cst_188 {dimension_numbers = #tpu.dot_dimension_numbers<[1], [0], [0], [1], [0, 0, 1, 1], [], []>} : vector<16x32xf32>, vector<32x8xf32>, vector<16x8xf32> -> vector<16x8xf32>
    %c5_189 = arith.constant 5 : index
    %c0_190 = arith.constant 0 : index
    %c0_191 = arith.constant 0 : index
    %277 = vector.load %arg12[%c5_189, %c0_190, %c0_191] : memref<12x1x8xf32, #tpu.memory_space<vmem>>, vector<1x1x8xf32>
    %278 = vector.shape_cast %277 : vector<1x1x8xf32> to vector<1x8xf32>
    %279 = vector.broadcast %278 : vector<1x8xf32> to vector<16x8xf32>
    %280 = arith.addf %276, %279 : vector<16x8xf32>
    %c5_192 = arith.constant 5 : index
    %c0_193 = arith.constant 0 : index
    %c0_194 = arith.constant 0 : index
    %281 = vector.load %arg9[%c5_192, %c0_193, %c0_194] : memref<12x32x8xf32, #tpu.memory_space<vmem>>, vector<1x32x8xf32>
    %282 = vector.shape_cast %281 : vector<1x32x8xf32> to vector<32x8xf32>
    %cst_195 = arith.constant dense<0.000000e+00> : vector<16x8xf32>
    %283 = tpu.matmul %234, %282, %cst_195 {dimension_numbers = #tpu.dot_dimension_numbers<[1], [0], [0], [1], [0, 0, 1, 1], [], []>} : vector<16x32xf32>, vector<32x8xf32>, vector<16x8xf32> -> vector<16x8xf32>
    %c5_196 = arith.constant 5 : index
    %c0_197 = arith.constant 0 : index
    %c0_198 = arith.constant 0 : index
    %284 = vector.load %arg13[%c5_196, %c0_197, %c0_198] : memref<12x1x8xf32, #tpu.memory_space<vmem>>, vector<1x1x8xf32>
    %285 = vector.shape_cast %284 : vector<1x1x8xf32> to vector<1x8xf32>
    %286 = vector.broadcast %285 : vector<1x8xf32> to vector<16x8xf32>
    %287 = arith.addf %283, %286 : vector<16x8xf32>
    %c5_199 = arith.constant 5 : index
    %c0_200 = arith.constant 0 : index
    %c0_201 = arith.constant 0 : index
    %288 = vector.load %arg10[%c5_199, %c0_200, %c0_201] : memref<12x32x8xf32, #tpu.memory_space<vmem>>, vector<1x32x8xf32>
    %289 = vector.shape_cast %288 : vector<1x32x8xf32> to vector<32x8xf32>
    %cst_202 = arith.constant dense<0.000000e+00> : vector<16x8xf32>
    %290 = tpu.matmul %234, %289, %cst_202 {dimension_numbers = #tpu.dot_dimension_numbers<[1], [0], [0], [1], [0, 0, 1, 1], [], []>} : vector<16x32xf32>, vector<32x8xf32>, vector<16x8xf32> -> vector<16x8xf32>
    %c5_203 = arith.constant 5 : index
    %c0_204 = arith.constant 0 : index
    %c0_205 = arith.constant 0 : index
    %291 = vector.load %arg14[%c5_203, %c0_204, %c0_205] : memref<12x1x8xf32, #tpu.memory_space<vmem>>, vector<1x1x8xf32>
    %292 = vector.shape_cast %291 : vector<1x1x8xf32> to vector<1x8xf32>
    %293 = vector.broadcast %292 : vector<1x8xf32> to vector<16x8xf32>
    %294 = arith.addf %290, %293 : vector<16x8xf32>
    "tpu.trace_start"() <{level = 10 : i32, message = "ld,sd->ls"}> : () -> ()
    %cst_206 = arith.constant dense<0.000000e+00> : vector<16x16xf32>
    %295 = tpu.matmul %280, %287, %cst_206 {dimension_numbers = #tpu.dot_dimension_numbers<[1], [1], [0], [0], [0, 0, 1, 0], [], []>} : vector<16x8xf32>, vector<16x8xf32>, vector<16x16xf32> -> vector<16x16xf32>
    "tpu.trace_stop"() : () -> ()
    %cst_207 = arith.constant 0.353553385 : f32
    %296 = vector.broadcast %cst_207 : f32 to vector<16x16xf32>
    %297 = arith.mulf %295, %296 : vector<16x16xf32>
    %298 = arith.addf %297, %36 : vector<16x16xf32>
    %cst_208 = arith.constant dense<0xFF800000> : vector<16xf32>
    %299 = vector.multi_reduction <maximumf>, %298, %cst_208 [1] : vector<16x16xf32> to vector<16xf32>
    %300 = vector.shape_cast %299 : vector<16xf32> to vector<16x1xf32>
    %301 = vector.broadcast %300 : vector<16x1xf32> to vector<16x16xf32>
    %302 = arith.subf %298, %301 : vector<16x16xf32>
    %303 = math.exp %302 : vector<16x16xf32>
    %cst_209 = arith.constant dense<0.000000e+00> : vector<16xf32>
    %304 = vector.multi_reduction <add>, %303, %cst_209 [1] : vector<16x16xf32> to vector<16xf32>
    %305 = vector.shape_cast %304 : vector<16xf32> to vector<16x1xf32>
    %306 = tpu.reciprocal %305 {approx = true} : vector<16x1xf32> -> vector<16x1xf32>
    %307 = vector.broadcast %306 : vector<16x1xf32> to vector<16x16xf32>
    %308 = arith.mulf %303, %307 : vector<16x16xf32>
    %cst_210 = arith.constant dense<0.000000e+00> : vector<16x8xf32>
    %309 = tpu.matmul %308, %294, %cst_210 {dimension_numbers = #tpu.dot_dimension_numbers<[1], [0], [0], [1], [0, 0, 1, 1], [], []>} : vector<16x16xf32>, vector<16x8xf32>, vector<16x8xf32> -> vector<16x8xf32>
    %c5_211 = arith.constant 5 : index
    %c0_212 = arith.constant 0 : index
    %c0_213 = arith.constant 0 : index
    %310 = vector.load %arg11[%c5_211, %c0_212, %c0_213] : memref<12x8x32xf32, #tpu.memory_space<vmem>>, vector<1x8x32xf32>
    %311 = vector.shape_cast %310 : vector<1x8x32xf32> to vector<8x32xf32>
    %cst_214 = arith.constant dense<0.000000e+00> : vector<16x32xf32>
    %312 = tpu.matmul %309, %311, %cst_214 {dimension_numbers = #tpu.dot_dimension_numbers<[1], [0], [0], [1], [0, 0, 1, 1], [], []>} : vector<16x8xf32>, vector<8x32xf32>, vector<16x32xf32> -> vector<16x32xf32>
    %313 = arith.addf %273, %312 : vector<16x32xf32>
    %314 = arith.addf %269, %308 : vector<16x16xf32>
    %c6 = arith.constant 6 : index
    %c0_215 = arith.constant 0 : index
    %c0_216 = arith.constant 0 : index
    %315 = vector.load %arg8[%c6, %c0_215, %c0_216] : memref<12x32x8xf32, #tpu.memory_space<vmem>>, vector<1x32x8xf32>
    %316 = vector.shape_cast %315 : vector<1x32x8xf32> to vector<32x8xf32>
    %cst_217 = arith.constant dense<0.000000e+00> : vector<16x8xf32>
    %317 = tpu.matmul %234, %316, %cst_217 {dimension_numbers = #tpu.dot_dimension_numbers<[1], [0], [0], [1], [0, 0, 1, 1], [], []>} : vector<16x32xf32>, vector<32x8xf32>, vector<16x8xf32> -> vector<16x8xf32>
    %c6_218 = arith.constant 6 : index
    %c0_219 = arith.constant 0 : index
    %c0_220 = arith.constant 0 : index
    %318 = vector.load %arg12[%c6_218, %c0_219, %c0_220] : memref<12x1x8xf32, #tpu.memory_space<vmem>>, vector<1x1x8xf32>
    %319 = vector.shape_cast %318 : vector<1x1x8xf32> to vector<1x8xf32>
    %320 = vector.broadcast %319 : vector<1x8xf32> to vector<16x8xf32>
    %321 = arith.addf %317, %320 : vector<16x8xf32>
    %c6_221 = arith.constant 6 : index
    %c0_222 = arith.constant 0 : index
    %c0_223 = arith.constant 0 : index
    %322 = vector.load %arg9[%c6_221, %c0_222, %c0_223] : memref<12x32x8xf32, #tpu.memory_space<vmem>>, vector<1x32x8xf32>
    %323 = vector.shape_cast %322 : vector<1x32x8xf32> to vector<32x8xf32>
    %cst_224 = arith.constant dense<0.000000e+00> : vector<16x8xf32>
    %324 = tpu.matmul %234, %323, %cst_224 {dimension_numbers = #tpu.dot_dimension_numbers<[1], [0], [0], [1], [0, 0, 1, 1], [], []>} : vector<16x32xf32>, vector<32x8xf32>, vector<16x8xf32> -> vector<16x8xf32>
    %c6_225 = arith.constant 6 : index
    %c0_226 = arith.constant 0 : index
    %c0_227 = arith.constant 0 : index
    %325 = vector.load %arg13[%c6_225, %c0_226, %c0_227] : memref<12x1x8xf32, #tpu.memory_space<vmem>>, vector<1x1x8xf32>
    %326 = vector.shape_cast %325 : vector<1x1x8xf32> to vector<1x8xf32>
    %327 = vector.broadcast %326 : vector<1x8xf32> to vector<16x8xf32>
    %328 = arith.addf %324, %327 : vector<16x8xf32>
    %c6_228 = arith.constant 6 : index
    %c0_229 = arith.constant 0 : index
    %c0_230 = arith.constant 0 : index
    %329 = vector.load %arg10[%c6_228, %c0_229, %c0_230] : memref<12x32x8xf32, #tpu.memory_space<vmem>>, vector<1x32x8xf32>
    %330 = vector.shape_cast %329 : vector<1x32x8xf32> to vector<32x8xf32>
    %cst_231 = arith.constant dense<0.000000e+00> : vector<16x8xf32>
    %331 = tpu.matmul %234, %330, %cst_231 {dimension_numbers = #tpu.dot_dimension_numbers<[1], [0], [0], [1], [0, 0, 1, 1], [], []>} : vector<16x32xf32>, vector<32x8xf32>, vector<16x8xf32> -> vector<16x8xf32>
    %c6_232 = arith.constant 6 : index
    %c0_233 = arith.constant 0 : index
    %c0_234 = arith.constant 0 : index
    %332 = vector.load %arg14[%c6_232, %c0_233, %c0_234] : memref<12x1x8xf32, #tpu.memory_space<vmem>>, vector<1x1x8xf32>
    %333 = vector.shape_cast %332 : vector<1x1x8xf32> to vector<1x8xf32>
    %334 = vector.broadcast %333 : vector<1x8xf32> to vector<16x8xf32>
    %335 = arith.addf %331, %334 : vector<16x8xf32>
    "tpu.trace_start"() <{level = 10 : i32, message = "ld,sd->ls"}> : () -> ()
    %cst_235 = arith.constant dense<0.000000e+00> : vector<16x16xf32>
    %336 = tpu.matmul %321, %328, %cst_235 {dimension_numbers = #tpu.dot_dimension_numbers<[1], [1], [0], [0], [0, 0, 1, 0], [], []>} : vector<16x8xf32>, vector<16x8xf32>, vector<16x16xf32> -> vector<16x16xf32>
    "tpu.trace_stop"() : () -> ()
    %cst_236 = arith.constant 0.353553385 : f32
    %337 = vector.broadcast %cst_236 : f32 to vector<16x16xf32>
    %338 = arith.mulf %336, %337 : vector<16x16xf32>
    %339 = arith.addf %338, %36 : vector<16x16xf32>
    %cst_237 = arith.constant dense<0xFF800000> : vector<16xf32>
    %340 = vector.multi_reduction <maximumf>, %339, %cst_237 [1] : vector<16x16xf32> to vector<16xf32>
    %341 = vector.shape_cast %340 : vector<16xf32> to vector<16x1xf32>
    %342 = vector.broadcast %341 : vector<16x1xf32> to vector<16x16xf32>
    %343 = arith.subf %339, %342 : vector<16x16xf32>
    %344 = math.exp %343 : vector<16x16xf32>
    %cst_238 = arith.constant dense<0.000000e+00> : vector<16xf32>
    %345 = vector.multi_reduction <add>, %344, %cst_238 [1] : vector<16x16xf32> to vector<16xf32>
    %346 = vector.shape_cast %345 : vector<16xf32> to vector<16x1xf32>
    %347 = tpu.reciprocal %346 {approx = true} : vector<16x1xf32> -> vector<16x1xf32>
    %348 = vector.broadcast %347 : vector<16x1xf32> to vector<16x16xf32>
    %349 = arith.mulf %344, %348 : vector<16x16xf32>
    %cst_239 = arith.constant dense<0.000000e+00> : vector<16x8xf32>
    %350 = tpu.matmul %349, %335, %cst_239 {dimension_numbers = #tpu.dot_dimension_numbers<[1], [0], [0], [1], [0, 0, 1, 1], [], []>} : vector<16x16xf32>, vector<16x8xf32>, vector<16x8xf32> -> vector<16x8xf32>
    %c6_240 = arith.constant 6 : index
    %c0_241 = arith.constant 0 : index
    %c0_242 = arith.constant 0 : index
    %351 = vector.load %arg11[%c6_240, %c0_241, %c0_242] : memref<12x8x32xf32, #tpu.memory_space<vmem>>, vector<1x8x32xf32>
    %352 = vector.shape_cast %351 : vector<1x8x32xf32> to vector<8x32xf32>
    %cst_243 = arith.constant dense<0.000000e+00> : vector<16x32xf32>
    %353 = tpu.matmul %350, %352, %cst_243 {dimension_numbers = #tpu.dot_dimension_numbers<[1], [0], [0], [1], [0, 0, 1, 1], [], []>} : vector<16x8xf32>, vector<8x32xf32>, vector<16x32xf32> -> vector<16x32xf32>
    %354 = arith.addf %313, %353 : vector<16x32xf32>
    %355 = arith.addf %314, %349 : vector<16x16xf32>
    %c7 = arith.constant 7 : index
    %c0_244 = arith.constant 0 : index
    %c0_245 = arith.constant 0 : index
    %356 = vector.load %arg8[%c7, %c0_244, %c0_245] : memref<12x32x8xf32, #tpu.memory_space<vmem>>, vector<1x32x8xf32>
    %357 = vector.shape_cast %356 : vector<1x32x8xf32> to vector<32x8xf32>
    %cst_246 = arith.constant dense<0.000000e+00> : vector<16x8xf32>
    %358 = tpu.matmul %234, %357, %cst_246 {dimension_numbers = #tpu.dot_dimension_numbers<[1], [0], [0], [1], [0, 0, 1, 1], [], []>} : vector<16x32xf32>, vector<32x8xf32>, vector<16x8xf32> -> vector<16x8xf32>
    %c7_247 = arith.constant 7 : index
    %c0_248 = arith.constant 0 : index
    %c0_249 = arith.constant 0 : index
    %359 = vector.load %arg12[%c7_247, %c0_248, %c0_249] : memref<12x1x8xf32, #tpu.memory_space<vmem>>, vector<1x1x8xf32>
    %360 = vector.shape_cast %359 : vector<1x1x8xf32> to vector<1x8xf32>
    %361 = vector.broadcast %360 : vector<1x8xf32> to vector<16x8xf32>
    %362 = arith.addf %358, %361 : vector<16x8xf32>
    %c7_250 = arith.constant 7 : index
    %c0_251 = arith.constant 0 : index
    %c0_252 = arith.constant 0 : index
    %363 = vector.load %arg9[%c7_250, %c0_251, %c0_252] : memref<12x32x8xf32, #tpu.memory_space<vmem>>, vector<1x32x8xf32>
    %364 = vector.shape_cast %363 : vector<1x32x8xf32> to vector<32x8xf32>
    %cst_253 = arith.constant dense<0.000000e+00> : vector<16x8xf32>
    %365 = tpu.matmul %234, %364, %cst_253 {dimension_numbers = #tpu.dot_dimension_numbers<[1], [0], [0], [1], [0, 0, 1, 1], [], []>} : vector<16x32xf32>, vector<32x8xf32>, vector<16x8xf32> -> vector<16x8xf32>
    %c7_254 = arith.constant 7 : index
    %c0_255 = arith.constant 0 : index
    %c0_256 = arith.constant 0 : index
    %366 = vector.load %arg13[%c7_254, %c0_255, %c0_256] : memref<12x1x8xf32, #tpu.memory_space<vmem>>, vector<1x1x8xf32>
    %367 = vector.shape_cast %366 : vector<1x1x8xf32> to vector<1x8xf32>
    %368 = vector.broadcast %367 : vector<1x8xf32> to vector<16x8xf32>
    %369 = arith.addf %365, %368 : vector<16x8xf32>
    %c7_257 = arith.constant 7 : index
    %c0_258 = arith.constant 0 : index
    %c0_259 = arith.constant 0 : index
    %370 = vector.load %arg10[%c7_257, %c0_258, %c0_259] : memref<12x32x8xf32, #tpu.memory_space<vmem>>, vector<1x32x8xf32>
    %371 = vector.shape_cast %370 : vector<1x32x8xf32> to vector<32x8xf32>
    %cst_260 = arith.constant dense<0.000000e+00> : vector<16x8xf32>
    %372 = tpu.matmul %234, %371, %cst_260 {dimension_numbers = #tpu.dot_dimension_numbers<[1], [0], [0], [1], [0, 0, 1, 1], [], []>} : vector<16x32xf32>, vector<32x8xf32>, vector<16x8xf32> -> vector<16x8xf32>
    %c7_261 = arith.constant 7 : index
    %c0_262 = arith.constant 0 : index
    %c0_263 = arith.constant 0 : index
    %373 = vector.load %arg14[%c7_261, %c0_262, %c0_263] : memref<12x1x8xf32, #tpu.memory_space<vmem>>, vector<1x1x8xf32>
    %374 = vector.shape_cast %373 : vector<1x1x8xf32> to vector<1x8xf32>
    %375 = vector.broadcast %374 : vector<1x8xf32> to vector<16x8xf32>
    %376 = arith.addf %372, %375 : vector<16x8xf32>
    "tpu.trace_start"() <{level = 10 : i32, message = "ld,sd->ls"}> : () -> ()
    %cst_264 = arith.constant dense<0.000000e+00> : vector<16x16xf32>
    %377 = tpu.matmul %362, %369, %cst_264 {dimension_numbers = #tpu.dot_dimension_numbers<[1], [1], [0], [0], [0, 0, 1, 0], [], []>} : vector<16x8xf32>, vector<16x8xf32>, vector<16x16xf32> -> vector<16x16xf32>
    "tpu.trace_stop"() : () -> ()
    %cst_265 = arith.constant 0.353553385 : f32
    %378 = vector.broadcast %cst_265 : f32 to vector<16x16xf32>
    %379 = arith.mulf %377, %378 : vector<16x16xf32>
    %380 = arith.addf %379, %36 : vector<16x16xf32>
    %cst_266 = arith.constant dense<0xFF800000> : vector<16xf32>
    %381 = vector.multi_reduction <maximumf>, %380, %cst_266 [1] : vector<16x16xf32> to vector<16xf32>
    %382 = vector.shape_cast %381 : vector<16xf32> to vector<16x1xf32>
    %383 = vector.broadcast %382 : vector<16x1xf32> to vector<16x16xf32>
    %384 = arith.subf %380, %383 : vector<16x16xf32>
    %385 = math.exp %384 : vector<16x16xf32>
    %cst_267 = arith.constant dense<0.000000e+00> : vector<16xf32>
    %386 = vector.multi_reduction <add>, %385, %cst_267 [1] : vector<16x16xf32> to vector<16xf32>
    %387 = vector.shape_cast %386 : vector<16xf32> to vector<16x1xf32>
    %388 = tpu.reciprocal %387 {approx = true} : vector<16x1xf32> -> vector<16x1xf32>
    %389 = vector.broadcast %388 : vector<16x1xf32> to vector<16x16xf32>
    %390 = arith.mulf %385, %389 : vector<16x16xf32>
    %cst_268 = arith.constant dense<0.000000e+00> : vector<16x8xf32>
    %391 = tpu.matmul %390, %376, %cst_268 {dimension_numbers = #tpu.dot_dimension_numbers<[1], [0], [0], [1], [0, 0, 1, 1], [], []>} : vector<16x16xf32>, vector<16x8xf32>, vector<16x8xf32> -> vector<16x8xf32>
    %c7_269 = arith.constant 7 : index
    %c0_270 = arith.constant 0 : index
    %c0_271 = arith.constant 0 : index
    %392 = vector.load %arg11[%c7_269, %c0_270, %c0_271] : memref<12x8x32xf32, #tpu.memory_space<vmem>>, vector<1x8x32xf32>
    %393 = vector.shape_cast %392 : vector<1x8x32xf32> to vector<8x32xf32>
    %cst_272 = arith.constant dense<0.000000e+00> : vector<16x32xf32>
    %394 = tpu.matmul %391, %393, %cst_272 {dimension_numbers = #tpu.dot_dimension_numbers<[1], [0], [0], [1], [0, 0, 1, 1], [], []>} : vector<16x8xf32>, vector<8x32xf32>, vector<16x32xf32> -> vector<16x32xf32>
    %395 = arith.addf %354, %394 : vector<16x32xf32>
    %396 = arith.addf %355, %390 : vector<16x16xf32>
    %cst_273 = arith.constant 2.500000e-01 : f32
    %397 = vector.broadcast %cst_273 : f32 to vector<16x16xf32>
    %398 = arith.mulf %396, %397 : vector<16x16xf32>
    %c1_274 = arith.constant 1 : index
    %c0_275 = arith.constant 0 : index
    %c0_276 = arith.constant 0 : index
    %399 = vector.load %arg26[%c1_274, %c0_275, %c0_276] : memref<3x16x16xf32, #tpu.memory_space<vmem>>, vector<1x16x16xf32>
    %400 = vector.shape_cast %399 : vector<1x16x16xf32> to vector<16x16xf32>
    %401 = vector.shape_cast %398 : vector<16x16xf32> to vector<1x16x16xf32>
    tpu.vector_store %arg26[%c1_274, %c0_275, %c0_276], %401 {strides = array<i32>} : memref<3x16x16xf32, #tpu.memory_space<vmem>>, vector<1x16x16xf32>,
    %402 = arith.addf %234, %395 : vector<16x32xf32>
    %c1_277 = arith.constant 1 : index
    %c0_278 = arith.constant 0 : index
    %c0_279 = arith.constant 0 : index
    %403 = vector.load %arg15[%c1_277, %c0_278, %c0_279] : memref<3x1x32xf32, #tpu.memory_space<vmem>>, vector<1x1x32xf32>
    %404 = vector.shape_cast %403 : vector<1x1x32xf32> to vector<1x32xf32>
    %405 = vector.broadcast %404 : vector<1x32xf32> to vector<16x32xf32>
    %406 = arith.addf %402, %405 : vector<16x32xf32>
    %c1_280 = arith.constant 1 : index
    %c0_281 = arith.constant 0 : index
    %c0_282 = arith.constant 0 : index
    %407 = vector.load %arg16[%c1_280, %c0_281, %c0_282] : memref<3x1x32xf32, #tpu.memory_space<vmem>>, vector<1x1x32xf32>
    %408 = vector.shape_cast %407 : vector<1x1x32xf32> to vector<1x32xf32>
    %c1_283 = arith.constant 1 : index
    %c0_284 = arith.constant 0 : index
    %c0_285 = arith.constant 0 : index
    %409 = vector.load %arg17[%c1_283, %c0_284, %c0_285] : memref<3x1x32xf32, #tpu.memory_space<vmem>>, vector<1x1x32xf32>
    %410 = vector.shape_cast %409 : vector<1x1x32xf32> to vector<1x32xf32>
    %cst_286 = arith.constant dense<0.000000e+00> : vector<16xf32>
    %411 = vector.multi_reduction <add>, %406, %cst_286 [1] : vector<16x32xf32> to vector<16xf32>
    %412 = vector.shape_cast %411 : vector<16xf32> to vector<16x1xf32>
    %cst_287 = arith.constant 3.200000e+01 : f32
    %413 = vector.broadcast %cst_287 : f32 to vector<16x1xf32>
    %414 = arith.divf %412, %413 : vector<16x1xf32>
    %415 = vector.broadcast %414 : vector<16x1xf32> to vector<16x32xf32>
    %416 = arith.subf %406, %415 : vector<16x32xf32>
    %417 = arith.mulf %416, %416 : vector<16x32xf32>
    %cst_288 = arith.constant dense<0.000000e+00> : vector<16xf32>
    %418 = vector.multi_reduction <add>, %417, %cst_288 [1] : vector<16x32xf32> to vector<16xf32>
    %419 = vector.shape_cast %418 : vector<16xf32> to vector<16x1xf32>
    %cst_289 = arith.constant 3.200000e+01 : f32
    %420 = vector.broadcast %cst_289 : f32 to vector<16x1xf32>
    %421 = arith.divf %419, %420 : vector<16x1xf32>
    %422 = vector.broadcast %414 : vector<16x1xf32> to vector<16x32xf32>
    %423 = arith.subf %406, %422 : vector<16x32xf32>
    %cst_290 = arith.constant 9.99999974E-6 : f32
    %424 = vector.broadcast %cst_290 : f32 to vector<16x1xf32>
    %425 = arith.addf %421, %424 : vector<16x1xf32>
    %426 = math.rsqrt %425 : vector<16x1xf32>
    %427 = vector.broadcast %426 : vector<16x1xf32> to vector<16x32xf32>
    %428 = arith.mulf %423, %427 : vector<16x32xf32>
    %429 = vector.broadcast %408 : vector<1x32xf32> to vector<16x32xf32>
    %430 = arith.mulf %428, %429 : vector<16x32xf32>
    %431 = vector.broadcast %410 : vector<1x32xf32> to vector<16x32xf32>
    %432 = arith.addf %430, %431 : vector<16x32xf32>
    %c8 = arith.constant 8 : index
    %c0_291 = arith.constant 0 : index
    %c0_292 = arith.constant 0 : index
    %433 = vector.load %arg8[%c8, %c0_291, %c0_292] : memref<12x32x8xf32, #tpu.memory_space<vmem>>, vector<1x32x8xf32>
    %434 = vector.shape_cast %433 : vector<1x32x8xf32> to vector<32x8xf32>
    %cst_293 = arith.constant dense<0.000000e+00> : vector<16x8xf32>
    %435 = tpu.matmul %432, %434, %cst_293 {dimension_numbers = #tpu.dot_dimension_numbers<[1], [0], [0], [1], [0, 0, 1, 1], [], []>} : vector<16x32xf32>, vector<32x8xf32>, vector<16x8xf32> -> vector<16x8xf32>
    %c8_294 = arith.constant 8 : index
    %c0_295 = arith.constant 0 : index
    %c0_296 = arith.constant 0 : index
    %436 = vector.load %arg12[%c8_294, %c0_295, %c0_296] : memref<12x1x8xf32, #tpu.memory_space<vmem>>, vector<1x1x8xf32>
    %437 = vector.shape_cast %436 : vector<1x1x8xf32> to vector<1x8xf32>
    %438 = vector.broadcast %437 : vector<1x8xf32> to vector<16x8xf32>
    %439 = arith.addf %435, %438 : vector<16x8xf32>
    %c8_297 = arith.constant 8 : index
    %c0_298 = arith.constant 0 : index
    %c0_299 = arith.constant 0 : index
    %440 = vector.load %arg9[%c8_297, %c0_298, %c0_299] : memref<12x32x8xf32, #tpu.memory_space<vmem>>, vector<1x32x8xf32>
    %441 = vector.shape_cast %440 : vector<1x32x8xf32> to vector<32x8xf32>
    %cst_300 = arith.constant dense<0.000000e+00> : vector<16x8xf32>
    %442 = tpu.matmul %432, %441, %cst_300 {dimension_numbers = #tpu.dot_dimension_numbers<[1], [0], [0], [1], [0, 0, 1, 1], [], []>} : vector<16x32xf32>, vector<32x8xf32>, vector<16x8xf32> -> vector<16x8xf32>
    %c8_301 = arith.constant 8 : index
    %c0_302 = arith.constant 0 : index
    %c0_303 = arith.constant 0 : index
    %443 = vector.load %arg13[%c8_301, %c0_302, %c0_303] : memref<12x1x8xf32, #tpu.memory_space<vmem>>, vector<1x1x8xf32>
    %444 = vector.shape_cast %443 : vector<1x1x8xf32> to vector<1x8xf32>
    %445 = vector.broadcast %444 : vector<1x8xf32> to vector<16x8xf32>
    %446 = arith.addf %442, %445 : vector<16x8xf32>
    %c8_304 = arith.constant 8 : index
    %c0_305 = arith.constant 0 : index
    %c0_306 = arith.constant 0 : index
    %447 = vector.load %arg10[%c8_304, %c0_305, %c0_306] : memref<12x32x8xf32, #tpu.memory_space<vmem>>, vector<1x32x8xf32>
    %448 = vector.shape_cast %447 : vector<1x32x8xf32> to vector<32x8xf32>
    %cst_307 = arith.constant dense<0.000000e+00> : vector<16x8xf32>
    %449 = tpu.matmul %432, %448, %cst_307 {dimension_numbers = #tpu.dot_dimension_numbers<[1], [0], [0], [1], [0, 0, 1, 1], [], []>} : vector<16x32xf32>, vector<32x8xf32>, vector<16x8xf32> -> vector<16x8xf32>
    %c8_308 = arith.constant 8 : index
    %c0_309 = arith.constant 0 : index
    %c0_310 = arith.constant 0 : index
    %450 = vector.load %arg14[%c8_308, %c0_309, %c0_310] : memref<12x1x8xf32, #tpu.memory_space<vmem>>, vector<1x1x8xf32>
    %451 = vector.shape_cast %450 : vector<1x1x8xf32> to vector<1x8xf32>
    %452 = vector.broadcast %451 : vector<1x8xf32> to vector<16x8xf32>
    %453 = arith.addf %449, %452 : vector<16x8xf32>
    "tpu.trace_start"() <{level = 10 : i32, message = "ld,sd->ls"}> : () -> ()
    %cst_311 = arith.constant dense<0.000000e+00> : vector<16x16xf32>
    %454 = tpu.matmul %439, %446, %cst_311 {dimension_numbers = #tpu.dot_dimension_numbers<[1], [1], [0], [0], [0, 0, 1, 0], [], []>} : vector<16x8xf32>, vector<16x8xf32>, vector<16x16xf32> -> vector<16x16xf32>
    "tpu.trace_stop"() : () -> ()
    %cst_312 = arith.constant 0.353553385 : f32
    %455 = vector.broadcast %cst_312 : f32 to vector<16x16xf32>
    %456 = arith.mulf %454, %455 : vector<16x16xf32>
    %457 = arith.addf %456, %36 : vector<16x16xf32>
    %cst_313 = arith.constant dense<0xFF800000> : vector<16xf32>
    %458 = vector.multi_reduction <maximumf>, %457, %cst_313 [1] : vector<16x16xf32> to vector<16xf32>
    %459 = vector.shape_cast %458 : vector<16xf32> to vector<16x1xf32>
    %460 = vector.broadcast %459 : vector<16x1xf32> to vector<16x16xf32>
    %461 = arith.subf %457, %460 : vector<16x16xf32>
    %462 = math.exp %461 : vector<16x16xf32>
    %cst_314 = arith.constant dense<0.000000e+00> : vector<16xf32>
    %463 = vector.multi_reduction <add>, %462, %cst_314 [1] : vector<16x16xf32> to vector<16xf32>
    %464 = vector.shape_cast %463 : vector<16xf32> to vector<16x1xf32>
    %465 = tpu.reciprocal %464 {approx = true} : vector<16x1xf32> -> vector<16x1xf32>
    %466 = vector.broadcast %465 : vector<16x1xf32> to vector<16x16xf32>
    %467 = arith.mulf %462, %466 : vector<16x16xf32>
    %cst_315 = arith.constant dense<0.000000e+00> : vector<16x8xf32>
    %468 = tpu.matmul %467, %453, %cst_315 {dimension_numbers = #tpu.dot_dimension_numbers<[1], [0], [0], [1], [0, 0, 1, 1], [], []>} : vector<16x16xf32>, vector<16x8xf32>, vector<16x8xf32> -> vector<16x8xf32>
    %c8_316 = arith.constant 8 : index
    %c0_317 = arith.constant 0 : index
    %c0_318 = arith.constant 0 : index
    %469 = vector.load %arg11[%c8_316, %c0_317, %c0_318] : memref<12x8x32xf32, #tpu.memory_space<vmem>>, vector<1x8x32xf32>
    %470 = vector.shape_cast %469 : vector<1x8x32xf32> to vector<8x32xf32>
    %cst_319 = arith.constant dense<0.000000e+00> : vector<16x32xf32>
    %471 = tpu.matmul %468, %470, %cst_319 {dimension_numbers = #tpu.dot_dimension_numbers<[1], [0], [0], [1], [0, 0, 1, 1], [], []>} : vector<16x8xf32>, vector<8x32xf32>, vector<16x32xf32> -> vector<16x32xf32>
    %c9 = arith.constant 9 : index
    %c0_320 = arith.constant 0 : index
    %c0_321 = arith.constant 0 : index
    %472 = vector.load %arg8[%c9, %c0_320, %c0_321] : memref<12x32x8xf32, #tpu.memory_space<vmem>>, vector<1x32x8xf32>
    %473 = vector.shape_cast %472 : vector<1x32x8xf32> to vector<32x8xf32>
    %cst_322 = arith.constant dense<0.000000e+00> : vector<16x8xf32>
    %474 = tpu.matmul %432, %473, %cst_322 {dimension_numbers = #tpu.dot_dimension_numbers<[1], [0], [0], [1], [0, 0, 1, 1], [], []>} : vector<16x32xf32>, vector<32x8xf32>, vector<16x8xf32> -> vector<16x8xf32>
    %c9_323 = arith.constant 9 : index
    %c0_324 = arith.constant 0 : index
    %c0_325 = arith.constant 0 : index
    %475 = vector.load %arg12[%c9_323, %c0_324, %c0_325] : memref<12x1x8xf32, #tpu.memory_space<vmem>>, vector<1x1x8xf32>
    %476 = vector.shape_cast %475 : vector<1x1x8xf32> to vector<1x8xf32>
    %477 = vector.broadcast %476 : vector<1x8xf32> to vector<16x8xf32>
    %478 = arith.addf %474, %477 : vector<16x8xf32>
    %c9_326 = arith.constant 9 : index
    %c0_327 = arith.constant 0 : index
    %c0_328 = arith.constant 0 : index
    %479 = vector.load %arg9[%c9_326, %c0_327, %c0_328] : memref<12x32x8xf32, #tpu.memory_space<vmem>>, vector<1x32x8xf32>
    %480 = vector.shape_cast %479 : vector<1x32x8xf32> to vector<32x8xf32>
    %cst_329 = arith.constant dense<0.000000e+00> : vector<16x8xf32>
    %481 = tpu.matmul %432, %480, %cst_329 {dimension_numbers = #tpu.dot_dimension_numbers<[1], [0], [0], [1], [0, 0, 1, 1], [], []>} : vector<16x32xf32>, vector<32x8xf32>, vector<16x8xf32> -> vector<16x8xf32>
    %c9_330 = arith.constant 9 : index
    %c0_331 = arith.constant 0 : index
    %c0_332 = arith.constant 0 : index
    %482 = vector.load %arg13[%c9_330, %c0_331, %c0_332] : memref<12x1x8xf32, #tpu.memory_space<vmem>>, vector<1x1x8xf32>
    %483 = vector.shape_cast %482 : vector<1x1x8xf32> to vector<1x8xf32>
    %484 = vector.broadcast %483 : vector<1x8xf32> to vector<16x8xf32>
    %485 = arith.addf %481, %484 : vector<16x8xf32>
    %c9_333 = arith.constant 9 : index
    %c0_334 = arith.constant 0 : index
    %c0_335 = arith.constant 0 : index
    %486 = vector.load %arg10[%c9_333, %c0_334, %c0_335] : memref<12x32x8xf32, #tpu.memory_space<vmem>>, vector<1x32x8xf32>
    %487 = vector.shape_cast %486 : vector<1x32x8xf32> to vector<32x8xf32>
    %cst_336 = arith.constant dense<0.000000e+00> : vector<16x8xf32>
    %488 = tpu.matmul %432, %487, %cst_336 {dimension_numbers = #tpu.dot_dimension_numbers<[1], [0], [0], [1], [0, 0, 1, 1], [], []>} : vector<16x32xf32>, vector<32x8xf32>, vector<16x8xf32> -> vector<16x8xf32>
    %c9_337 = arith.constant 9 : index
    %c0_338 = arith.constant 0 : index
    %c0_339 = arith.constant 0 : index
    %489 = vector.load %arg14[%c9_337, %c0_338, %c0_339] : memref<12x1x8xf32, #tpu.memory_space<vmem>>, vector<1x1x8xf32>
    %490 = vector.shape_cast %489 : vector<1x1x8xf32> to vector<1x8xf32>
    %491 = vector.broadcast %490 : vector<1x8xf32> to vector<16x8xf32>
    %492 = arith.addf %488, %491 : vector<16x8xf32>
    "tpu.trace_start"() <{level = 10 : i32, message = "ld,sd->ls"}> : () -> ()
    %cst_340 = arith.constant dense<0.000000e+00> : vector<16x16xf32>
    %493 = tpu.matmul %478, %485, %cst_340 {dimension_numbers = #tpu.dot_dimension_numbers<[1], [1], [0], [0], [0, 0, 1, 0], [], []>} : vector<16x8xf32>, vector<16x8xf32>, vector<16x16xf32> -> vector<16x16xf32>
    "tpu.trace_stop"() : () -> ()
    %cst_341 = arith.constant 0.353553385 : f32
    %494 = vector.broadcast %cst_341 : f32 to vector<16x16xf32>
    %495 = arith.mulf %493, %494 : vector<16x16xf32>
    %496 = arith.addf %495, %36 : vector<16x16xf32>
    %cst_342 = arith.constant dense<0xFF800000> : vector<16xf32>
    %497 = vector.multi_reduction <maximumf>, %496, %cst_342 [1] : vector<16x16xf32> to vector<16xf32>
    %498 = vector.shape_cast %497 : vector<16xf32> to vector<16x1xf32>
    %499 = vector.broadcast %498 : vector<16x1xf32> to vector<16x16xf32>
    %500 = arith.subf %496, %499 : vector<16x16xf32>
    %501 = math.exp %500 : vector<16x16xf32>
    %cst_343 = arith.constant dense<0.000000e+00> : vector<16xf32>
    %502 = vector.multi_reduction <add>, %501, %cst_343 [1] : vector<16x16xf32> to vector<16xf32>
    %503 = vector.shape_cast %502 : vector<16xf32> to vector<16x1xf32>
    %504 = tpu.reciprocal %503 {approx = true} : vector<16x1xf32> -> vector<16x1xf32>
    %505 = vector.broadcast %504 : vector<16x1xf32> to vector<16x16xf32>
    %506 = arith.mulf %501, %505 : vector<16x16xf32>
    %cst_344 = arith.constant dense<0.000000e+00> : vector<16x8xf32>
    %507 = tpu.matmul %506, %492, %cst_344 {dimension_numbers = #tpu.dot_dimension_numbers<[1], [0], [0], [1], [0, 0, 1, 1], [], []>} : vector<16x16xf32>, vector<16x8xf32>, vector<16x8xf32> -> vector<16x8xf32>
    %c9_345 = arith.constant 9 : index
    %c0_346 = arith.constant 0 : index
    %c0_347 = arith.constant 0 : index
    %508 = vector.load %arg11[%c9_345, %c0_346, %c0_347] : memref<12x8x32xf32, #tpu.memory_space<vmem>>, vector<1x8x32xf32>
    %509 = vector.shape_cast %508 : vector<1x8x32xf32> to vector<8x32xf32>
    %cst_348 = arith.constant dense<0.000000e+00> : vector<16x32xf32>
    %510 = tpu.matmul %507, %509, %cst_348 {dimension_numbers = #tpu.dot_dimension_numbers<[1], [0], [0], [1], [0, 0, 1, 1], [], []>} : vector<16x8xf32>, vector<8x32xf32>, vector<16x32xf32> -> vector<16x32xf32>
    %511 = arith.addf %471, %510 : vector<16x32xf32>
    %512 = arith.addf %467, %506 : vector<16x16xf32>
    %c10 = arith.constant 10 : index
    %c0_349 = arith.constant 0 : index
    %c0_350 = arith.constant 0 : index
    %513 = vector.load %arg8[%c10, %c0_349, %c0_350] : memref<12x32x8xf32, #tpu.memory_space<vmem>>, vector<1x32x8xf32>
    %514 = vector.shape_cast %513 : vector<1x32x8xf32> to vector<32x8xf32>
    %cst_351 = arith.constant dense<0.000000e+00> : vector<16x8xf32>
    %515 = tpu.matmul %432, %514, %cst_351 {dimension_numbers = #tpu.dot_dimension_numbers<[1], [0], [0], [1], [0, 0, 1, 1], [], []>} : vector<16x32xf32>, vector<32x8xf32>, vector<16x8xf32> -> vector<16x8xf32>
    %c10_352 = arith.constant 10 : index
    %c0_353 = arith.constant 0 : index
    %c0_354 = arith.constant 0 : index
    %516 = vector.load %arg12[%c10_352, %c0_353, %c0_354] : memref<12x1x8xf32, #tpu.memory_space<vmem>>, vector<1x1x8xf32>
    %517 = vector.shape_cast %516 : vector<1x1x8xf32> to vector<1x8xf32>
    %518 = vector.broadcast %517 : vector<1x8xf32> to vector<16x8xf32>
    %519 = arith.addf %515, %518 : vector<16x8xf32>
    %c10_355 = arith.constant 10 : index
    %c0_356 = arith.constant 0 : index
    %c0_357 = arith.constant 0 : index
    %520 = vector.load %arg9[%c10_355, %c0_356, %c0_357] : memref<12x32x8xf32, #tpu.memory_space<vmem>>, vector<1x32x8xf32>
    %521 = vector.shape_cast %520 : vector<1x32x8xf32> to vector<32x8xf32>
    %cst_358 = arith.constant dense<0.000000e+00> : vector<16x8xf32>
    %522 = tpu.matmul %432, %521, %cst_358 {dimension_numbers = #tpu.dot_dimension_numbers<[1], [0], [0], [1], [0, 0, 1, 1], [], []>} : vector<16x32xf32>, vector<32x8xf32>, vector<16x8xf32> -> vector<16x8xf32>
    %c10_359 = arith.constant 10 : index
    %c0_360 = arith.constant 0 : index
    %c0_361 = arith.constant 0 : index
    %523 = vector.load %arg13[%c10_359, %c0_360, %c0_361] : memref<12x1x8xf32, #tpu.memory_space<vmem>>, vector<1x1x8xf32>
    %524 = vector.shape_cast %523 : vector<1x1x8xf32> to vector<1x8xf32>
    %525 = vector.broadcast %524 : vector<1x8xf32> to vector<16x8xf32>
    %526 = arith.addf %522, %525 : vector<16x8xf32>
    %c10_362 = arith.constant 10 : index
    %c0_363 = arith.constant 0 : index
    %c0_364 = arith.constant 0 : index
    %527 = vector.load %arg10[%c10_362, %c0_363, %c0_364] : memref<12x32x8xf32, #tpu.memory_space<vmem>>, vector<1x32x8xf32>
    %528 = vector.shape_cast %527 : vector<1x32x8xf32> to vector<32x8xf32>
    %cst_365 = arith.constant dense<0.000000e+00> : vector<16x8xf32>
    %529 = tpu.matmul %432, %528, %cst_365 {dimension_numbers = #tpu.dot_dimension_numbers<[1], [0], [0], [1], [0, 0, 1, 1], [], []>} : vector<16x32xf32>, vector<32x8xf32>, vector<16x8xf32> -> vector<16x8xf32>
    %c10_366 = arith.constant 10 : index
    %c0_367 = arith.constant 0 : index
    %c0_368 = arith.constant 0 : index
    %530 = vector.load %arg14[%c10_366, %c0_367, %c0_368] : memref<12x1x8xf32, #tpu.memory_space<vmem>>, vector<1x1x8xf32>
    %531 = vector.shape_cast %530 : vector<1x1x8xf32> to vector<1x8xf32>
    %532 = vector.broadcast %531 : vector<1x8xf32> to vector<16x8xf32>
    %533 = arith.addf %529, %532 : vector<16x8xf32>
    "tpu.trace_start"() <{level = 10 : i32, message = "ld,sd->ls"}> : () -> ()
    %cst_369 = arith.constant dense<0.000000e+00> : vector<16x16xf32>
    %534 = tpu.matmul %519, %526, %cst_369 {dimension_numbers = #tpu.dot_dimension_numbers<[1], [1], [0], [0], [0, 0, 1, 0], [], []>} : vector<16x8xf32>, vector<16x8xf32>, vector<16x16xf32> -> vector<16x16xf32>
    "tpu.trace_stop"() : () -> ()
    %cst_370 = arith.constant 0.353553385 : f32
    %535 = vector.broadcast %cst_370 : f32 to vector<16x16xf32>
    %536 = arith.mulf %534, %535 : vector<16x16xf32>
    %537 = arith.addf %536, %36 : vector<16x16xf32>
    %cst_371 = arith.constant dense<0xFF800000> : vector<16xf32>
    %538 = vector.multi_reduction <maximumf>, %537, %cst_371 [1] : vector<16x16xf32> to vector<16xf32>
    %539 = vector.shape_cast %538 : vector<16xf32> to vector<16x1xf32>
    %540 = vector.broadcast %539 : vector<16x1xf32> to vector<16x16xf32>
    %541 = arith.subf %537, %540 : vector<16x16xf32>
    %542 = math.exp %541 : vector<16x16xf32>
    %cst_372 = arith.constant dense<0.000000e+00> : vector<16xf32>
    %543 = vector.multi_reduction <add>, %542, %cst_372 [1] : vector<16x16xf32> to vector<16xf32>
    %544 = vector.shape_cast %543 : vector<16xf32> to vector<16x1xf32>
    %545 = tpu.reciprocal %544 {approx = true} : vector<16x1xf32> -> vector<16x1xf32>
    %546 = vector.broadcast %545 : vector<16x1xf32> to vector<16x16xf32>
    %547 = arith.mulf %542, %546 : vector<16x16xf32>
    %cst_373 = arith.constant dense<0.000000e+00> : vector<16x8xf32>
    %548 = tpu.matmul %547, %533, %cst_373 {dimension_numbers = #tpu.dot_dimension_numbers<[1], [0], [0], [1], [0, 0, 1, 1], [], []>} : vector<16x16xf32>, vector<16x8xf32>, vector<16x8xf32> -> vector<16x8xf32>
    %c10_374 = arith.constant 10 : index
    %c0_375 = arith.constant 0 : index
    %c0_376 = arith.constant 0 : index
    %549 = vector.load %arg11[%c10_374, %c0_375, %c0_376] : memref<12x8x32xf32, #tpu.memory_space<vmem>>, vector<1x8x32xf32>
    %550 = vector.shape_cast %549 : vector<1x8x32xf32> to vector<8x32xf32>
    %cst_377 = arith.constant dense<0.000000e+00> : vector<16x32xf32>
    %551 = tpu.matmul %548, %550, %cst_377 {dimension_numbers = #tpu.dot_dimension_numbers<[1], [0], [0], [1], [0, 0, 1, 1], [], []>} : vector<16x8xf32>, vector<8x32xf32>, vector<16x32xf32> -> vector<16x32xf32>
    %552 = arith.addf %511, %551 : vector<16x32xf32>
    %553 = arith.addf %512, %547 : vector<16x16xf32>
    %c11 = arith.constant 11 : index
    %c0_378 = arith.constant 0 : index
    %c0_379 = arith.constant 0 : index
    %554 = vector.load %arg8[%c11, %c0_378, %c0_379] : memref<12x32x8xf32, #tpu.memory_space<vmem>>, vector<1x32x8xf32>
    %555 = vector.shape_cast %554 : vector<1x32x8xf32> to vector<32x8xf32>
    %cst_380 = arith.constant dense<0.000000e+00> : vector<16x8xf32>
    %556 = tpu.matmul %432, %555, %cst_380 {dimension_numbers = #tpu.dot_dimension_numbers<[1], [0], [0], [1], [0, 0, 1, 1], [], []>} : vector<16x32xf32>, vector<32x8xf32>, vector<16x8xf32> -> vector<16x8xf32>
    %c11_381 = arith.constant 11 : index
    %c0_382 = arith.constant 0 : index
    %c0_383 = arith.constant 0 : index
    %557 = vector.load %arg12[%c11_381, %c0_382, %c0_383] : memref<12x1x8xf32, #tpu.memory_space<vmem>>, vector<1x1x8xf32>
    %558 = vector.shape_cast %557 : vector<1x1x8xf32> to vector<1x8xf32>
    %559 = vector.broadcast %558 : vector<1x8xf32> to vector<16x8xf32>
    %560 = arith.addf %556, %559 : vector<16x8xf32>
    %c11_384 = arith.constant 11 : index
    %c0_385 = arith.constant 0 : index
    %c0_386 = arith.constant 0 : index
    %561 = vector.load %arg9[%c11_384, %c0_385, %c0_386] : memref<12x32x8xf32, #tpu.memory_space<vmem>>, vector<1x32x8xf32>
    %562 = vector.shape_cast %561 : vector<1x32x8xf32> to vector<32x8xf32>
    %cst_387 = arith.constant dense<0.000000e+00> : vector<16x8xf32>
    %563 = tpu.matmul %432, %562, %cst_387 {dimension_numbers = #tpu.dot_dimension_numbers<[1], [0], [0], [1], [0, 0, 1, 1], [], []>} : vector<16x32xf32>, vector<32x8xf32>, vector<16x8xf32> -> vector<16x8xf32>
    %c11_388 = arith.constant 11 : index
    %c0_389 = arith.constant 0 : index
    %c0_390 = arith.constant 0 : index
    %564 = vector.load %arg13[%c11_388, %c0_389, %c0_390] : memref<12x1x8xf32, #tpu.memory_space<vmem>>, vector<1x1x8xf32>
    %565 = vector.shape_cast %564 : vector<1x1x8xf32> to vector<1x8xf32>
    %566 = vector.broadcast %565 : vector<1x8xf32> to vector<16x8xf32>
    %567 = arith.addf %563, %566 : vector<16x8xf32>
    %c11_391 = arith.constant 11 : index
    %c0_392 = arith.constant 0 : index
    %c0_393 = arith.constant 0 : index
    %568 = vector.load %arg10[%c11_391, %c0_392, %c0_393] : memref<12x32x8xf32, #tpu.memory_space<vmem>>, vector<1x32x8xf32>
    %569 = vector.shape_cast %568 : vector<1x32x8xf32> to vector<32x8xf32>
    %cst_394 = arith.constant dense<0.000000e+00> : vector<16x8xf32>
    %570 = tpu.matmul %432, %569, %cst_394 {dimension_numbers = #tpu.dot_dimension_numbers<[1], [0], [0], [1], [0, 0, 1, 1], [], []>} : vector<16x32xf32>, vector<32x8xf32>, vector<16x8xf32> -> vector<16x8xf32>
    %c11_395 = arith.constant 11 : index
    %c0_396 = arith.constant 0 : index
    %c0_397 = arith.constant 0 : index
    %571 = vector.load %arg14[%c11_395, %c0_396, %c0_397] : memref<12x1x8xf32, #tpu.memory_space<vmem>>, vector<1x1x8xf32>
    %572 = vector.shape_cast %571 : vector<1x1x8xf32> to vector<1x8xf32>
    %573 = vector.broadcast %572 : vector<1x8xf32> to vector<16x8xf32>
    %574 = arith.addf %570, %573 : vector<16x8xf32>
    "tpu.trace_start"() <{level = 10 : i32, message = "ld,sd->ls"}> : () -> ()
    %cst_398 = arith.constant dense<0.000000e+00> : vector<16x16xf32>
    %575 = tpu.matmul %560, %567, %cst_398 {dimension_numbers = #tpu.dot_dimension_numbers<[1], [1], [0], [0], [0, 0, 1, 0], [], []>} : vector<16x8xf32>, vector<16x8xf32>, vector<16x16xf32> -> vector<16x16xf32>
    "tpu.trace_stop"() : () -> ()
    %cst_399 = arith.constant 0.353553385 : f32
    %576 = vector.broadcast %cst_399 : f32 to vector<16x16xf32>
    %577 = arith.mulf %575, %576 : vector<16x16xf32>
    %578 = arith.addf %577, %36 : vector<16x16xf32>
    %cst_400 = arith.constant dense<0xFF800000> : vector<16xf32>
    %579 = vector.multi_reduction <maximumf>, %578, %cst_400 [1] : vector<16x16xf32> to vector<16xf32>
    %580 = vector.shape_cast %579 : vector<16xf32> to vector<16x1xf32>
    %581 = vector.broadcast %580 : vector<16x1xf32> to vector<16x16xf32>
    %582 = arith.subf %578, %581 : vector<16x16xf32>
    %583 = math.exp %582 : vector<16x16xf32>
    %cst_401 = arith.constant dense<0.000000e+00> : vector<16xf32>
    %584 = vector.multi_reduction <add>, %583, %cst_401 [1] : vector<16x16xf32> to vector<16xf32>
    %585 = vector.shape_cast %584 : vector<16xf32> to vector<16x1xf32>
    %586 = tpu.reciprocal %585 {approx = true} : vector<16x1xf32> -> vector<16x1xf32>
    %587 = vector.broadcast %586 : vector<16x1xf32> to vector<16x16xf32>
    %588 = arith.mulf %583, %587 : vector<16x16xf32>
    %cst_402 = arith.constant dense<0.000000e+00> : vector<16x8xf32>
    %589 = tpu.matmul %588, %574, %cst_402 {dimension_numbers = #tpu.dot_dimension_numbers<[1], [0], [0], [1], [0, 0, 1, 1], [], []>} : vector<16x16xf32>, vector<16x8xf32>, vector<16x8xf32> -> vector<16x8xf32>
    %c11_403 = arith.constant 11 : index
    %c0_404 = arith.constant 0 : index
    %c0_405 = arith.constant 0 : index
    %590 = vector.load %arg11[%c11_403, %c0_404, %c0_405] : memref<12x8x32xf32, #tpu.memory_space<vmem>>, vector<1x8x32xf32>
    %591 = vector.shape_cast %590 : vector<1x8x32xf32> to vector<8x32xf32>
    %cst_406 = arith.constant dense<0.000000e+00> : vector<16x32xf32>
    %592 = tpu.matmul %589, %591, %cst_406 {dimension_numbers = #tpu.dot_dimension_numbers<[1], [0], [0], [1], [0, 0, 1, 1], [], []>} : vector<16x8xf32>, vector<8x32xf32>, vector<16x32xf32> -> vector<16x32xf32>
    %593 = arith.addf %552, %592 : vector<16x32xf32>
    %594 = arith.addf %553, %588 : vector<16x16xf32>
    %cst_407 = arith.constant 2.500000e-01 : f32
    %595 = vector.broadcast %cst_407 : f32 to vector<16x16xf32>
    %596 = arith.mulf %594, %595 : vector<16x16xf32>
    %c2_408 = arith.constant 2 : index
    %c0_409 = arith.constant 0 : index
    %c0_410 = arith.constant 0 : index
    %597 = vector.load %arg26[%c2_408, %c0_409, %c0_410] : memref<3x16x16xf32, #tpu.memory_space<vmem>>, vector<1x16x16xf32>
    %598 = vector.shape_cast %597 : vector<1x16x16xf32> to vector<16x16xf32>
    %599 = vector.shape_cast %596 : vector<16x16xf32> to vector<1x16x16xf32>
    tpu.vector_store %arg26[%c2_408, %c0_409, %c0_410], %599 {strides = array<i32>} : memref<3x16x16xf32, #tpu.memory_space<vmem>>, vector<1x16x16xf32>,
    %600 = arith.addf %432, %593 : vector<16x32xf32>
    %c2_411 = arith.constant 2 : index
    %c0_412 = arith.constant 0 : index
    %c0_413 = arith.constant 0 : index
    %601 = vector.load %arg15[%c2_411, %c0_412, %c0_413] : memref<3x1x32xf32, #tpu.memory_space<vmem>>, vector<1x1x32xf32>
    %602 = vector.shape_cast %601 : vector<1x1x32xf32> to vector<1x32xf32>
    %603 = vector.broadcast %602 : vector<1x32xf32> to vector<16x32xf32>
    %604 = arith.addf %600, %603 : vector<16x32xf32>
    %c2_414 = arith.constant 2 : index
    %c0_415 = arith.constant 0 : index
    %c0_416 = arith.constant 0 : index
    %605 = vector.load %arg16[%c2_414, %c0_415, %c0_416] : memref<3x1x32xf32, #tpu.memory_space<vmem>>, vector<1x1x32xf32>
    %606 = vector.shape_cast %605 : vector<1x1x32xf32> to vector<1x32xf32>
    %c2_417 = arith.constant 2 : index
    %c0_418 = arith.constant 0 : index
    %c0_419 = arith.constant 0 : index
    %607 = vector.load %arg17[%c2_417, %c0_418, %c0_419] : memref<3x1x32xf32, #tpu.memory_space<vmem>>, vector<1x1x32xf32>
    %608 = vector.shape_cast %607 : vector<1x1x32xf32> to vector<1x32xf32>
    %cst_420 = arith.constant dense<0.000000e+00> : vector<16xf32>
    %609 = vector.multi_reduction <add>, %604, %cst_420 [1] : vector<16x32xf32> to vector<16xf32>
    %610 = vector.shape_cast %609 : vector<16xf32> to vector<16x1xf32>
    %cst_421 = arith.constant 3.200000e+01 : f32
    %611 = vector.broadcast %cst_421 : f32 to vector<16x1xf32>
    %612 = arith.divf %610, %611 : vector<16x1xf32>
    %613 = vector.broadcast %612 : vector<16x1xf32> to vector<16x32xf32>
    %614 = arith.subf %604, %613 : vector<16x32xf32>
    %615 = arith.mulf %614, %614 : vector<16x32xf32>
    %cst_422 = arith.constant dense<0.000000e+00> : vector<16xf32>
    %616 = vector.multi_reduction <add>, %615, %cst_422 [1] : vector<16x32xf32> to vector<16xf32>
    %617 = vector.shape_cast %616 : vector<16xf32> to vector<16x1xf32>
    %cst_423 = arith.constant 3.200000e+01 : f32
    %618 = vector.broadcast %cst_423 : f32 to vector<16x1xf32>
    %619 = arith.divf %617, %618 : vector<16x1xf32>
    %620 = vector.broadcast %612 : vector<16x1xf32> to vector<16x32xf32>
    %621 = arith.subf %604, %620 : vector<16x32xf32>
    %cst_424 = arith.constant 9.99999974E-6 : f32
    %622 = vector.broadcast %cst_424 : f32 to vector<16x1xf32>
    %623 = arith.addf %619, %622 : vector<16x1xf32>
    %624 = math.rsqrt %623 : vector<16x1xf32>
    %625 = vector.broadcast %624 : vector<16x1xf32> to vector<16x32xf32>
    %626 = arith.mulf %621, %625 : vector<16x32xf32>
    %627 = vector.broadcast %606 : vector<1x32xf32> to vector<16x32xf32>
    %628 = arith.mulf %626, %627 : vector<16x32xf32>
    %629 = vector.broadcast %608 : vector<1x32xf32> to vector<16x32xf32>
    %630 = arith.addf %628, %629 : vector<16x32xf32>
    %c0_425 = arith.constant 0 : index
    %c0_426 = arith.constant 0 : index
    %631 = vector.load %arg18[%c0_425, %c0_426] : memref<32x256xf32, #tpu.memory_space<vmem>>, vector<32x256xf32>
    %cst_427 = arith.constant dense<0.000000e+00> : vector<16x256xf32>
    %632 = tpu.matmul %630, %631, %cst_427 {dimension_numbers = #tpu.dot_dimension_numbers<[1], [0], [0], [1], [0, 0, 1, 1], [], []>} : vector<16x32xf32>, vector<32x256xf32>, vector<16x256xf32> -> vector<16x256xf32>
    %c0_428 = arith.constant 0 : index
    %c0_429 = arith.constant 0 : index
    %633 = vector.load %arg19[%c0_428, %c0_429] : memref<16x256xf32, #tpu.memory_space<vmem>>, vector<16x256xf32>
    %634 = arith.mulf %632, %633 : vector<16x256xf32>
    %c0_430 = arith.constant 0 : index
    %c0_431 = arith.constant 0 : index
    %635 = vector.load %arg20[%c0_430, %c0_431] : memref<256x32xf32, #tpu.memory_space<vmem>>, vector<256x32xf32>
    %cst_432 = arith.constant dense<0.000000e+00> : vector<16x32xf32>
    %636 = tpu.matmul %634, %635, %cst_432 {dimension_numbers = #tpu.dot_dimension_numbers<[1], [0], [0], [1], [0, 0, 1, 1], [], []>} : vector<16x256xf32>, vector<256x32xf32>, vector<16x32xf32> -> vector<16x32xf32>
    %c0_433 = arith.constant 0 : index
    %c0_434 = arith.constant 0 : index
    %637 = vector.load %arg21[%c0_433, %c0_434] : memref<2x16xf32, #tpu.memory_space<vmem>>, vector<2x16xf32>
    %cst_435 = arith.constant dense<0.000000e+00> : vector<2x32xf32>
    %638 = tpu.matmul %637, %636, %cst_435 {dimension_numbers = #tpu.dot_dimension_numbers<[1], [0], [0], [1], [0, 0, 1, 1], [], []>} : vector<2x16xf32>, vector<16x32xf32>, vector<2x32xf32> -> vector<2x32xf32>
    %c0_436 = arith.constant 0 : index
    %c0_437 = arith.constant 0 : index
    %639 = vector.load %arg22[%c0_436, %c0_437] : memref<1x32xf32, #tpu.memory_space<vmem>>, vector<1x32xf32>
    %640 = vector.broadcast %639 : vector<1x32xf32> to vector<2x32xf32>
    %641 = arith.addf %638, %640 : vector<2x32xf32>
    %cst_438 = arith.constant 0.000000e+00 : f32
    %642 = vector.broadcast %cst_438 : f32 to vector<2x32xf32>
    %643 = arith.maximumf %641, %642 : vector<2x32xf32>
    %c0_439 = arith.constant 0 : index
    %c0_440 = arith.constant 0 : index
    %644 = vector.load %arg23[%c0_439, %c0_440] : memref<32x1xf32, #tpu.memory_space<vmem>>, vector<32x1xf32>
    %cst_441 = arith.constant dense<0.000000e+00> : vector<2x1xf32>
    %645 = tpu.matmul %643, %644, %cst_441 {dimension_numbers = #tpu.dot_dimension_numbers<[1], [0], [0], [1], [0, 0, 1, 1], [], []>} : vector<2x32xf32>, vector<32x1xf32>, vector<2x1xf32> -> vector<2x1xf32>
    %c0_442 = arith.constant 0 : index
    %c0_443 = arith.constant 0 : index
    %646 = vector.load %arg24[%c0_442, %c0_443] : memref<1x1xf32, #tpu.memory_space<vmem>>, vector<1x1xf32>
    %647 = vector.broadcast %646 : vector<1x1xf32> to vector<2x1xf32>
    %648 = arith.addf %645, %647 : vector<2x1xf32>
    %649 = arith.negf %648 : vector<2x1xf32>
    %650 = math.exp %649 : vector<2x1xf32>
    %cst_444 = arith.constant 1.000000e+00 : f32
    %651 = vector.broadcast %cst_444 : f32 to vector<2x1xf32>
    %652 = arith.addf %651, %650 : vector<2x1xf32>
    %653 = arith.divf %651, %652 : vector<2x1xf32>
    %c0_445 = arith.constant 0 : index
    %c0_446 = arith.constant 0 : index
    %654 = vector.load %arg25[%c0_445, %c0_446] : memref<2x1xf32, #tpu.memory_space<vmem>>, vector<2x1xf32>
    tpu.vector_store %arg25[%c0_445, %c0_446], %653 {strides = array<i32>} : memref<2x1xf32, #tpu.memory_space<vmem>>, vector<2x1xf32>,
    return
  }
}

</mosaic_0001>

<bundles_post_ra>
// kernel: tpu_custom_call.1
= control target key start
LH: loop header
LB: loop body
LE: loop exit
PB: predicated region body
PF: predicated region fallthrough
CT: control target
= control target key end

     0   :  { %s10494_s0 = inlined_call_operand.vmem [shape: f32[2,8], index: 0, kind: input, shape index: {}]   ;;  %s10495_s1 = inlined_call_operand.vmem [shape: f32[8,32], index: 1, kind: input, shape index: {}]   ;;  %s10496_s2 = inlined_call_operand.vmem [shape: f32[1,32], index: 2, kind: input, shape index: {}]   ;;  %s10497_s3 = inlined_call_operand.vmem [shape: f32[1,32], index: 3, kind: input, shape index: {}]   ;;  %s10498_s4 = inlined_call_operand.vmem [shape: f32[1,32], index: 4, kind: input, shape index: {}]   ;;  %s10499_s5 = inlined_call_operand.vmem [shape: f32[16,2], index: 5, kind: input, shape index: {}]   ;;  %s10500_s6 = inlined_call_operand.vmem [shape: f32[16,32], index: 6, kind: input, shape index: {}]   ;;  %s10501_s7 = inlined_call_operand.vmem [shape: f32[16,16], index: 7, kind: input, shape index: {}]   ;;  %s10502_s8 = inlined_call_operand.vmem [shape: f32[12,32,8], index: 8, kind: input, shape index: {}]   ;;  %s10503_s9 = inlined_call_operand.vmem [shape: f32[12,32,8], index: 9, kind: input, shape index: {}]   ;;  %s10504_s10 = inlined_call_operand.vmem [shape: f32[12,32,8], index: 10, kind: input, shape index: {}]   ;;  %s10505_s11 = inlined_call_operand.vmem [shape: f32[12,8,32], index: 11, kind: input, shape index: {}]   ;;  %s10506_s12 = inlined_call_operand.vmem [shape: f32[12,1,8], index: 12, kind: input, shape index: {}]   ;;  %s10507_s13 = inlined_call_operand.vmem [shape: f32[12,1,8], index: 13, kind: input, shape index: {}]   ;;  %s10508_s14 = inlined_call_operand.vmem [shape: f32[12,1,8], index: 14, kind: input, shape index: {}]   ;;  %s10509_s15 = inlined_call_operand.vmem [shape: f32[3,1,32], index: 15, kind: input, shape index: {}]   ;;  %s10510_s16 = inlined_call_operand.vmem [shape: f32[3,1,32], index: 16, kind: input, shape index: {}]   ;;  %s10511_s17 = inlined_call_operand.vmem [shape: f32[3,1,32], index: 17, kind: input, shape index: {}]   ;;  %s10512_s18 = inlined_call_operand.vmem [shape: f32[32,256], index: 18, kind: input, shape index: {}]   ;;  %s10513_s19 = inlined_call_operand.vmem [shape: f32[16,256], index: 19, kind: input, shape index: {}]   ;;  %s10514_s20 = inlined_call_operand.vmem [shape: f32[256,32], index: 20, kind: input, shape index: {}]   ;;  %s10515_s21 = inlined_call_operand.vmem [shape: f32[2,16], index: 21, kind: input, shape index: {}]   ;;  %s10516_s22 = inlined_call_operand.vmem [shape: f32[1,32], index: 22, kind: input, shape index: {}]   ;;  %s10517_s23 = inlined_call_operand.vmem [shape: f32[32,1], index: 23, kind: input, shape index: {}]   ;;  %s10518_s24 = inlined_call_operand.<no memory space> [shape: f32[1,1], index: 24, kind: input, shape index: {}]   ;;  %s10519_s25 = inlined_call_operand.vmem [shape: f32[2,1], index: 25, kind: output, shape index: {0}]   ;;  %s10520_s26 = inlined_call_operand.hbm [shape: f32[3,16,16], index: 26, kind: output, shape index: {1}]  }
   0x1   :  { %10527 = sst [smem:[#allocation6_spill]] %s10494_s0  ;;  %v32_v0 = vstv %s10518_s24 }
   0x2   :  { %10528 = sst [smem:[#allocation7_spill]] %s10495_s1  ;;  %33 = vst [vmem:[#allocation2] sm:$0x1] %v32_v0 }
   0x3   :  { %10529 = sst [smem:[#allocation8_spill]] %s10496_s2 }
   0x4   :  { %10530 = sst [smem:[#allocation9_spill]] %s10497_s3 }
   0x5   :  { %10531 = sst [smem:[#allocation10_spill]] %s10498_s4 }
   0x6   :  { %10532 = sst [smem:[#allocation11_spill]] %s10499_s5 }
   0x7   :  { %10533 = sst [smem:[#allocation12_spill]] %s10500_s6 }
   0x8   :  { %10534 = sst [smem:[#allocation13_spill]] %s10501_s7 }
   0x9   :  { %10535 = sst [smem:[#allocation14_spill]] %s10502_s8 }
   0xa   :  { %10536 = sst [smem:[#allocation15_spill]] %s10503_s9 }
   0xb   :  { %10537 = sst [smem:[#allocation16_spill]] %s10504_s10 }
   0xc   :  { %s10538_s8 = sld [smem:[#allocation7_spill]]  ;;  %vm94_vm0 = vcmask 64512   ;;  %v9017_v3 = vmov 0.0   ;;  %vm9018_vm1 = vmmov 0  }
   0xd   :  { %s10539_s0 = sld [smem:[#allocation6_spill]]  ;;  %8220 = vmatprep.subr.mxu0 %v9017_v3  ;;  %8222 = vmatprep.mubr.msk.f32.mxu0 %vm9018_vm1, %v9017_v3 }
  0x12   :  { %v86_v1 = vld [vmem:[%s10538_s8] sm:$0xff] }
  0x13   :  { %v85_v2 = vld [vmem:[%s10539_s0] sm:$0x3] }
  0x14   :  { %34 = vsyncpa [#allocation4], 0  ;;  %8221 = vmatpush3.msra.mxu0 %v86_v1  ;;  %s10540_s30 = sld [smem:[#allocation8_spill]]  ;;  %vm170_vm2 = vcmask 254976   ;;  %vm204_vm3 = vcmask 15360   ;;  %vm211_vm4 = vcmask 1041408  }
  0x15   :  { %8223 = vmatmul.mubr.msk.f32.vlgmr.msra.gmra.mxu0 %vm94_vm0, %v85_v2  ;;  %s10541_s10 = sld [smem:[#allocation11_spill]]  ;;  %vm303_vm5 = vcmask 261120   ;;  %v7419_v45 = vld [vmem:[%s10506_s12] ss:$0 sm:$0xff]  ;;  %vm648_vm6 = vcmask 130048  }
  0x16   :  { %s10542_s27 = sld [smem:[#allocation14_spill]]  ;;  %v7422_v48 = vld [vmem:[%s10507_s13] ss:$0 sm:$0xff] }
  0x17   :  { %s10543_s4 = sld [smem:[#allocation9_spill]]  ;;  %v7425_v53 = vld [vmem:[%s10508_s14] ss:$0 sm:$0xff] }
  0x18   :  { %s10544_s24 = sld [smem:[#allocation10_spill]] }
  0x19   :  { %s10545_s28 = sld [smem:[#allocation15_spill]] }
  0x1a   :  { %v7412_v4 = vld [vmem:[%s10540_s30] ss:$0 sm:$0xff]  ;;  %s10547_s7 = sld [smem:[#allocation16_spill]] }
  0x1b   :  { %v200_v14 = vld [vmem:[%s10541_s10] sm:$0xff]  ;;  %v201_v27 = vld [vmem:[%s10541_s10 + $0x8] sm:$0xff]  ;;  %s10548_s0 = sld [smem:[#allocation13_spill]] }
  0x1c   :  { %8227 = vmatprep.mubr.msk.f32.mxu1 %vm204_vm3, %v200_v14  ;;  %v295_v15 = vld [vmem:[%s10542_s27 + $0x18] sm:$0xff]  ;;  %v294_v16 = vld [vmem:[%s10542_s27 + $0x10] sm:$0xff]  ;;  %v293_v28 = vld [vmem:[%s10542_s27 + $0x8] sm:$0xff] }
  0x1d   :  { %8230 = vmatprep.subr.mxu0 %v295_v15  ;;  %v7414_v21 = vld [vmem:[%s10543_s4] ss:$0 sm:$0xff]  ;;  %s10546_s4 = sld [smem:[#allocation12_spill]]  ;;  %v7437_v54 = vld [vmem:[%s10542_s27 + $0x38] sm:$0xff]  ;;  %v7436_v60 = vld [vmem:[%s10542_s27 + $0x30] sm:$0xff] }
  0x1e   :  { %8231 = vmatpush3.msra.mxu0 %v295_v15  ;;  %v7415_v23 = vld [vmem:[%s10544_s24] ss:$0 sm:$0xff]  ;;  %v7435_v61 = vld [vmem:[%s10542_s27 + $0x28] sm:$0xff] }
  0x1f   :  { %8232 = vmatprep.subr.mxu0 %v294_v16  ;;  %v292_v29 = vld [vmem:[%s10542_s27] sm:$0xff]  ;;  %v388_v30 = vld [vmem:[%s10545_s28 + $0x18] sm:$0xff]  ;;  %v387_v37 = vld [vmem:[%s10545_s28 + $0x10] sm:$0xff] }
  0x20   :  { %8233 = vmatpush3.msra.mxu0 %v294_v16  ;;  %v386_v38 = vld [vmem:[%s10545_s28 + $0x8] sm:$0xff]  ;;  %v385_v39 = vld [vmem:[%s10545_s28] sm:$0xff]  ;;  %v474_v40 = vld [vmem:[%s10547_s7 + $0x18] sm:$0xff] }
  0x21   :  { %8234 = vmatprep.subr.mxu0 %v293_v28  ;;  %v473_v41 = vld [vmem:[%s10547_s7 + $0x10] sm:$0xff]  ;;  %v472_v42 = vld [vmem:[%s10547_s7 + $0x8] sm:$0xff]  ;;  %v471_v43 = vld [vmem:[%s10547_s7] sm:$0xff] }
  0x22   :  { %8235 = vmatpush3.msra.mxu0 %v293_v28  ;;  %v7434_v62 = vld [vmem:[%s10542_s27 + $0x20] sm:$0xff]  ;;  %v7453_v63 = vld [vmem:[%s10547_s7 + $0x38] sm:$0xff]  ;;  %v7452_v0 = vld [vmem:[%s10547_s7 + $0x30] sm:$0xff] }
  0x23   :  { %8236 = vmatprep.subr.mxu0 %v292_v29  ;;  %v202_v32 = vld [vmem:[%s10546_s4] sm:$0xff]  ;;  %v203_v33 = vld [vmem:[%s10546_s4 + $0x8] sm:$0xff]  ;;  %s9019_s4 = smov [#allocation3]  }
  0x24   :  { %8237 = vmatpush3.msra.mxu0 %v292_v29  ;;  %v7451_v1 = vld [vmem:[%s10547_s7 + $0x28] sm:$0xff]  ;;  %v7450_v2 = vld [vmem:[%s10547_s7 + $0x20] sm:$0xff]  ;;  %s7399_s29 = sshll.u32 %s9019_s4, 4  ;;  %s7400_s29 = int_to_ptr.vmem [resolvable:$true] %s7399_s29 }
  0x25   :  { %8241 = vmatprep.subr.mxu0 %v388_v30  ;;  %s8995_s24 = scalar_lea.vmem %s7400_s29, 768  ;;  %p9000_p1 = scmp.lt.s32.totalorder %s7400_s29, %s7400_s29 }
  0x26   :  { %p8996_p0 = scmp.ne.s32.totalorder %s7400_s29, %s8995_s24  ;;  %p9001_p2 = scmp.lt.s32.totalorder %s8995_s24, %s8995_s24 }
  0x28   :  { %p9002_p3 = por %p9001_p2, %p9000_p1 }
  0x2a   :  { %p9003_p4 = pnand %p9002_p3, %p8996_p0 }
  0xd5   :  { %v164_v5 = vpop.f32.mrf.mxu0 }
  0xd6   :  { %v165_v6 = vadd.f32 %v7412_v4, %v164_v5 }
  0xd7   :  { %v8224_v7 = vpop.f32.mrf.mxu0 }
  0xd8   :  { %v171_v8 = vsel %vm170_vm2, %v165_v6, 0.0 }
  0xd9   :  { %172 = vadd.xlane.f32.xlu0 %v171_v8 }
 0x162   :  { %v173_v9 = vpop.xlane.xlu0 %172 }
 0x163   :  { %v175_v10 = vmul.f32 0.03125, %v173_v9  ;;  %v9300_v9 = vld [vmem:[%s10548_s0 + $0x8] sm:$0xff] }
 0x165   :  { %v176_v11 = vsub.f32 %v165_v6, %v175_v10  ;;  %v9295_v6 = vld [vmem:[%s10548_s0] sm:$0xff] }
 0x167   :  { %v177_v12 = vmul.f32 %v176_v11, %v176_v11 }
 0x169   :  { %v178_v13 = vsel %vm170_vm2, %v177_v12, 0.0 }
 0x16a   :  { %179 = vadd.xlane.f32.xlu0 %v178_v13 }
 0x1f3   :  { %v180_v17 = vpop.xlane.xlu0 %179 }
 0x1f4   :  { %v181_v18 = vmul.f32 0.03125, %v180_v17 }
 0x1f6   :  { %v182_v19 = vadd.f32 1e-05, %v181_v18  ;;  %v7455_v18 = vld [vmem:[%s10508_s14 + $0x1] ss:$0 sm:$0xff] }
 0x1f8   :  { %8877 = vrsqrt.f32 %v182_v19 }
 0x205   :  { %v8878_v20 = vpop.eup %8877 }
 0x206   :  { %v184_v22 = vmul.f32 %v8878_v20, %v176_v11  ;;  %v7439_v11 = vld [vmem:[%s10506_s12 + $0x1] ss:$0 sm:$0xff] }
 0x208   :  { %v191_v24 = vmul.f32 %v7414_v21, %v184_v22 }
 0x20a   :  { %v198_v25 = vadd.f32 %v7415_v23, %v191_v24 }
 0x20c   :  { %v199_v26 = vmax.f32 %v198_v25, 0.0 }
 0x20e   :  { %8225 = vmatprep.subr.msk.mxu1 %vm211_vm4, %v199_v26 }
 0x20f   :  { %8226 = vmatpush3.msk.msra.mxu1 %vm211_vm4, %v199_v26 }
 0x210   :  { %8228 = vmatmul.mubr.msk.f32.vlgmr.msra.gmra.mxu1 %vm204_vm3, %v201_v27 }
 0x2d0   :  { %v8229_v31 = vpop.f32.mrf.mxu1 }
 0x2d1   :  { %v9210_v36 = vadd.f32 %v8229_v31, %v203_v33  ;;  %v7445_v33 = vld [vmem:[%s10545_s28 + $0x38] sm:$0xff] }
 0x2d2   :  { %v281_v34 = vpop.f32.mrf.mxu1 }
 0x2d3   :  { %v9208_v35 = vadd.f32 %v281_v34, %v202_v32 }
 0x2d5   :  { %8238 = vmatprep.mubr.msk.f32.mxu0 %vm303_vm5, %v9208_v35 }
 0x2d6   :  { %8239 = vmatmul.mubr.msk.f32.vlgmr.msra.gmra.mxu0 %vm303_vm5, %v9210_v36 }
 0x2d7   :  { %8242 = vmatpush3.msra.mxu0 %v388_v30  ;;  %8249 = vmatprep.mubr.msk.f32.mxu0 %vm303_vm5, %v9208_v35 }
 0x2d8   :  { %8243 = vmatprep.subr.mxu0 %v387_v37 }
 0x2d9   :  { %8244 = vmatpush3.msra.mxu0 %v387_v37 }
 0x2da   :  { %8245 = vmatprep.subr.mxu0 %v386_v38 }
 0x2db   :  { %8246 = vmatpush3.msra.mxu0 %v386_v38 }
 0x2dc   :  { %8247 = vmatprep.subr.mxu0 %v385_v39 }
 0x2dd   :  { %8248 = vmatpush3.msra.mxu0 %v385_v39 }
 0x2de   :  { %8250 = vmatmul.mubr.msk.f32.vlgmr.msra.gmra.mxu0 %vm303_vm5, %v9210_v36  ;;  %8252 = vmatprep.subr.mxu0 %v474_v40 }
 0x2df   :  { %8253 = vmatpush3.msra.mxu0 %v474_v40  ;;  %8260 = vmatprep.mubr.msk.f32.mxu0 %vm303_vm5, %v9208_v35 }
 0x2e0   :  { %8254 = vmatprep.subr.mxu0 %v473_v41 }
 0x2e1   :  { %8255 = vmatpush3.msra.mxu0 %v473_v41 }
 0x2e2   :  { %8256 = vmatprep.subr.mxu0 %v472_v42 }
 0x2e3   :  { %8257 = vmatpush3.msra.mxu0 %v472_v42  ;;  %v7444_v42 = vld [vmem:[%s10545_s28 + $0x30] sm:$0xff] }
 0x2e4   :  { %8258 = vmatprep.subr.mxu0 %v471_v43 }
 0x2e5   :  { %8259 = vmatpush3.msra.mxu0 %v471_v43  ;;  %v7443_v43 = vld [vmem:[%s10545_s28 + $0x28] sm:$0xff] }
 0x2e6   :  { %8261 = vmatmul.mubr.msk.f32.vlgmr.msra.gmra.mxu0 %vm303_vm5, %v9210_v36 }
 0x396   :  { %v8240_v44 = vpop.f32.mrf.mxu0 }
 0x397   :  { %v382_v56 = vadd.f32 %v8240_v44, %v7419_v45  ;;  %v7442_v44 = vld [vmem:[%s10545_s28 + $0x20] sm:$0xff] }
 0x398   :  { %v376_v46 = vpop.f32.mrf.mxu0 }
 0x399   :  { %v377_v47 = vadd.f32 %v7419_v45, %v376_v46 }
 0x39b   :  { %8267 = vmatprep.mubr.msk.f32.mxu1 %vm94_vm0, %v377_v47 }
 0x39e   :  { %v8251_v49 = vpop.f32.mrf.mxu0 }
 0x39f   :  { %v468_v50 = vadd.f32 %v8251_v49, %v7422_v48 }
 0x3a0   :  { %v462_v51 = vpop.f32.mrf.mxu0 }
 0x3a1   :  { %v463_v52 = vadd.f32 %v7422_v48, %v462_v51  ;;  %8263 = vmatprep.subr.msk.mxu1 %vm94_vm0, %v468_v50  ;;  %v7447_v48 = vld [vmem:[%s10507_s13 + $0x1] ss:$0 sm:$0xff] }
 0x3a2   :  { %8264 = vmatpush3.xpose.msk.msra.mxu1 %vm94_vm0, %v468_v50 }
 0x3a3   :  { %8265 = vmatprep.subr.msk.mxu1 %vm94_vm0, %v463_v52 }
 0x3a6   :  { %v8262_v55 = vpop.f32.mrf.mxu0  ;;  %8266 = vmatpush3.xpose.msk.msra.mxu1 %vm94_vm0, %v463_v52 }
 0x3a7   :  { %v554_v57 = vadd.f32 %v8262_v55, %v7425_v53  ;;  %8277 = vmatprep.subr.mxu1 %v7437_v54 }
 0x3a8   :  { %v548_v58 = vpop.f32.mrf.mxu0 }
 0x3a9   :  { %v549_v59 = vadd.f32 %v7425_v53, %v548_v58  ;;  %8268 = vmatmul.mubr.msk.f32.vlgmr.msra.gmra.mxu1 %vm94_vm0, %v382_v56  ;;  %8270 = vmatprep.subr.mxu0 %v554_v57 }
 0x3aa   :  { %8271 = vmatpush3.msra.mxu0 %v554_v57  ;;  %8278 = vmatpush3.msra.mxu1 %v7437_v54 }
 0x3ab   :  { %8285 = vmatprep.mubr.msk.f32.mxu1 %vm303_vm5, %v9208_v35  ;;  %8272 = vmatprep.subr.mxu0 %v549_v59 }
 0x3ac   :  { %8279 = vmatprep.subr.mxu1 %v7436_v60  ;;  %8273 = vmatpush3.msra.mxu0 %v549_v59 }
 0x3ad   :  { %8280 = vmatpush3.msra.mxu1 %v7436_v60  ;;  %8288 = vmatprep.subr.mxu0 %v7445_v33 }
 0x3ae   :  { %8281 = vmatprep.subr.mxu1 %v7435_v61 }
 0x3af   :  { %8282 = vmatpush3.msra.mxu1 %v7435_v61 }
 0x3b0   :  { %8283 = vmatprep.subr.mxu1 %v7434_v62 }
 0x3b1   :  { %8284 = vmatpush3.msra.mxu1 %v7434_v62 }
 0x3b2   :  { %8286 = vmatmul.mubr.msk.f32.vlgmr.msra.gmra.mxu1 %vm303_vm5, %v9210_v36  ;;  %8299 = vmatprep.subr.mxu1 %v7453_v63 }
 0x3b3   :  { %8300 = vmatpush3.msra.mxu1 %v7453_v63  ;;  %8307 = vmatprep.mubr.msk.f32.mxu1 %vm303_vm5, %v9208_v35 }
 0x3b4   :  { %8301 = vmatprep.subr.mxu1 %v7452_v0 }
 0x3b5   :  { %8302 = vmatpush3.msra.mxu1 %v7452_v0 }
 0x3b6   :  { %8303 = vmatprep.subr.mxu1 %v7451_v1 }
 0x3b7   :  { %8304 = vmatpush3.msra.mxu1 %v7451_v1 }
 0x3b8   :  { %8305 = vmatprep.subr.mxu1 %v7450_v2 }
 0x3b9   :  { %8306 = vmatpush3.msra.mxu1 %v7450_v2 }
 0x3ba   :  { %8308 = vmatmul.mubr.msk.f32.vlgmr.msra.gmra.mxu1 %vm303_vm5, %v9210_v36 }
 0x469   :  { %v8269_v4 = vpop.f32.mrf.mxu1 }
 0x46a   :  { %v645_v7 = vmul.f32 0.35355338, %v8269_v4 }
 0x46b   :  { %v635_v5 = vpop.f32.mrf.mxu1 }
 0x46c   :  { %v644_v8 = vmul.f32 0.35355338, %v635_v5  ;;  %v647_v13 = vadd.f32 %v645_v7, %v9300_v9 }
 0x46e   :  { %v646_v10 = vadd.f32 %v644_v8, %v9295_v6  ;;  %v652_v16 = vsel %vm648_vm6, %v647_v13, -inf }
 0x470   :  { %v649_v12 = vsel %vm648_vm6, %v646_v10, -inf }
 0x471   :  { %650 = vmax.xlane.f32.xlu1 %v649_v12 }
 0x472   :  { %v8287_v14 = vpop.f32.mrf.mxu1 }
 0x473   :  { %v9308_v15 = vadd.f32 %v8287_v14, %v7439_v11 }
 0x474   :  { %v832_v17 = vpop.f32.mrf.mxu1 }
 0x475   :  { %653 = vmax.xlane.f32.xlu1 %v652_v16  ;;  %v833_v45 = vadd.f32 %v7439_v11, %v832_v17  ;;  %v7480_v17 = vld [vmem:[%s10545_s28 + $0x58] sm:$0xff] }
 0x47a   :  { %v8309_v19 = vpop.f32.mrf.mxu1 }
 0x47b   :  { %v1014_v20 = vadd.f32 %v8309_v19, %v7455_v18  ;;  %v7478_v19 = vld [vmem:[%s10545_s28 + $0x48] sm:$0xff] }
 0x47c   :  { %v1008_v21 = vpop.f32.mrf.mxu1 }
 0x47d   :  { %v1009_v22 = vadd.f32 %v7455_v18, %v1008_v21  ;;  %8317 = vmatprep.subr.mxu1 %v1014_v20  ;;  %v7479_v18 = vld [vmem:[%s10545_s28 + $0x50] sm:$0xff]  ;;  %v7464_v21 = vld [vmem:[%s10505_s11 + $0x8] sm:$0xff] }
 0x47e   :  { %8318 = vmatpush3.msra.mxu1 %v1014_v20  ;;  %v7477_v20 = vld [vmem:[%s10545_s28 + $0x40] sm:$0xff] }
 0x47f   :  { %8319 = vmatprep.subr.mxu1 %v1009_v22 }
 0x480   :  { %8320 = vmatpush3.msra.mxu1 %v1009_v22  ;;  %v7472_v22 = vld [vmem:[%s10542_s27 + $0x58] sm:$0xff] }
 0x4fa   :  { %v651_v23 = vpop.xlane.xlu1 %650 }
 0x4fb   :  { %v655_v24 = vsub.f32 %v646_v10, %v651_v23  ;;  %v752_v10 = vld [vmem:[%s10505_s11] sm:$0xff] }
 0x4fc   :  { %8329 = vmatprep.subr.mxu1 %v752_v10 }
 0x4fd   :  { %v657_v25 = vmul.f32 1.442695, %v655_v24 }
 0x4fe   :  { %v654_v26 = vpop.xlane.xlu1 %653 }
 0x4ff   :  { %8879 = vpow2.f32 %v657_v25  ;;  %v656_v27 = vsub.f32 %v647_v13, %v654_v26  ;;  %v7471_v25 = vld [vmem:[%s10542_s27 + $0x50] sm:$0xff]  ;;  %v7470_v26 = vld [vmem:[%s10542_s27 + $0x48] sm:$0xff] }
 0x501   :  { %v659_v28 = vmul.f32 1.442695, %v656_v27 }
 0x503   :  { %8881 = vpow2.f32 %v659_v28  ;;  %v7469_v28 = vld [vmem:[%s10542_s27 + $0x40] sm:$0xff] }
 0x50c   :  { %v8880_v29 = vpop.eup %8879 }
 0x50d   :  { %v661_v30 = vsel %vm648_vm6, %v8880_v29, 0.0 }
 0x50e   :  { %662 = vadd.xlane.f32.xlu0 %v661_v30 }
 0x510   :  { %v8882_v31 = vpop.eup %8881 }
 0x511   :  { %v664_v32 = vsel %vm648_vm6, %v8882_v31, 0.0 }
 0x512   :  { %665 = vadd.xlane.f32.xlu1 %v664_v32  ;;  %v7487_v32 = vld [vmem:[%s10547_s7 + $0x50] sm:$0xff] }
 0x597   :  { %v663_v34 = vpop.xlane.xlu0 %662 }
 0x598   :  { %8883 = vrcp.f32 %v663_v34 }
 0x59b   :  { %v666_v37 = vpop.xlane.xlu1 %665 }
 0x59c   :  { %8885 = vrcp.f32 %v666_v37  ;;  %v7486_v37 = vld [vmem:[%s10547_s7 + $0x48] sm:$0xff] }
 0x5a5   :  { %v8884_v38 = vpop.eup %8883 }
 0x5a6   :  { %v9319_v39 = vmul.f32 %v8884_v38, %v8880_v29  ;;  %v7488_v29 = vld [vmem:[%s10547_s7 + $0x58] sm:$0xff] }
 0x5a8   :  { %8274 = vmatprep.mubr.msk.f32.mxu0 %vm648_vm6, %v9319_v39 }
 0x5a9   :  { %v8886_v40 = vpop.eup %8885 }
 0x5aa   :  { %v9323_v41 = vmul.f32 %v8886_v40, %v8882_v31  ;;  %v7482_v31 = vld [vmem:[%s10507_s13 + $0x2] ss:$0 sm:$0xff] }
 0x5ac   :  { %8275 = vmatmul.mubr.msk.f32.vlgmr.msra.gmra.mxu0 %vm648_vm6, %v9323_v41 }
 0x5ad   :  { %8289 = vmatpush3.msra.mxu0 %v7445_v33  ;;  %8296 = vmatprep.mubr.msk.f32.mxu0 %vm303_vm5, %v9208_v35 }
 0x5ae   :  { %8290 = vmatprep.subr.mxu0 %v7444_v42 }
 0x5af   :  { %8291 = vmatpush3.msra.mxu0 %v7444_v42  ;;  %v7485_v42 = vld [vmem:[%s10547_s7 + $0x40] sm:$0xff] }
 0x5b0   :  { %8292 = vmatprep.subr.mxu0 %v7443_v43 }
 0x5b1   :  { %8293 = vmatpush3.msra.mxu0 %v7443_v43 }
 0x5b2   :  { %8294 = vmatprep.subr.mxu0 %v7442_v44 }
 0x5b3   :  { %8295 = vmatpush3.msra.mxu0 %v7442_v44 }
 0x5b4   :  { %8297 = vmatmul.mubr.msk.f32.vlgmr.msra.gmra.mxu0 %vm303_vm5, %v9210_v36 }
 0x5b5   :  { %8314 = vmatprep.mubr.msk.f32.mxu0 %vm94_vm0, %v833_v45 }
 0x66c   :  { %v8276_v46 = vpop.f32.mrf.mxu0 }
 0x66e   :  { %v743_v47 = vpop.f32.mrf.mxu0 }
 0x674   :  { %v8298_v49 = vpop.f32.mrf.mxu0 }
 0x675   :  { %v926_v50 = vadd.f32 %v8298_v49, %v7447_v48 }
 0x676   :  { %v920_v51 = vpop.f32.mrf.mxu0 }
 0x677   :  { %v921_v52 = vadd.f32 %v7447_v48, %v920_v51  ;;  %8310 = vmatprep.subr.msk.mxu0 %vm94_vm0, %v926_v50 }
 0x678   :  { %8311 = vmatpush3.xpose.msk.msra.mxu0 %vm94_vm0, %v926_v50  ;;  %v7490_v50 = vld [vmem:[%s10508_s14 + $0x2] ss:$0 sm:$0xff] }
 0x679   :  { %8312 = vmatprep.subr.msk.mxu0 %vm94_vm0, %v921_v52 }
 0x67c   :  { %8313 = vmatpush3.xpose.msk.msra.mxu0 %vm94_vm0, %v921_v52 }
 0x67d   :  { %8324 = vmatprep.subr.mxu0 %v7464_v21 }
 0x67f   :  { %8315 = vmatmul.mubr.msk.f32.vlgmr.msra.gmra.mxu0 %vm94_vm0, %v9308_v15 }
 0x680   :  { %8325 = vmatpush3.msra.mxu0 %v7464_v21 }
 0x681   :  { %8334 = vmatprep.subr.mxu0 %v7472_v22 }
 0x73f   :  { %v8316_v53 = vpop.f32.mrf.mxu0 }
 0x740   :  { %v1105_v54 = vmul.f32 0.35355338, %v8316_v53 }
 0x741   :  { %v1095_v55 = vpop.f32.mrf.mxu0 }
 0x742   :  { %v1104_v56 = vmul.f32 0.35355338, %v1095_v55  ;;  %v1107_v57 = vadd.f32 %v1105_v54, %v9300_v9 }
 0x744   :  { %v1111_v58 = vsel %vm648_vm6, %v1107_v57, -inf  ;;  %v1106_v59 = vadd.f32 %v1104_v56, %v9295_v6 }
 0x745   :  { %1112 = vmax.xlane.f32.xlu1 %v1111_v58 }
 0x746   :  { %v1108_v60 = vsel %vm648_vm6, %v1106_v59, -inf }
 0x747   :  { %1109 = vmax.xlane.f32.xlu0 %v1108_v60 }
 0x7ce   :  { %v1113_v61 = vpop.xlane.xlu1 %1112 }
 0x7cf   :  { %v1115_v62 = vsub.f32 %v1107_v57, %v1113_v61 }
 0x7d0   :  { %v1110_v63 = vpop.xlane.xlu0 %1109 }
 0x7d1   :  { %v1118_v0 = vmul.f32 1.442695, %v1115_v62  ;;  %v1114_v1 = vsub.f32 %v1106_v59, %v1110_v63 }
 0x7d3   :  { %8887 = vpow2.f32 %v1118_v0  ;;  %v1116_v2 = vmul.f32 1.442695, %v1114_v1 }
 0x7d5   :  { %8889 = vpow2.f32 %v1116_v2 }
 0x7e0   :  { %v8888_v4 = vpop.eup %8887 }
 0x7e1   :  { %v1123_v5 = vsel %vm648_vm6, %v8888_v4, 0.0 }
 0x7e2   :  { %v8890_v7 = vpop.eup %8889  ;;  %1124 = vadd.xlane.f32.xlu1 %v1123_v5 }
 0x7e3   :  { %v1120_v8 = vsel %vm648_vm6, %v8890_v7, 0.0 }
 0x7e4   :  { %1121 = vadd.xlane.f32.xlu0 %v1120_v8 }
 0x86b   :  { %v1125_v11 = vpop.xlane.xlu1 %1124 }
 0x86c   :  { %8891 = vrcp.f32 %v1125_v11 }
 0x86d   :  { %v1122_v12 = vpop.xlane.xlu0 %1121 }
 0x86e   :  { %8893 = vrcp.f32 %v1122_v12  ;;  %v7505_v12 = vld [vmem:[%s10542_s27 + $0x78] sm:$0xff] }
 0x879   :  { %v8892_v13 = vpop.eup %8891 }
 0x87a   :  { %v9361_v16 = vmul.f32 %v8892_v13, %v8888_v4 }
 0x87b   :  { %v8894_v14 = vpop.eup %8893 }
 0x87c   :  { %v9359_v15 = vmul.f32 %v8894_v14, %v8890_v7 }
 0x87e   :  { %8321 = vmatprep.mubr.msk.f32.mxu1 %vm648_vm6, %v9359_v15  ;;  %v1375_v21 = vadd.f32 %v9359_v15, %v9319_v39  ;;  %v7503_v39 = vld [vmem:[%s10542_s27 + $0x68] sm:$0xff]  ;;  %v7521_v15 = vld [vmem:[%s10547_s7 + $0x78] sm:$0xff] }
 0x87f   :  { %8322 = vmatmul.mubr.msk.f32.vlgmr.msra.gmra.mxu1 %vm648_vm6, %v9361_v16 }
 0x880   :  { %8331 = vmatprep.mubr.msk.f32.mxu1 %vm94_vm0, %v743_v47  ;;  %8330 = vmatpush3.msra.mxu1 %v752_v10 }
 0x881   :  { %8345 = vmatprep.subr.mxu1 %v7480_v17 }
 0x883   :  { %8332 = vmatmul.mubr.msk.f32.vlgmr.msra.gmra.mxu1 %vm94_vm0, %v8276_v46  ;;  %v7474_v46 = vld [vmem:[%s10506_s12 + $0x2] ss:$0 sm:$0xff] }
 0x884   :  { %8346 = vmatpush3.msra.mxu1 %v7480_v17  ;;  %8353 = vmatprep.mubr.msk.f32.mxu1 %vm303_vm5, %v9208_v35 }
 0x885   :  { %8347 = vmatprep.subr.mxu1 %v7479_v18 }
 0x886   :  { %8348 = vmatpush3.msra.mxu1 %v7479_v18  ;;  %v1376_v18 = vadd.f32 %v9361_v16, %v9323_v41  ;;  %v7502_v41 = vld [vmem:[%s10542_s27 + $0x60] sm:$0xff]  ;;  %v7520_v16 = vld [vmem:[%s10547_s7 + $0x70] sm:$0xff] }
 0x887   :  { %8349 = vmatprep.subr.mxu1 %v7478_v19 }
 0x888   :  { %8350 = vmatpush3.msra.mxu1 %v7478_v19 }
 0x889   :  { %8351 = vmatprep.subr.mxu1 %v7477_v20 }
 0x88a   :  { %8352 = vmatpush3.msra.mxu1 %v7477_v20 }
 0x88b   :  { %8354 = vmatmul.mubr.msk.f32.vlgmr.msra.gmra.mxu1 %vm303_vm5, %v9210_v36 }
 0x93f   :  { %v8323_v23 = vpop.f32.mrf.mxu1 }
 0x941   :  { %v1202_v24 = vpop.f32.mrf.mxu1 }
 0x942   :  { %8326 = vmatprep.mubr.msk.f32.mxu0 %vm94_vm0, %v1202_v24 }
 0x943   :  { %8327 = vmatmul.mubr.msk.f32.vlgmr.msra.gmra.mxu0 %vm94_vm0, %v8323_v23  ;;  %v9401_v27 = vpop.f32.mrf.mxu1 }
 0x944   :  { %8335 = vmatpush3.msra.mxu0 %v7472_v22  ;;  %8342 = vmatprep.mubr.msk.f32.mxu0 %vm303_vm5, %v9208_v35 }
 0x945   :  { %8336 = vmatprep.subr.mxu0 %v7471_v25  ;;  %v9409_v30 = vpop.f32.mrf.mxu1 }
 0x946   :  { %8337 = vmatpush3.msra.mxu0 %v7471_v25  ;;  %v7504_v25 = vld [vmem:[%s10542_s27 + $0x70] sm:$0xff] }
 0x947   :  { %8338 = vmatprep.subr.mxu0 %v7470_v26 }
 0x948   :  { %8339 = vmatpush3.msra.mxu0 %v7470_v26  ;;  %v7519_v26 = vld [vmem:[%s10547_s7 + $0x68] sm:$0xff] }
 0x949   :  { %8340 = vmatprep.subr.mxu0 %v7469_v28 }
 0x94a   :  { %8341 = vmatpush3.msra.mxu0 %v7469_v28  ;;  %v7518_v28 = vld [vmem:[%s10547_s7 + $0x60] sm:$0xff] }
 0x94b   :  { %8343 = vmatmul.mubr.msk.f32.vlgmr.msra.gmra.mxu0 %vm303_vm5, %v9210_v36  ;;  %v8355_v33 = vpop.f32.mrf.mxu1  ;;  %8356 = vmatprep.subr.mxu0 %v7488_v29 }
 0x94c   :  { %v1550_v34 = vadd.f32 %v8355_v33, %v7482_v31  ;;  %8357 = vmatpush3.msra.mxu0 %v7488_v29  ;;  %8364 = vmatprep.mubr.msk.f32.mxu0 %vm303_vm5, %v9208_v35  ;;  %v7499_v29 = vld [vmem:[%s10505_s11 + $0x10] sm:$0xff] }
 0x94d   :  { %v1544_v38 = vpop.f32.mrf.mxu1  ;;  %8358 = vmatprep.subr.mxu0 %v7487_v32 }
 0x94e   :  { %v1545_v40 = vadd.f32 %v7482_v31, %v1544_v38  ;;  %8359 = vmatpush3.msra.mxu0 %v7487_v32  ;;  %8367 = vmatprep.subr.msk.mxu1 %vm94_vm0, %v1550_v34  ;;  %v7513_v31 = vld [vmem:[%s10545_s28 + $0x78] sm:$0xff]  ;;  %v7507_v38 = vld [vmem:[%s10506_s12 + $0x3] ss:$0 sm:$0xff] }
 0x94f   :  { %8360 = vmatprep.subr.mxu0 %v7486_v37  ;;  %8368 = vmatpush3.xpose.msk.msra.mxu1 %vm94_vm0, %v1550_v34  ;;  %v7512_v34 = vld [vmem:[%s10545_s28 + $0x70] sm:$0xff] }
 0x950   :  { %8361 = vmatpush3.msra.mxu0 %v7486_v37  ;;  %8369 = vmatprep.subr.msk.mxu1 %vm94_vm0, %v1545_v40  ;;  %v7511_v37 = vld [vmem:[%s10545_s28 + $0x68] sm:$0xff] }
 0x951   :  { %8362 = vmatprep.subr.mxu0 %v7485_v42 }
 0x952   :  { %8363 = vmatpush3.msra.mxu0 %v7485_v42 }
 0x953   :  { %8365 = vmatmul.mubr.msk.f32.vlgmr.msra.gmra.mxu0 %vm303_vm5, %v9210_v36  ;;  %8370 = vmatpush3.xpose.msk.msra.mxu1 %vm94_vm0, %v1545_v40  ;;  %v7510_v40 = vld [vmem:[%s10545_s28 + $0x60] sm:$0xff] }
 0x954   :  { %8381 = vmatprep.subr.mxu1 %v7499_v29 }
 0xa03   :  { %v9433_v43 = vpop.f32.mrf.mxu0 }
 0xa05   :  { %v9435_v44 = vpop.f32.mrf.mxu0 }
 0xa0b   :  { %v8344_v45 = vpop.f32.mrf.mxu0 }
 0xa0c   :  { %v1462_v49 = vadd.f32 %v8344_v45, %v7474_v46 }
 0xa0d   :  { %v1456_v47 = vpop.f32.mrf.mxu0 }
 0xa0e   :  { %v1457_v48 = vadd.f32 %v7474_v46, %v1456_v47 }
 0xa10   :  { %8371 = vmatprep.mubr.msk.f32.mxu1 %vm94_vm0, %v1457_v48  ;;  %v7523_v48 = vld [vmem:[%s10508_s14 + $0x3] ss:$0 sm:$0xff] }
 0xa11   :  { %8372 = vmatmul.mubr.msk.f32.vlgmr.msra.gmra.mxu1 %vm94_vm0, %v1462_v49 }
 0xa12   :  { %8382 = vmatpush3.msra.mxu1 %v7499_v29 }
 0xa13   :  { %v8366_v51 = vpop.f32.mrf.mxu0  ;;  %8397 = vmatprep.subr.mxu1 %v7513_v31 }
 0xa14   :  { %v1638_v52 = vadd.f32 %v8366_v51, %v7490_v50 }
 0xa15   :  { %v1632_v53 = vpop.f32.mrf.mxu0 }
 0xa16   :  { %v1633_v54 = vadd.f32 %v7490_v50, %v1632_v53  ;;  %8374 = vmatprep.subr.mxu0 %v1638_v52  ;;  %v1372_v53 = vadd.f32 %v9401_v27, %v9433_v43 }
 0xa17   :  { %8375 = vmatpush3.msra.mxu0 %v1638_v52 }
 0xa18   :  { %8376 = vmatprep.subr.mxu0 %v1633_v54 }
 0xa19   :  { %8377 = vmatpush3.msra.mxu0 %v1633_v54 }
 0xa1a   :  { %8386 = vmatprep.subr.mxu0 %v7505_v12 }
 0xad1   :  { %v8373_v55 = vpop.f32.mrf.mxu1 }
 0xad2   :  { %v1729_v56 = vmul.f32 0.35355338, %v8373_v55  ;;  %v1367_v55 = vadd.f32 %v9409_v30, %v9435_v44 }
 0xad3   :  { %v1719_v57 = vpop.f32.mrf.mxu1 }
 0xad4   :  { %v1728_v58 = vmul.f32 0.35355338, %v1719_v57  ;;  %v1731_v59 = vadd.f32 %v1729_v56, %v9300_v9 }
 0xad6   :  { %v1735_v60 = vsel %vm648_vm6, %v1731_v59, -inf  ;;  %v1730_v61 = vadd.f32 %v1728_v58, %v9295_v6 }
 0xad7   :  { %1736 = vmax.xlane.f32.xlu1 %v1735_v60 }
 0xad8   :  { %v1732_v62 = vsel %vm648_vm6, %v1730_v61, -inf }
 0xad9   :  { %1733 = vmax.xlane.f32.xlu0 %v1732_v62 }
 0xb60   :  { %v1737_v63 = vpop.xlane.xlu1 %1736 }
 0xb61   :  { %v1739_v0 = vsub.f32 %v1731_v59, %v1737_v63  ;;  %v7515_v59 = vld [vmem:[%s10507_s13 + $0x3] ss:$0 sm:$0xff] }
 0xb62   :  { %v1734_v1 = vpop.xlane.xlu0 %1733 }
 0xb63   :  { %v1742_v2 = vmul.f32 1.442695, %v1739_v0  ;;  %v1738_v4 = vsub.f32 %v1730_v61, %v1734_v1 }
 0xb65   :  { %8895 = vpow2.f32 %v1742_v2  ;;  %v1740_v5 = vmul.f32 1.442695, %v1738_v4 }
 0xb67   :  { %8897 = vpow2.f32 %v1740_v5 }
 0xb72   :  { %v8896_v7 = vpop.eup %8895 }
 0xb73   :  { %v1747_v8 = vsel %vm648_vm6, %v8896_v7, 0.0 }
 0xb74   :  { %v8898_v10 = vpop.eup %8897  ;;  %1748 = vadd.xlane.f32.xlu1 %v1747_v8 }
 0xb75   :  { %v1744_v11 = vsel %vm648_vm6, %v8898_v10, 0.0 }
 0xb76   :  { %1745 = vadd.xlane.f32.xlu0 %v1744_v11 }
 0xbfd   :  { %v1749_v13 = vpop.xlane.xlu1 %1748 }
 0xbfe   :  { %8899 = vrcp.f32 %v1749_v13 }
 0xbff   :  { %v1746_v14 = vpop.xlane.xlu0 %1745 }
 0xc00   :  { %8901 = vrcp.f32 %v1746_v14 }
 0xc0b   :  { %v8900_v17 = vpop.eup %8899 }
 0xc0c   :  { %v1753_v19 = vmul.f32 %v8900_v17, %v8896_v7 }
 0xc0d   :  { %v8902_v20 = vpop.eup %8901 }
 0xc0e   :  { %v1752_v22 = vmul.f32 %v8902_v20, %v8898_v10  ;;  %v9458_v23 = vadd.f32 %v1753_v19, %v1376_v18 }
 0xc10   :  { %8378 = vmatprep.mubr.msk.f32.mxu0 %vm648_vm6, %v1752_v22  ;;  %v9461_v24 = vadd.f32 %v1752_v22, %v1375_v21 }
 0xc11   :  { %8379 = vmatmul.mubr.msk.f32.vlgmr.msra.gmra.mxu0 %vm648_vm6, %v1753_v19 }
 0xc12   :  { %8387 = vmatpush3.msra.mxu0 %v7505_v12  ;;  %8394 = vmatprep.mubr.msk.f32.mxu0 %vm303_vm5, %v9208_v35 }
 0xc13   :  { %8388 = vmatprep.subr.mxu0 %v7504_v25 }
 0xc14   :  { %8389 = vmatpush3.msra.mxu0 %v7504_v25 }
 0xc15   :  { %8390 = vmatprep.subr.mxu0 %v7503_v39 }
 0xc16   :  { %8391 = vmatpush3.msra.mxu0 %v7503_v39 }
 0xc17   :  { %8392 = vmatprep.subr.mxu0 %v7502_v41 }
 0xc18   :  { %8393 = vmatpush3.msra.mxu0 %v7502_v41 }
 0xc19   :  { %8395 = vmatmul.mubr.msk.f32.vlgmr.msra.gmra.mxu0 %vm303_vm5, %v9210_v36  ;;  %8408 = vmatprep.subr.mxu0 %v7521_v15 }
 0xc1a   :  { %8409 = vmatpush3.msra.mxu0 %v7521_v15  ;;  %8416 = vmatprep.mubr.msk.f32.mxu0 %vm303_vm5, %v9208_v35 }
 0xc1b   :  { %8410 = vmatprep.subr.mxu0 %v7520_v16 }
 0xc1c   :  { %8411 = vmatpush3.msra.mxu0 %v7520_v16 }
 0xc1d   :  { %8412 = vmatprep.subr.mxu0 %v7519_v26 }
 0xc1e   :  { %8413 = vmatpush3.msra.mxu0 %v7519_v26 }
 0xc1f   :  { %8414 = vmatprep.subr.mxu0 %v7518_v28 }
 0xc20   :  { %8415 = vmatpush3.msra.mxu0 %v7518_v28  ;;  %v7532_v28 = vld [vmem:[%s10505_s11 + $0x18] sm:$0xff] }
 0xc21   :  { %8417 = vmatmul.mubr.msk.f32.vlgmr.msra.gmra.mxu0 %vm303_vm5, %v9210_v36 }
 0xcd1   :  { %v8380_v32 = vpop.f32.mrf.mxu0 }
 0xcd3   :  { %v1826_v33 = vpop.f32.mrf.mxu0 }
 0xcd4   :  { %8383 = vmatprep.mubr.msk.f32.mxu1 %vm94_vm0, %v1826_v33  ;;  %v7535_v33 = vld [vmem:[%s10509_s15] ss:$0 sm:$0xff] }
 0xcd5   :  { %8384 = vmatmul.mubr.msk.f32.vlgmr.msra.gmra.mxu1 %vm94_vm0, %v8380_v32 }
 0xcd6   :  { %8398 = vmatpush3.msra.mxu1 %v7513_v31  ;;  %8405 = vmatprep.mubr.msk.f32.mxu1 %vm303_vm5, %v9208_v35 }
 0xcd7   :  { %8399 = vmatprep.subr.mxu1 %v7512_v34 }
 0xcd8   :  { %8400 = vmatpush3.msra.mxu1 %v7512_v34 }
 0xcd9   :  { %v8396_v42 = vpop.f32.mrf.mxu0  ;;  %8401 = vmatprep.subr.mxu1 %v7511_v37 }
 0xcda   :  { %v2007_v45 = vadd.f32 %v8396_v42, %v7507_v38  ;;  %8402 = vmatpush3.msra.mxu1 %v7511_v37 }
 0xcdb   :  { %v2001_v46 = vpop.f32.mrf.mxu0  ;;  %8403 = vmatprep.subr.mxu1 %v7510_v40 }
 0xcdc   :  { %v2002_v47 = vadd.f32 %v7507_v38, %v2001_v46  ;;  %8404 = vmatpush3.msra.mxu1 %v7510_v40 }
 0xcdd   :  { %8406 = vmatmul.mubr.msk.f32.vlgmr.msra.gmra.mxu1 %vm303_vm5, %v9210_v36 }
 0xcde   :  { %8423 = vmatprep.mubr.msk.f32.mxu1 %vm94_vm0, %v2002_v47 }
 0xce1   :  { %v8418_v49 = vpop.f32.mrf.mxu0 }
 0xce2   :  { %v2183_v50 = vadd.f32 %v8418_v49, %v7523_v48 }
 0xce3   :  { %v2177_v51 = vpop.f32.mrf.mxu0 }
 0xce4   :  { %v2178_v52 = vadd.f32 %v7523_v48, %v2177_v51  ;;  %8426 = vmatprep.subr.mxu0 %v2183_v50 }
 0xce5   :  { %8427 = vmatpush3.msra.mxu0 %v2183_v50 }
 0xce6   :  { %8428 = vmatprep.subr.mxu0 %v2178_v52 }
 0xce7   :  { %8429 = vmatpush3.msra.mxu0 %v2178_v52 }
 0xd95   :  { %v8385_v54 = vpop.f32.mrf.mxu1 }
 0xd96   :  { %v1919_v56 = vadd.f32 %v8385_v54, %v1372_v53 }
 0xd97   :  { %v1909_v57 = vpop.f32.mrf.mxu1 }
 0xd98   :  { %v9525_v58 = vadd.f32 %v1909_v57, %v1367_v55  ;;  %v7541_v55 = vld [vmem:[%s10542_s27 + $0x98] sm:$0xff]  ;;  %v7540_v57 = vld [vmem:[%s10542_s27 + $0x90] sm:$0xff] }
 0xd99   :  { %8438 = vmatprep.subr.mxu0 %v7541_v55 }
 0xd9d   :  { %v8407_v60 = vpop.f32.mrf.mxu1 }
 0xd9e   :  { %v2095_v61 = vadd.f32 %v8407_v60, %v7515_v59  ;;  %v7547_v60 = vld [vmem:[%s10545_s28 + $0x88] sm:$0xff] }
 0xd9f   :  { %v2089_v62 = vpop.f32.mrf.mxu1 }
 0xda0   :  { %v2090_v63 = vadd.f32 %v7515_v59, %v2089_v62  ;;  %8419 = vmatprep.subr.msk.mxu1 %vm94_vm0, %v2095_v61  ;;  %v7539_v59 = vld [vmem:[%s10542_s27 + $0x88] sm:$0xff]  ;;  %v7546_v62 = vld [vmem:[%s10545_s28 + $0x80] sm:$0xff] }
 0xda1   :  { %8420 = vmatpush3.xpose.msk.msra.mxu1 %vm94_vm0, %v2095_v61  ;;  %v7538_v61 = vld [vmem:[%s10542_s27 + $0x80] sm:$0xff] }
 0xda2   :  { %8421 = vmatprep.subr.msk.mxu1 %vm94_vm0, %v2090_v63 }
 0xda5   :  { %8422 = vmatpush3.xpose.msk.msra.mxu1 %vm94_vm0, %v2090_v63  ;;  %v7557_v63 = vld [vmem:[%s10547_s7 + $0x98] sm:$0xff] }
 0xda6   :  { %8433 = vmatprep.subr.mxu1 %v7532_v28 }
 0xda8   :  { %8424 = vmatmul.mubr.msk.f32.vlgmr.msra.gmra.mxu1 %vm94_vm0, %v2007_v45 }
 0xda9   :  { %8434 = vmatpush3.msra.mxu1 %v7532_v28  ;;  %v7559_v28 = vld [vmem:[%s10508_s14 + $0x4] ss:$0 sm:$0xff] }
 0xe68   :  { %v8425_v27 = vpop.f32.mrf.mxu1 }
 0xe69   :  { %v2274_v30 = vmul.f32 0.35355338, %v8425_v27 }
 0xe6a   :  { %v2264_v43 = vpop.f32.mrf.mxu1 }
 0xe6b   :  { %v2273_v44 = vmul.f32 0.35355338, %v2264_v43  ;;  %v2276_v0 = vadd.f32 %v2274_v30, %v9300_v9 }
 0xe6d   :  { %v2280_v1 = vsel %vm648_vm6, %v2276_v0, -inf  ;;  %v2275_v2 = vadd.f32 %v2273_v44, %v9295_v6 }
 0xe6e   :  { %2281 = vmax.xlane.f32.xlu1 %v2280_v1 }
 0xe6f   :  { %v2277_v4 = vsel %vm648_vm6, %v2275_v2, -inf }
 0xe70   :  { %2278 = vmax.xlane.f32.xlu0 %v2277_v4  ;;  %v7536_v4 = vld [vmem:[%s10510_s16] ss:$0 sm:$0xff] }
 0xef7   :  { %v2282_v5 = vpop.xlane.xlu1 %2281 }
 0xef8   :  { %v2284_v7 = vsub.f32 %v2276_v0, %v2282_v5 }
 0xef9   :  { %v2279_v8 = vpop.xlane.xlu0 %2278 }
 0xefa   :  { %v2287_v10 = vmul.f32 1.442695, %v2284_v7  ;;  %v2283_v11 = vsub.f32 %v2275_v2, %v2279_v8 }
 0xefc   :  { %8903 = vpow2.f32 %v2287_v10  ;;  %v2285_v12 = vmul.f32 1.442695, %v2283_v11  ;;  %v7537_v11 = vld [vmem:[%s10511_s17] ss:$0 sm:$0xff] }
 0xefe   :  { %8905 = vpow2.f32 %v2285_v12 }
 0xf09   :  { %v8904_v13 = vpop.eup %8903 }
 0xf0a   :  { %v2292_v14 = vsel %vm648_vm6, %v8904_v13, 0.0 }
 0xf0b   :  { %v8906_v17 = vpop.eup %8905  ;;  %2293 = vadd.xlane.f32.xlu1 %v2292_v14 }
 0xf0c   :  { %v2289_v18 = vsel %vm648_vm6, %v8906_v17, 0.0 }
 0xf0d   :  { %2290 = vadd.xlane.f32.xlu0 %v2289_v18  ;;  %v7555_v18 = vld [vmem:[%s10547_s7 + $0x88] sm:$0xff] }
 0xf94   :  { %v2294_v19 = vpop.xlane.xlu1 %2293 }
 0xf95   :  { %8907 = vrcp.f32 %v2294_v19  ;;  %v7554_v19 = vld [vmem:[%s10547_s7 + $0x80] sm:$0xff] }
 0xf96   :  { %v2291_v20 = vpop.xlane.xlu0 %2290 }
 0xf97   :  { %8909 = vrcp.f32 %v2291_v20  ;;  %v7551_v20 = vld [vmem:[%s10507_s13 + $0x4] ss:$0 sm:$0xff] }
 0xfa2   :  { %v8908_v21 = vpop.eup %8907 }
 0xfa3   :  { %v2298_v22 = vmul.f32 %v8908_v21, %v8904_v13 }
 0xfa4   :  { %v8910_v25 = vpop.eup %8909 }
 0xfa5   :  { %v2297_v39 = vmul.f32 %v8910_v25, %v8906_v17  ;;  %v2466_v41 = vadd.f32 %v2298_v22, %v9458_v23  ;;  %v7556_v17 = vld [vmem:[%s10547_s7 + $0x90] sm:$0xff] }
 0xfa7   :  { %8430 = vmatprep.mubr.msk.f32.mxu0 %vm648_vm6, %v2297_v39  ;;  %v2465_v15 = vadd.f32 %v2297_v39, %v9461_v24  ;;  %v2468_v16 = vmul.f32 0.25, %v2466_v41  ;;  %v7543_v39 = vld [vmem:[%s10506_s12 + $0x4] ss:$0 sm:$0xff] }
 0xfa8   :  { %8431 = vmatmul.mubr.msk.f32.vlgmr.msra.gmra.mxu0 %vm648_vm6, %v2298_v22 }
 0xfa9   :  { %v2467_v26 = vmul.f32 0.25, %v2465_v15  ;;  %2470 = vst.msk [vmem:[#allocation3 + $0x8] sm:$0xff] %vm648_vm6, %v2468_v16  ;;  %8439 = vmatpush3.msra.mxu0 %v7541_v55 }
 0xfaa   :  { %8440 = vmatprep.subr.mxu0 %v7540_v57 }
 0xfab   :  { %2469 = vst.msk [vmem:[#allocation3] sm:$0xff] %vm648_vm6, %v2467_v26  ;;  %8441 = vmatpush3.msra.mxu0 %v7540_v57  ;;  %v7590_v57 = vld [vmem:[%s10508_s14 + $0x5] ss:$0 sm:$0xff] }
 0xfac   :  { %8442 = vmatprep.subr.mxu0 %v7539_v59 }
 0xfad   :  { %8443 = vmatpush3.msra.mxu0 %v7539_v59 }
 0xfae   :  { %8444 = vmatprep.subr.mxu0 %v7538_v61 }
 0xfaf   :  { %8445 = vmatpush3.msra.mxu0 %v7538_v61 }
 0xfb0   :  { %8460 = vmatprep.subr.mxu0 %v7557_v63 }
0x1068   :  { %v8432_v29 = vpop.f32.mrf.mxu0 }
0x106a   :  { %v2371_v23 = vpop.f32.mrf.mxu0 }
0x106b   :  { %8435 = vmatprep.mubr.msk.f32.mxu1 %vm94_vm0, %v2371_v23 }
0x106c   :  { %8436 = vmatmul.mubr.msk.f32.vlgmr.msra.gmra.mxu1 %vm94_vm0, %v8432_v29  ;;  %v7572_v29 = vld [vmem:[%s10542_s27 + $0xb8] sm:$0xff] }
0x112c   :  { %v8437_v24 = vpop.f32.mrf.mxu1 }
0x112d   :  { %v2464_v31 = vadd.f32 %v8437_v24, %v1919_v56  ;;  %v7549_v56 = vld [vmem:[%s10545_s28 + $0x98] sm:$0xff] }
0x112e   :  { %v2454_v32 = vpop.f32.mrf.mxu1  ;;  %8449 = vmatprep.subr.mxu1 %v7549_v56 }
0x112f   :  { %v2472_v34 = vadd.f32 %v2464_v31, %v9210_v36  ;;  %v2463_v37 = vadd.f32 %v2454_v32, %v9525_v58  ;;  %8450 = vmatpush3.msra.mxu1 %v7549_v56  ;;  %v7548_v58 = vld [vmem:[%s10545_s28 + $0x90] sm:$0xff] }
0x1130   :  { %8451 = vmatprep.subr.mxu1 %v7548_v58 }
0x1131   :  { %v2471_v38 = vadd.f32 %v2463_v37, %v9208_v35  ;;  %v2481_v40 = vadd.f32 %v7535_v33, %v2472_v34  ;;  %8452 = vmatpush3.msra.mxu1 %v7548_v58  ;;  %v7571_v34 = vld [vmem:[%s10542_s27 + $0xb0] sm:$0xff]  ;;  %v7570_v37 = vld [vmem:[%s10542_s27 + $0xa8] sm:$0xff] }
0x1132   :  { %8453 = vmatprep.subr.mxu1 %v7547_v60 }
0x1133   :  { %v2487_v42 = vsel %vm303_vm5, %v2481_v40, 0.0  ;;  %v2480_v45 = vadd.f32 %v7535_v33, %v2471_v38  ;;  %8454 = vmatpush3.msra.mxu1 %v7547_v60  ;;  %v7569_v38 = vld [vmem:[%s10542_s27 + $0xa0] sm:$0xff] }
0x1134   :  { %2488 = vadd.xlane.f32.xlu1 %v2487_v42  ;;  %8455 = vmatprep.subr.mxu1 %v7546_v62  ;;  %v7587_v42 = vld [vmem:[%s10547_s7 + $0xb0] sm:$0xff] }
0x1135   :  { %v2484_v46 = vsel %vm303_vm5, %v2480_v45, 0.0  ;;  %8456 = vmatpush3.msra.mxu1 %v7546_v62 }
0x1136   :  { %2485 = vadd.xlane.f32.xlu0 %v2484_v46  ;;  %v7585_v46 = vld [vmem:[%s10547_s7 + $0xa0] sm:$0xff] }
0x11bd   :  { %v2489_v47 = vpop.xlane.xlu1 %2488 }
0x11be   :  { %v2491_v48 = vmul.f32 0.03125, %v2489_v47 }
0x11bf   :  { %v2486_v49 = vpop.xlane.xlu0 %2485 }
0x11c0   :  { %v2493_v50 = vsub.f32 %v2481_v40, %v2491_v48  ;;  %v2490_v51 = vmul.f32 0.03125, %v2486_v49  ;;  %v7588_v40 = vld [vmem:[%s10547_s7 + $0xb8] sm:$0xff] }
0x11c2   :  { %v2492_v52 = vsub.f32 %v2480_v45, %v2490_v51  ;;  %v2495_v53 = vmul.f32 %v2493_v50, %v2493_v50  ;;  %v7586_v45 = vld [vmem:[%s10547_s7 + $0xa8] sm:$0xff] }
0x11c4   :  { %v2499_v36 = vsel %vm303_vm5, %v2495_v53, 0.0  ;;  %v2494_v54 = vmul.f32 %v2492_v52, %v2492_v52 }
0x11c5   :  { %2500 = vadd.xlane.f32.xlu1 %v2499_v36  ;;  %v7574_v36 = vld [vmem:[%s10506_s12 + $0x5] ss:$0 sm:$0xff] }
0x11c6   :  { %v2496_v35 = vsel %vm303_vm5, %v2494_v54, 0.0 }
0x11c7   :  { %2497 = vadd.xlane.f32.xlu0 %v2496_v35 }
0x124e   :  { %v2501_v27 = vpop.xlane.xlu1 %2500 }
0x124f   :  { %v2503_v30 = vmul.f32 0.03125, %v2501_v27 }
0x1250   :  { %v2498_v43 = vpop.xlane.xlu0 %2497 }
0x1251   :  { %v2505_v44 = vadd.f32 1e-05, %v2503_v30  ;;  %v2502_v0 = vmul.f32 0.03125, %v2498_v43 }
0x1253   :  { %8911 = vrsqrt.f32 %v2505_v44  ;;  %v2504_v1 = vadd.f32 1e-05, %v2502_v0 }
0x1255   :  { %8913 = vrsqrt.f32 %v2504_v1 }
0x1260   :  { %v8912_v2 = vpop.eup %8911 }
0x1261   :  { %v2509_v5 = vmul.f32 %v8912_v2, %v2493_v50  ;;  %v7580_v2 = vld [vmem:[%s10545_s28 + $0xb8] sm:$0xff] }
0x1262   :  { %v8914_v7 = vpop.eup %8913 }
0x1263   :  { %v2508_v8 = vmul.f32 %v8914_v7, %v2492_v52  ;;  %v2517_v10 = vmul.f32 %v7536_v4, %v2509_v5 }
0x1265   :  { %v2516_v12 = vmul.f32 %v7536_v4, %v2508_v8  ;;  %v9597_v14 = vadd.f32 %v7537_v11, %v2517_v10 }
0x1267   :  { %v9595_v13 = vadd.f32 %v7537_v11, %v2516_v12  ;;  %v7579_v12 = vld [vmem:[%s10545_s28 + $0xb0] sm:$0xff] }
0x1269   :  { %8446 = vmatprep.mubr.msk.f32.mxu0 %vm303_vm5, %v9595_v13  ;;  %8457 = vmatprep.mubr.msk.f32.mxu1 %vm303_vm5, %v9595_v13 }
0x126a   :  { %8447 = vmatmul.mubr.msk.f32.vlgmr.msra.gmra.mxu0 %vm303_vm5, %v9597_v14  ;;  %8458 = vmatmul.mubr.msk.f32.vlgmr.msra.gmra.mxu1 %vm303_vm5, %v9597_v14 }
0x126b   :  { %8461 = vmatpush3.msra.mxu0 %v7557_v63  ;;  %8468 = vmatprep.mubr.msk.f32.mxu0 %vm303_vm5, %v9595_v13 }
0x126c   :  { %8462 = vmatprep.subr.mxu0 %v7556_v17 }
0x126d   :  { %8463 = vmatpush3.msra.mxu0 %v7556_v17  ;;  %v7578_v17 = vld [vmem:[%s10545_s28 + $0xa8] sm:$0xff] }
0x126e   :  { %8464 = vmatprep.subr.mxu0 %v7555_v18 }
0x126f   :  { %8465 = vmatpush3.msra.mxu0 %v7555_v18  ;;  %v7577_v18 = vld [vmem:[%s10545_s28 + $0xa0] sm:$0xff] }
0x1270   :  { %8466 = vmatprep.subr.mxu0 %v7554_v19 }
0x1271   :  { %8467 = vmatpush3.msra.mxu0 %v7554_v19 }
0x1272   :  { %8469 = vmatmul.mubr.msk.f32.vlgmr.msra.gmra.mxu0 %vm303_vm5, %v9597_v14 }
0x132a   :  { %v8448_v21 = vpop.f32.mrf.mxu0  ;;  %v8459_v22 = vpop.f32.mrf.mxu1 }
0x132b   :  { %v2705_v25 = vadd.f32 %v8459_v22, %v7551_v20  ;;  %v2617_v24 = vadd.f32 %v8448_v21, %v7543_v39  ;;  %v7582_v22 = vld [vmem:[%s10507_s13 + $0x5] ss:$0 sm:$0xff] }
0x132c   :  { %v2611_v41 = vpop.f32.mrf.mxu0  ;;  %v2699_v15 = vpop.f32.mrf.mxu1 }
0x132d   :  { %v2612_v16 = vadd.f32 %v7543_v39, %v2611_v41  ;;  %v2700_v26 = vadd.f32 %v7551_v20, %v2699_v15  ;;  %8471 = vmatprep.subr.msk.mxu1 %vm94_vm0, %v2705_v25 }
0x132e   :  { %8472 = vmatpush3.xpose.msk.msra.mxu1 %vm94_vm0, %v2705_v25 }
0x132f   :  { %8473 = vmatprep.subr.msk.mxu1 %vm94_vm0, %v2700_v26  ;;  %8475 = vmatprep.mubr.msk.f32.mxu1 %vm94_vm0, %v2612_v16 }
0x1332   :  { %v8470_v23 = vpop.f32.mrf.mxu0  ;;  %8474 = vmatpush3.xpose.msk.msra.mxu1 %vm94_vm0, %v2700_v26 }
0x1333   :  { %v2793_v31 = vadd.f32 %v8470_v23, %v7559_v28  ;;  %8485 = vmatprep.subr.mxu1 %v7572_v29  ;;  %v9715_v23 = vld [vmem:[%s10548_s0 + $0x8] sm:$0xff] }
0x1334   :  { %v2787_v32 = vpop.f32.mrf.mxu0 }
0x1335   :  { %v2788_v33 = vadd.f32 %v7559_v28, %v2787_v32  ;;  %8478 = vmatprep.subr.mxu0 %v2793_v31  ;;  %8476 = vmatmul.mubr.msk.f32.vlgmr.msra.gmra.mxu1 %vm94_vm0, %v2617_v24  ;;  %v9722_v32 = vld [vmem:[%s10548_s0] sm:$0xff] }
0x1336   :  { %8479 = vmatpush3.msra.mxu0 %v2793_v31  ;;  %8486 = vmatpush3.msra.mxu1 %v7572_v29 }
0x1337   :  { %8480 = vmatprep.subr.mxu0 %v2788_v33  ;;  %8493 = vmatprep.mubr.msk.f32.mxu1 %vm303_vm5, %v9595_v13 }
0x1338   :  { %8481 = vmatpush3.msra.mxu0 %v2788_v33  ;;  %8487 = vmatprep.subr.mxu1 %v7571_v34 }
0x1339   :  { %8488 = vmatpush3.msra.mxu1 %v7571_v34  ;;  %8496 = vmatprep.subr.mxu0 %v7580_v2 }
0x133a   :  { %8489 = vmatprep.subr.mxu1 %v7570_v37 }
0x133b   :  { %8490 = vmatpush3.msra.mxu1 %v7570_v37 }
0x133c   :  { %8491 = vmatprep.subr.mxu1 %v7569_v38 }
0x133d   :  { %8492 = vmatpush3.msra.mxu1 %v7569_v38 }
0x133e   :  { %8494 = vmatmul.mubr.msk.f32.vlgmr.msra.gmra.mxu1 %vm303_vm5, %v9597_v14  ;;  %8507 = vmatprep.subr.mxu1 %v7588_v40 }
0x133f   :  { %8508 = vmatpush3.msra.mxu1 %v7588_v40  ;;  %8515 = vmatprep.mubr.msk.f32.mxu1 %vm303_vm5, %v9595_v13 }
0x1340   :  { %8509 = vmatprep.subr.mxu1 %v7587_v42 }
0x1341   :  { %8510 = vmatpush3.msra.mxu1 %v7587_v42 }
0x1342   :  { %8511 = vmatprep.subr.mxu1 %v7586_v45 }
0x1343   :  { %8512 = vmatpush3.msra.mxu1 %v7586_v45 }
0x1344   :  { %8513 = vmatprep.subr.mxu1 %v7585_v46 }
0x1345   :  { %8514 = vmatpush3.msra.mxu1 %v7585_v46 }
0x1346   :  { %8516 = vmatmul.mubr.msk.f32.vlgmr.msra.gmra.mxu1 %vm303_vm5, %v9597_v14 }
0x13f5   :  { %v8477_v47 = vpop.f32.mrf.mxu1 }
0x13f6   :  { %v2884_v48 = vmul.f32 0.35355338, %v8477_v47 }
0x13f7   :  { %v2874_v49 = vpop.f32.mrf.mxu1 }
0x13f8   :  { %v2883_v50 = vmul.f32 0.35355338, %v2874_v49  ;;  %v2886_v51 = vadd.f32 %v2884_v48, %v9300_v9 }
0x13fa   :  { %v2890_v52 = vsel %vm648_vm6, %v2886_v51, -inf  ;;  %v2885_v53 = vadd.f32 %v2883_v50, %v9295_v6 }
0x13fb   :  { %2891 = vmax.xlane.f32.xlu1 %v2890_v52 }
0x13fc   :  { %v2887_v54 = vsel %vm648_vm6, %v2885_v53, -inf }
0x13fd   :  { %2888 = vmax.xlane.f32.xlu0 %v2887_v54 }
0x13fe   :  { %v8495_v35 = vpop.f32.mrf.mxu1 }
0x13ff   :  { %v3077_v55 = vadd.f32 %v8495_v35, %v7574_v36 }
0x1400   :  { %v3071_v56 = vpop.f32.mrf.mxu1 }
0x1401   :  { %v3072_v19 = vadd.f32 %v7574_v36, %v3071_v56  ;;  %v7615_v56 = vld [vmem:[%s10545_s28 + $0xd8] sm:$0xff] }
0x1406   :  { %v8517_v9 = vpop.f32.mrf.mxu1 }
0x1407   :  { %v3253_v58 = vadd.f32 %v8517_v9, %v7590_v57  ;;  %v7613_v9 = vld [vmem:[%s10545_s28 + $0xc8] sm:$0xff] }
0x1408   :  { %v3247_v59 = vpop.f32.mrf.mxu1 }
0x1409   :  { %v3248_v60 = vadd.f32 %v7590_v57, %v3247_v59  ;;  %8525 = vmatprep.subr.mxu1 %v3253_v58  ;;  %v7614_v57 = vld [vmem:[%s10545_s28 + $0xd0] sm:$0xff]  ;;  %v7599_v59 = vld [vmem:[%s10505_s11 + $0x28] sm:$0xff] }
0x140a   :  { %8526 = vmatpush3.msra.mxu1 %v3253_v58  ;;  %v7612_v58 = vld [vmem:[%s10545_s28 + $0xc0] sm:$0xff] }
0x140b   :  { %8527 = vmatprep.subr.mxu1 %v3248_v60 }
0x140c   :  { %8528 = vmatpush3.msra.mxu1 %v3248_v60  ;;  %v7607_v60 = vld [vmem:[%s10542_s27 + $0xd8] sm:$0xff] }
0x1484   :  { %v2892_v6 = vpop.xlane.xlu1 %2891 }
0x1485   :  { %v2894_v61 = vsub.f32 %v2886_v51, %v2892_v6  ;;  %v7568_v51 = vld [vmem:[%s10505_s11 + $0x20] sm:$0xff] }
0x1486   :  { %v2889_v62 = vpop.xlane.xlu0 %2888  ;;  %8537 = vmatprep.subr.mxu1 %v7568_v51 }
0x1487   :  { %v2897_v63 = vmul.f32 1.442695, %v2894_v61  ;;  %v2893_v27 = vsub.f32 %v2885_v53, %v2889_v62  ;;  %v7606_v62 = vld [vmem:[%s10542_s27 + $0xd0] sm:$0xff] }
0x1489   :  { %8915 = vpow2.f32 %v2897_v63  ;;  %v2895_v30 = vmul.f32 1.442695, %v2893_v27  ;;  %v7605_v63 = vld [vmem:[%s10542_s27 + $0xc8] sm:$0xff] }
0x148b   :  { %8917 = vpow2.f32 %v2895_v30  ;;  %v7604_v30 = vld [vmem:[%s10542_s27 + $0xc0] sm:$0xff] }
0x1496   :  { %v8916_v43 = vpop.eup %8915 }
0x1497   :  { %v2902_v44 = vsel %vm648_vm6, %v8916_v43, 0.0 }
0x1498   :  { %v8918_v0 = vpop.eup %8917  ;;  %2903 = vadd.xlane.f32.xlu1 %v2902_v44 }
0x1499   :  { %v2899_v1 = vsel %vm648_vm6, %v8918_v0, 0.0 }
0x149a   :  { %2900 = vadd.xlane.f32.xlu0 %v2899_v1  ;;  %v7622_v1 = vld [vmem:[%s10547_s7 + $0xd0] sm:$0xff] }
0x1521   :  { %v2904_v4 = vpop.xlane.xlu1 %2903 }
0x1522   :  { %8919 = vrcp.f32 %v2904_v4 }
0x1523   :  { %v2901_v5 = vpop.xlane.xlu0 %2900 }
0x1524   :  { %8921 = vrcp.f32 %v2901_v5  ;;  %v7621_v5 = vld [vmem:[%s10547_s7 + $0xc8] sm:$0xff] }
0x152f   :  { %v8920_v7 = vpop.eup %8919 }
0x1530   :  { %v9684_v11 = vmul.f32 %v8920_v7, %v8916_v43  ;;  %v7623_v43 = vld [vmem:[%s10547_s7 + $0xd8] sm:$0xff] }
0x1531   :  { %v8922_v8 = vpop.eup %8921 }
0x1532   :  { %v9682_v10 = vmul.f32 %v8922_v8, %v8918_v0  ;;  %v7617_v0 = vld [vmem:[%s10507_s13 + $0x6] ss:$0 sm:$0xff] }
0x1534   :  { %8482 = vmatprep.mubr.msk.f32.mxu0 %vm648_vm6, %v9682_v10 }
0x1535   :  { %8483 = vmatmul.mubr.msk.f32.vlgmr.msra.gmra.mxu0 %vm648_vm6, %v9684_v11 }
0x1536   :  { %8497 = vmatpush3.msra.mxu0 %v7580_v2  ;;  %8504 = vmatprep.mubr.msk.f32.mxu0 %vm303_vm5, %v9595_v13 }
0x1537   :  { %8498 = vmatprep.subr.mxu0 %v7579_v12 }
0x1538   :  { %8499 = vmatpush3.msra.mxu0 %v7579_v12  ;;  %v7620_v12 = vld [vmem:[%s10547_s7 + $0xc0] sm:$0xff] }
0x1539   :  { %8500 = vmatprep.subr.mxu0 %v7578_v17 }
0x153a   :  { %8501 = vmatpush3.msra.mxu0 %v7578_v17 }
0x153b   :  { %8502 = vmatprep.subr.mxu0 %v7577_v18 }
0x153c   :  { %8503 = vmatpush3.msra.mxu0 %v7577_v18 }
0x153d   :  { %8505 = vmatmul.mubr.msk.f32.vlgmr.msra.gmra.mxu0 %vm303_vm5, %v9597_v14 }
0x153e   :  { %8522 = vmatprep.mubr.msk.f32.mxu0 %vm94_vm0, %v3072_v19 }
0x15f5   :  { %v8484_v20 = vpop.f32.mrf.mxu0 }
0x15f7   :  { %v2981_v21 = vpop.f32.mrf.mxu0 }
0x15fd   :  { %v8506_v25 = vpop.f32.mrf.mxu0 }
0x15fe   :  { %v3165_v39 = vadd.f32 %v8506_v25, %v7582_v22 }
0x15ff   :  { %v3159_v41 = vpop.f32.mrf.mxu0 }
0x1600   :  { %v3160_v15 = vadd.f32 %v7582_v22, %v3159_v41  ;;  %8518 = vmatprep.subr.msk.mxu0 %vm94_vm0, %v3165_v39 }
0x1601   :  { %8519 = vmatpush3.xpose.msk.msra.mxu0 %vm94_vm0, %v3165_v39  ;;  %v7625_v39 = vld [vmem:[%s10508_s14 + $0x6] ss:$0 sm:$0xff] }
0x1602   :  { %8520 = vmatprep.subr.msk.mxu0 %vm94_vm0, %v3160_v15 }
0x1605   :  { %8521 = vmatpush3.xpose.msk.msra.mxu0 %vm94_vm0, %v3160_v15 }
0x1606   :  { %8532 = vmatprep.subr.mxu0 %v7599_v59 }
0x1608   :  { %8523 = vmatmul.mubr.msk.f32.vlgmr.msra.gmra.mxu0 %vm94_vm0, %v3077_v55 }
0x1609   :  { %8533 = vmatpush3.msra.mxu0 %v7599_v59 }
0x160a   :  { %8542 = vmatprep.subr.mxu0 %v7607_v60 }
0x16c8   :  { %v8524_v16 = vpop.f32.mrf.mxu0 }
0x16c9   :  { %v3344_v26 = vmul.f32 0.35355338, %v8524_v16 }
0x16ca   :  { %v3334_v28 = vpop.f32.mrf.mxu0 }
0x16cb   :  { %v3343_v29 = vmul.f32 0.35355338, %v3334_v28  ;;  %v3346_v24 = vadd.f32 %v9715_v23, %v3344_v26 }
0x16cd   :  { %v3350_v31 = vsel %vm648_vm6, %v3346_v24, -inf  ;;  %v3345_v33 = vadd.f32 %v9722_v32, %v3343_v29 }
0x16ce   :  { %3351 = vmax.xlane.f32.xlu1 %v3350_v31 }
0x16cf   :  { %v3347_v34 = vsel %vm648_vm6, %v3345_v33, -inf }
0x16d0   :  { %3348 = vmax.xlane.f32.xlu0 %v3347_v34 }
0x1757   :  { %v3352_v37 = vpop.xlane.xlu1 %3351 }
0x1758   :  { %v3354_v38 = vsub.f32 %v3346_v24, %v3352_v37 }
0x1759   :  { %v3349_v40 = vpop.xlane.xlu0 %3348 }
0x175a   :  { %v3357_v42 = vmul.f32 1.442695, %v3354_v38  ;;  %v3353_v45 = vsub.f32 %v3345_v33, %v3349_v40 }
0x175c   :  { %8923 = vpow2.f32 %v3357_v42  ;;  %v3355_v46 = vmul.f32 1.442695, %v3353_v45 }
0x175e   :  { %8925 = vpow2.f32 %v3355_v46 }
0x1769   :  { %v8924_v47 = vpop.eup %8923 }
0x176a   :  { %v3362_v48 = vsel %vm648_vm6, %v8924_v47, 0.0 }
0x176b   :  { %v8926_v49 = vpop.eup %8925  ;;  %3363 = vadd.xlane.f32.xlu1 %v3362_v48 }
0x176c   :  { %v3359_v50 = vsel %vm648_vm6, %v8926_v49, 0.0 }
0x176d   :  { %3360 = vadd.xlane.f32.xlu0 %v3359_v50 }
0x17f4   :  { %v3364_v52 = vpop.xlane.xlu1 %3363 }
0x17f5   :  { %8927 = vrcp.f32 %v3364_v52 }
0x17f6   :  { %v3361_v53 = vpop.xlane.xlu0 %3360 }
0x17f7   :  { %8929 = vrcp.f32 %v3361_v53  ;;  %v7640_v53 = vld [vmem:[%s10542_s27 + $0xf8] sm:$0xff] }
0x1802   :  { %v8928_v36 = vpop.eup %8927 }
0x1803   :  { %v9733_v55 = vmul.f32 %v8928_v36, %v8924_v47 }
0x1804   :  { %v8930_v54 = vpop.eup %8929 }
0x1805   :  { %v9731_v35 = vmul.f32 %v8930_v54, %v8926_v49 }
0x1807   :  { %8529 = vmatprep.mubr.msk.f32.mxu1 %vm648_vm6, %v9731_v35  ;;  %v3614_v59 = vadd.f32 %v9731_v35, %v9682_v10  ;;  %v7638_v10 = vld [vmem:[%s10542_s27 + $0xe8] sm:$0xff]  ;;  %v7656_v35 = vld [vmem:[%s10547_s7 + $0xf8] sm:$0xff] }
0x1808   :  { %8530 = vmatmul.mubr.msk.f32.vlgmr.msra.gmra.mxu1 %vm648_vm6, %v9733_v55 }
0x1809   :  { %8539 = vmatprep.mubr.msk.f32.mxu1 %vm94_vm0, %v2981_v21  ;;  %8538 = vmatpush3.msra.mxu1 %v7568_v51 }
0x180a   :  { %8553 = vmatprep.subr.mxu1 %v7615_v56 }
0x180c   :  { %8540 = vmatmul.mubr.msk.f32.vlgmr.msra.gmra.mxu1 %vm94_vm0, %v8484_v20  ;;  %v7609_v20 = vld [vmem:[%s10506_s12 + $0x6] ss:$0 sm:$0xff] }
0x180d   :  { %8554 = vmatpush3.msra.mxu1 %v7615_v56  ;;  %8561 = vmatprep.mubr.msk.f32.mxu1 %vm303_vm5, %v9595_v13 }
0x180e   :  { %8555 = vmatprep.subr.mxu1 %v7614_v57 }
0x180f   :  { %8556 = vmatpush3.msra.mxu1 %v7614_v57  ;;  %v3615_v57 = vadd.f32 %v9733_v55, %v9684_v11  ;;  %v7637_v11 = vld [vmem:[%s10542_s27 + $0xe0] sm:$0xff]  ;;  %v7655_v55 = vld [vmem:[%s10547_s7 + $0xf0] sm:$0xff] }
0x1810   :  { %8557 = vmatprep.subr.mxu1 %v7613_v9 }
0x1811   :  { %8558 = vmatpush3.msra.mxu1 %v7613_v9 }
0x1812   :  { %8559 = vmatprep.subr.mxu1 %v7612_v58 }
0x1813   :  { %8560 = vmatpush3.msra.mxu1 %v7612_v58 }
0x1814   :  { %8562 = vmatmul.mubr.msk.f32.vlgmr.msra.gmra.mxu1 %vm303_vm5, %v9597_v14 }
0x18c8   :  { %v8531_v6 = vpop.f32.mrf.mxu1 }
0x18ca   :  { %v3441_v61 = vpop.f32.mrf.mxu1 }
0x18cb   :  { %8534 = vmatprep.mubr.msk.f32.mxu0 %vm94_vm0, %v3441_v61 }
0x18cc   :  { %8535 = vmatmul.mubr.msk.f32.vlgmr.msra.gmra.mxu0 %vm94_vm0, %v8531_v6  ;;  %v9773_v27 = vpop.f32.mrf.mxu1 }
0x18cd   :  { %8543 = vmatpush3.msra.mxu0 %v7607_v60  ;;  %8550 = vmatprep.mubr.msk.f32.mxu0 %vm303_vm5, %v9595_v13 }
0x18ce   :  { %8544 = vmatprep.subr.mxu0 %v7606_v62  ;;  %v9781_v44 = vpop.f32.mrf.mxu1 }
0x18cf   :  { %8545 = vmatpush3.msra.mxu0 %v7606_v62  ;;  %v7639_v62 = vld [vmem:[%s10542_s27 + $0xf0] sm:$0xff] }
0x18d0   :  { %8546 = vmatprep.subr.mxu0 %v7605_v63 }
0x18d1   :  { %8547 = vmatpush3.msra.mxu0 %v7605_v63  ;;  %v7654_v63 = vld [vmem:[%s10547_s7 + $0xe8] sm:$0xff] }
0x18d2   :  { %8548 = vmatprep.subr.mxu0 %v7604_v30 }
0x18d3   :  { %8549 = vmatpush3.msra.mxu0 %v7604_v30  ;;  %v7653_v30 = vld [vmem:[%s10547_s7 + $0xe0] sm:$0xff] }
0x18d4   :  { %8551 = vmatmul.mubr.msk.f32.vlgmr.msra.gmra.mxu0 %vm303_vm5, %v9597_v14  ;;  %v8563_v2 = vpop.f32.mrf.mxu1  ;;  %8564 = vmatprep.subr.mxu0 %v7623_v43 }
0x18d5   :  { %v3789_v4 = vadd.f32 %v8563_v2, %v7617_v0  ;;  %8565 = vmatpush3.msra.mxu0 %v7623_v43  ;;  %8572 = vmatprep.mubr.msk.f32.mxu0 %vm303_vm5, %v9595_v13  ;;  %v7634_v43 = vld [vmem:[%s10505_s11 + $0x30] sm:$0xff] }
0x18d6   :  { %v3783_v7 = vpop.f32.mrf.mxu1  ;;  %8566 = vmatprep.subr.mxu0 %v7622_v1 }
0x18d7   :  { %v3784_v8 = vadd.f32 %v7617_v0, %v3783_v7  ;;  %8567 = vmatpush3.msra.mxu0 %v7622_v1  ;;  %8575 = vmatprep.subr.msk.mxu1 %vm94_vm0, %v3789_v4  ;;  %v7648_v0 = vld [vmem:[%s10545_s28 + $0xf8] sm:$0xff]  ;;  %v7642_v7 = vld [vmem:[%s10506_s12 + $0x7] ss:$0 sm:$0xff] }
0x18d8   :  { %8568 = vmatprep.subr.mxu0 %v7621_v5  ;;  %8576 = vmatpush3.xpose.msk.msra.mxu1 %vm94_vm0, %v3789_v4  ;;  %v7647_v4 = vld [vmem:[%s10545_s28 + $0xf0] sm:$0xff] }
0x18d9   :  { %8569 = vmatpush3.msra.mxu0 %v7621_v5  ;;  %8577 = vmatprep.subr.msk.mxu1 %vm94_vm0, %v3784_v8  ;;  %v7646_v5 = vld [vmem:[%s10545_s28 + $0xe8] sm:$0xff] }
0x18da   :  { %8570 = vmatprep.subr.mxu0 %v7620_v12 }
0x18db   :  { %8571 = vmatpush3.msra.mxu0 %v7620_v12 }
0x18dc   :  { %8573 = vmatmul.mubr.msk.f32.vlgmr.msra.gmra.mxu0 %vm303_vm5, %v9597_v14  ;;  %8578 = vmatpush3.xpose.msk.msra.mxu1 %vm94_vm0, %v3784_v8  ;;  %v7645_v8 = vld [vmem:[%s10545_s28 + $0xe0] sm:$0xff] }
0x18dd   :  { %8589 = vmatprep.subr.mxu1 %v7634_v43 }
0x198c   :  { %v9805_v17 = vpop.f32.mrf.mxu0 }
0x198e   :  { %v9807_v18 = vpop.f32.mrf.mxu0 }
0x1994   :  { %v8552_v19 = vpop.f32.mrf.mxu0 }
0x1995   :  { %v3701_v25 = vadd.f32 %v8552_v19, %v7609_v20 }
0x1996   :  { %v3695_v21 = vpop.f32.mrf.mxu0 }
0x1997   :  { %v3696_v22 = vadd.f32 %v7609_v20, %v3695_v21 }
0x1999   :  { %8579 = vmatprep.mubr.msk.f32.mxu1 %vm94_vm0, %v3696_v22  ;;  %v7658_v22 = vld [vmem:[%s10508_s14 + $0x7] ss:$0 sm:$0xff] }
0x199a   :  { %8580 = vmatmul.mubr.msk.f32.vlgmr.msra.gmra.mxu1 %vm94_vm0, %v3701_v25 }
0x199b   :  { %8590 = vmatpush3.msra.mxu1 %v7634_v43 }
0x199c   :  { %v8574_v41 = vpop.f32.mrf.mxu0  ;;  %8605 = vmatprep.subr.mxu1 %v7648_v0 }
0x199d   :  { %v3877_v15 = vadd.f32 %v8574_v41, %v7625_v39 }
0x199e   :  { %v3871_v16 = vpop.f32.mrf.mxu0 }
0x199f   :  { %v3872_v26 = vadd.f32 %v7625_v39, %v3871_v16  ;;  %8582 = vmatprep.subr.mxu0 %v3877_v15  ;;  %v3611_v16 = vadd.f32 %v9773_v27, %v9805_v17 }
0x19a0   :  { %8583 = vmatpush3.msra.mxu0 %v3877_v15 }
0x19a1   :  { %8584 = vmatprep.subr.mxu0 %v3872_v26 }
0x19a2   :  { %8585 = vmatpush3.msra.mxu0 %v3872_v26 }
0x19a3   :  { %8594 = vmatprep.subr.mxu0 %v7640_v53 }
0x1a5a   :  { %v8581_v28 = vpop.f32.mrf.mxu1 }
0x1a5b   :  { %v3968_v29 = vmul.f32 0.35355338, %v8581_v28  ;;  %v3606_v28 = vadd.f32 %v9781_v44, %v9807_v18 }
0x1a5c   :  { %v3958_v24 = vpop.f32.mrf.mxu1 }
0x1a5d   :  { %v3967_v31 = vmul.f32 0.35355338, %v3958_v24  ;;  %v3970_v33 = vadd.f32 %v9715_v23, %v3968_v29 }
0x1a5f   :  { %v3974_v34 = vsel %vm648_vm6, %v3970_v33, -inf  ;;  %v3969_v37 = vadd.f32 %v9722_v32, %v3967_v31 }
0x1a60   :  { %3975 = vmax.xlane.f32.xlu1 %v3974_v34 }
0x1a61   :  { %v3971_v38 = vsel %vm648_vm6, %v3969_v37, -inf }
0x1a62   :  { %3972 = vmax.xlane.f32.xlu0 %v3971_v38 }
0x1ae9   :  { %v3976_v40 = vpop.xlane.xlu1 %3975 }
0x1aea   :  { %v3978_v42 = vsub.f32 %v3970_v33, %v3976_v40  ;;  %v7650_v33 = vld [vmem:[%s10507_s13 + $0x7] ss:$0 sm:$0xff] }
0x1aeb   :  { %v3973_v45 = vpop.xlane.xlu0 %3972 }
0x1aec   :  { %v3981_v46 = vmul.f32 1.442695, %v3978_v42  ;;  %v3977_v47 = vsub.f32 %v3969_v37, %v3973_v45 }
0x1aee   :  { %8931 = vpow2.f32 %v3981_v46  ;;  %v3979_v48 = vmul.f32 1.442695, %v3977_v47 }
0x1af0   :  { %8933 = vpow2.f32 %v3979_v48 }
0x1afb   :  { %v8932_v49 = vpop.eup %8931 }
0x1afc   :  { %v3986_v50 = vsel %vm648_vm6, %v8932_v49, 0.0 }
0x1afd   :  { %v8934_v51 = vpop.eup %8933  ;;  %3987 = vadd.xlane.f32.xlu1 %v3986_v50 }
0x1afe   :  { %v3983_v52 = vsel %vm648_vm6, %v8934_v51, 0.0 }
0x1aff   :  { %3984 = vadd.xlane.f32.xlu0 %v3983_v52 }
0x1b86   :  { %v3988_v36 = vpop.xlane.xlu1 %3987 }
0x1b87   :  { %8935 = vrcp.f32 %v3988_v36 }
0x1b88   :  { %v3985_v54 = vpop.xlane.xlu0 %3984 }
0x1b89   :  { %8937 = vrcp.f32 %v3985_v54 }
0x1b94   :  { %v8936_v56 = vpop.eup %8935 }
0x1b95   :  { %v3992_v9 = vmul.f32 %v8936_v56, %v8932_v49 }
0x1b96   :  { %v8938_v58 = vpop.eup %8937 }
0x1b97   :  { %v3991_v60 = vmul.f32 %v8938_v58, %v8934_v51  ;;  %v9830_v6 = vadd.f32 %v3992_v9, %v3615_v57 }
0x1b99   :  { %8586 = vmatprep.mubr.msk.f32.mxu0 %vm648_vm6, %v3991_v60  ;;  %v9833_v61 = vadd.f32 %v3991_v60, %v3614_v59 }
0x1b9a   :  { %8587 = vmatmul.mubr.msk.f32.vlgmr.msra.gmra.mxu0 %vm648_vm6, %v3992_v9 }
0x1b9b   :  { %8595 = vmatpush3.msra.mxu0 %v7640_v53  ;;  %8602 = vmatprep.mubr.msk.f32.mxu0 %vm303_vm5, %v9595_v13 }
0x1b9c   :  { %8596 = vmatprep.subr.mxu0 %v7639_v62 }
0x1b9d   :  { %8597 = vmatpush3.msra.mxu0 %v7639_v62 }
0x1b9e   :  { %8598 = vmatprep.subr.mxu0 %v7638_v10 }
0x1b9f   :  { %8599 = vmatpush3.msra.mxu0 %v7638_v10 }
0x1ba0   :  { %8600 = vmatprep.subr.mxu0 %v7637_v11 }
0x1ba1   :  { %8601 = vmatpush3.msra.mxu0 %v7637_v11 }
0x1ba2   :  { %8603 = vmatmul.mubr.msk.f32.vlgmr.msra.gmra.mxu0 %vm303_vm5, %v9597_v14  ;;  %8616 = vmatprep.subr.mxu0 %v7656_v35 }
0x1ba3   :  { %8617 = vmatpush3.msra.mxu0 %v7656_v35  ;;  %8624 = vmatprep.mubr.msk.f32.mxu0 %vm303_vm5, %v9595_v13 }
0x1ba4   :  { %8618 = vmatprep.subr.mxu0 %v7655_v55 }
0x1ba5   :  { %8619 = vmatpush3.msra.mxu0 %v7655_v55 }
0x1ba6   :  { %8620 = vmatprep.subr.mxu0 %v7654_v63 }
0x1ba7   :  { %8621 = vmatpush3.msra.mxu0 %v7654_v63 }
0x1ba8   :  { %8622 = vmatprep.subr.mxu0 %v7653_v30 }
0x1ba9   :  { %8623 = vmatpush3.msra.mxu0 %v7653_v30  ;;  %v7667_v30 = vld [vmem:[%s10505_s11 + $0x38] sm:$0xff] }
0x1baa   :  { %8625 = vmatmul.mubr.msk.f32.vlgmr.msra.gmra.mxu0 %vm303_vm5, %v9597_v14 }
0x1c5a   :  { %v8588_v1 = vpop.f32.mrf.mxu0 }
0x1c5c   :  { %v4065_v2 = vpop.f32.mrf.mxu0 }
0x1c5d   :  { %8591 = vmatprep.mubr.msk.f32.mxu1 %vm94_vm0, %v4065_v2  ;;  %v7671_v2 = vld [vmem:[%s10509_s15 + $0x1] ss:$0 sm:$0xff] }
0x1c5e   :  { %8592 = vmatmul.mubr.msk.f32.vlgmr.msra.gmra.mxu1 %vm94_vm0, %v8588_v1 }
0x1c5f   :  { %8606 = vmatpush3.msra.mxu1 %v7648_v0  ;;  %8613 = vmatprep.mubr.msk.f32.mxu1 %vm303_vm5, %v9595_v13 }
0x1c60   :  { %8607 = vmatprep.subr.mxu1 %v7647_v4 }
0x1c61   :  { %8608 = vmatpush3.msra.mxu1 %v7647_v4 }
0x1c62   :  { %v8604_v12 = vpop.f32.mrf.mxu0  ;;  %8609 = vmatprep.subr.mxu1 %v7646_v5 }
0x1c63   :  { %v4246_v19 = vadd.f32 %v8604_v12, %v7642_v7  ;;  %8610 = vmatpush3.msra.mxu1 %v7646_v5 }
0x1c64   :  { %v4240_v20 = vpop.f32.mrf.mxu0  ;;  %8611 = vmatprep.subr.mxu1 %v7645_v8 }
0x1c65   :  { %v4241_v21 = vadd.f32 %v7642_v7, %v4240_v20  ;;  %8612 = vmatpush3.msra.mxu1 %v7645_v8 }
0x1c66   :  { %8614 = vmatmul.mubr.msk.f32.vlgmr.msra.gmra.mxu1 %vm303_vm5, %v9597_v14 }
0x1c67   :  { %8631 = vmatprep.mubr.msk.f32.mxu1 %vm94_vm0, %v4241_v21 }
0x1c6a   :  { %v8626_v25 = vpop.f32.mrf.mxu0 }
0x1c6b   :  { %v4422_v39 = vadd.f32 %v8626_v25, %v7658_v22 }
0x1c6c   :  { %v4416_v41 = vpop.f32.mrf.mxu0 }
0x1c6d   :  { %v4417_v15 = vadd.f32 %v7658_v22, %v4416_v41  ;;  %8634 = vmatprep.subr.mxu0 %v4422_v39 }
0x1c6e   :  { %8635 = vmatpush3.msra.mxu0 %v4422_v39 }
0x1c6f   :  { %8636 = vmatprep.subr.mxu0 %v4417_v15 }
0x1c70   :  { %8637 = vmatpush3.msra.mxu0 %v4417_v15 }
0x1d1e   :  { %v8593_v26 = vpop.f32.mrf.mxu1 }
0x1d1f   :  { %v4158_v29 = vadd.f32 %v8593_v26, %v3611_v16 }
0x1d20   :  { %v4148_v24 = vpop.f32.mrf.mxu1 }
0x1d21   :  { %v9897_v31 = vadd.f32 %v4148_v24, %v3606_v28  ;;  %v7679_v28 = vld [vmem:[%s10542_s27 + $0x118] sm:$0xff]  ;;  %v7678_v24 = vld [vmem:[%s10542_s27 + $0x110] sm:$0xff] }
0x1d22   :  { %8646 = vmatprep.subr.mxu0 %v7679_v28 }
0x1d26   :  { %v8615_v34 = vpop.f32.mrf.mxu1 }
0x1d27   :  { %v4334_v37 = vadd.f32 %v8615_v34, %v7650_v33  ;;  %v7685_v34 = vld [vmem:[%s10545_s28 + $0x108] sm:$0xff] }
0x1d28   :  { %v4328_v38 = vpop.f32.mrf.mxu1 }
0x1d29   :  { %v4329_v40 = vadd.f32 %v7650_v33, %v4328_v38  ;;  %8627 = vmatprep.subr.msk.mxu1 %vm94_vm0, %v4334_v37  ;;  %v7677_v33 = vld [vmem:[%s10542_s27 + $0x108] sm:$0xff]  ;;  %v7684_v38 = vld [vmem:[%s10545_s28 + $0x100] sm:$0xff] }
0x1d2a   :  { %8628 = vmatpush3.xpose.msk.msra.mxu1 %vm94_vm0, %v4334_v37  ;;  %v7676_v37 = vld [vmem:[%s10542_s27 + $0x100] sm:$0xff] }
0x1d2b   :  { %8629 = vmatprep.subr.msk.mxu1 %vm94_vm0, %v4329_v40 }
0x1d2e   :  { %8630 = vmatpush3.xpose.msk.msra.mxu1 %vm94_vm0, %v4329_v40  ;;  %v7695_v40 = vld [vmem:[%s10547_s7 + $0x118] sm:$0xff] }
0x1d2f   :  { %8641 = vmatprep.subr.mxu1 %v7667_v30 }
0x1d31   :  { %8632 = vmatmul.mubr.msk.f32.vlgmr.msra.gmra.mxu1 %vm94_vm0, %v4246_v19 }
0x1d32   :  { %8642 = vmatpush3.msra.mxu1 %v7667_v30  ;;  %v7697_v30 = vld [vmem:[%s10508_s14 + $0x8] ss:$0 sm:$0xff] }
0x1df1   :  { %v8633_v27 = vpop.f32.mrf.mxu1 }
0x1df2   :  { %v4513_v44 = vmul.f32 0.35355338, %v8633_v27 }
0x1df3   :  { %v4503_v17 = vpop.f32.mrf.mxu1 }
0x1df4   :  { %v4512_v18 = vmul.f32 0.35355338, %v4503_v17  ;;  %v4515_v42 = vadd.f32 %v9715_v23, %v4513_v44 }
0x1df6   :  { %v4519_v45 = vsel %vm648_vm6, %v4515_v42, -inf  ;;  %v4514_v46 = vadd.f32 %v9722_v32, %v4512_v18 }
0x1df7   :  { %4520 = vmax.xlane.f32.xlu1 %v4519_v45 }
0x1df8   :  { %v4516_v47 = vsel %vm648_vm6, %v4514_v46, -inf }
0x1df9   :  { %4517 = vmax.xlane.f32.xlu0 %v4516_v47  ;;  %v7674_v47 = vld [vmem:[%s10510_s16 + $0x1] ss:$0 sm:$0xff] }
0x1e80   :  { %v4521_v48 = vpop.xlane.xlu1 %4520 }
0x1e81   :  { %v4523_v49 = vsub.f32 %v4515_v42, %v4521_v48 }
0x1e82   :  { %v4518_v50 = vpop.xlane.xlu0 %4517 }
0x1e83   :  { %v4526_v51 = vmul.f32 1.442695, %v4523_v49  ;;  %v4522_v52 = vsub.f32 %v4514_v46, %v4518_v50 }
0x1e85   :  { %8939 = vpow2.f32 %v4526_v51  ;;  %v4524_v53 = vmul.f32 1.442695, %v4522_v52  ;;  %v7675_v52 = vld [vmem:[%s10511_s17 + $0x1] ss:$0 sm:$0xff] }
0x1e87   :  { %8941 = vpow2.f32 %v4524_v53 }
0x1e92   :  { %v8940_v36 = vpop.eup %8939 }
0x1e93   :  { %v4531_v54 = vsel %vm648_vm6, %v8940_v36, 0.0 }
0x1e94   :  { %v8942_v56 = vpop.eup %8941  ;;  %4532 = vadd.xlane.f32.xlu1 %v4531_v54 }
0x1e95   :  { %v4528_v57 = vsel %vm648_vm6, %v8942_v56, 0.0 }
0x1e96   :  { %4529 = vadd.xlane.f32.xlu0 %v4528_v57  ;;  %v7693_v57 = vld [vmem:[%s10547_s7 + $0x108] sm:$0xff] }
0x1f1d   :  { %v4533_v9 = vpop.xlane.xlu1 %4532 }
0x1f1e   :  { %8943 = vrcp.f32 %v4533_v9  ;;  %v7692_v9 = vld [vmem:[%s10547_s7 + $0x100] sm:$0xff] }
0x1f1f   :  { %v4530_v58 = vpop.xlane.xlu0 %4529 }
0x1f20   :  { %8945 = vrcp.f32 %v4530_v58  ;;  %v7689_v58 = vld [vmem:[%s10507_s13 + $0x8] ss:$0 sm:$0xff] }
0x1f2b   :  { %v8944_v59 = vpop.eup %8943 }
0x1f2c   :  { %v4537_v60 = vmul.f32 %v8944_v59, %v8940_v36 }
0x1f2d   :  { %v8946_v62 = vpop.eup %8945 }
0x1f2e   :  { %v4536_v10 = vmul.f32 %v8946_v62, %v8942_v56  ;;  %v4705_v11 = vadd.f32 %v4537_v60, %v9830_v6  ;;  %v7694_v56 = vld [vmem:[%s10547_s7 + $0x110] sm:$0xff] }
0x1f30   :  { %8638 = vmatprep.mubr.msk.f32.mxu0 %vm648_vm6, %v4536_v10  ;;  %v4704_v35 = vadd.f32 %v4536_v10, %v9833_v61  ;;  %v4707_v55 = vmul.f32 0.25, %v4705_v11  ;;  %v7681_v10 = vld [vmem:[%s10506_s12 + $0x8] ss:$0 sm:$0xff] }
0x1f31   :  { %8639 = vmatmul.mubr.msk.f32.vlgmr.msra.gmra.mxu0 %vm648_vm6, %v4537_v60 }
0x1f32   :  { %v4706_v63 = vmul.f32 0.25, %v4704_v35  ;;  %4710 = vst.msk [vmem:[#allocation3 + $0x18] sm:$0xff] %vm648_vm6, %v4707_v55  ;;  %8647 = vmatpush3.msra.mxu0 %v7679_v28 }
0x1f33   :  { %8648 = vmatprep.subr.mxu0 %v7678_v24 }
0x1f34   :  { %4709 = vst.msk [vmem:[#allocation3 + $0x10] sm:$0xff] %vm648_vm6, %v4706_v63  ;;  %8649 = vmatpush3.msra.mxu0 %v7678_v24  ;;  %v7728_v24 = vld [vmem:[%s10508_s14 + $0x9] ss:$0 sm:$0xff] }
0x1f35   :  { %8650 = vmatprep.subr.mxu0 %v7677_v33 }
0x1f36   :  { %8651 = vmatpush3.msra.mxu0 %v7677_v33 }
0x1f37   :  { %8652 = vmatprep.subr.mxu0 %v7676_v37 }
0x1f38   :  { %8653 = vmatpush3.msra.mxu0 %v7676_v37 }
0x1f39   :  { %8668 = vmatprep.subr.mxu0 %v7695_v40 }
0x1ff1   :  { %v8640_v43 = vpop.f32.mrf.mxu0 }
0x1ff3   :  { %v4610_v6 = vpop.f32.mrf.mxu0 }
0x1ff4   :  { %8643 = vmatprep.mubr.msk.f32.mxu1 %vm94_vm0, %v4610_v6 }
0x1ff5   :  { %8644 = vmatmul.mubr.msk.f32.vlgmr.msra.gmra.mxu1 %vm94_vm0, %v8640_v43  ;;  %v7710_v43 = vld [vmem:[%s10542_s27 + $0x138] sm:$0xff] }
0x20b5   :  { %v8645_v61 = vpop.f32.mrf.mxu1 }
0x20b6   :  { %v4703_v0 = vadd.f32 %v8645_v61, %v4158_v29  ;;  %v7687_v29 = vld [vmem:[%s10545_s28 + $0x118] sm:$0xff] }
0x20b7   :  { %v4693_v1 = vpop.f32.mrf.mxu1  ;;  %8657 = vmatprep.subr.mxu1 %v7687_v29 }
0x20b8   :  { %v4712_v4 = vadd.f32 %v4703_v0, %v9597_v14  ;;  %v4702_v5 = vadd.f32 %v4693_v1, %v9897_v31  ;;  %8658 = vmatpush3.msra.mxu1 %v7687_v29  ;;  %v7686_v31 = vld [vmem:[%s10545_s28 + $0x110] sm:$0xff] }
0x20b9   :  { %8659 = vmatprep.subr.mxu1 %v7686_v31 }
0x20ba   :  { %v4711_v7 = vadd.f32 %v4702_v5, %v9595_v13  ;;  %v4722_v8 = vadd.f32 %v7671_v2, %v4712_v4  ;;  %8660 = vmatpush3.msra.mxu1 %v7686_v31  ;;  %v7709_v4 = vld [vmem:[%s10542_s27 + $0x130] sm:$0xff]  ;;  %v7708_v5 = vld [vmem:[%s10542_s27 + $0x128] sm:$0xff] }
0x20bb   :  { %8661 = vmatprep.subr.mxu1 %v7685_v34 }
0x20bc   :  { %v4730_v12 = vsel %vm303_vm5, %v4722_v8, 0.0  ;;  %v4721_v19 = vadd.f32 %v7671_v2, %v4711_v7  ;;  %8662 = vmatpush3.msra.mxu1 %v7685_v34  ;;  %v7707_v7 = vld [vmem:[%s10542_s27 + $0x120] sm:$0xff] }
0x20bd   :  { %4731 = vadd.xlane.f32.xlu1 %v4730_v12  ;;  %8663 = vmatprep.subr.mxu1 %v7684_v38  ;;  %v7725_v12 = vld [vmem:[%s10547_s7 + $0x130] sm:$0xff] }
0x20be   :  { %v4727_v20 = vsel %vm303_vm5, %v4721_v19, 0.0  ;;  %8664 = vmatpush3.msra.mxu1 %v7684_v38 }
0x20bf   :  { %4728 = vadd.xlane.f32.xlu0 %v4727_v20  ;;  %v7723_v20 = vld [vmem:[%s10547_s7 + $0x120] sm:$0xff] }
0x2146   :  { %v4732_v21 = vpop.xlane.xlu1 %4731 }
0x2147   :  { %v4734_v22 = vmul.f32 0.03125, %v4732_v21 }
0x2148   :  { %v4729_v25 = vpop.xlane.xlu0 %4728 }
0x2149   :  { %v4736_v39 = vsub.f32 %v4722_v8, %v4734_v22  ;;  %v4733_v41 = vmul.f32 0.03125, %v4729_v25  ;;  %v7726_v8 = vld [vmem:[%s10547_s7 + $0x138] sm:$0xff] }
0x214b   :  { %v4735_v15 = vsub.f32 %v4721_v19, %v4733_v41  ;;  %v4738_v16 = vmul.f32 %v4736_v39, %v4736_v39  ;;  %v7724_v19 = vld [vmem:[%s10547_s7 + $0x128] sm:$0xff] }
0x214d   :  { %v4742_v14 = vsel %vm303_vm5, %v4738_v16, 0.0  ;;  %v4737_v26 = vmul.f32 %v4735_v15, %v4735_v15 }
0x214e   :  { %4743 = vadd.xlane.f32.xlu1 %v4742_v14  ;;  %v7712_v14 = vld [vmem:[%s10506_s12 + $0x9] ss:$0 sm:$0xff] }
0x214f   :  { %v4739_v13 = vsel %vm303_vm5, %v4737_v26, 0.0 }
0x2150   :  { %4740 = vadd.xlane.f32.xlu0 %v4739_v13 }
0x21d7   :  { %v4744_v27 = vpop.xlane.xlu1 %4743 }
0x21d8   :  { %v4746_v44 = vmul.f32 0.03125, %v4744_v27 }
0x21d9   :  { %v4741_v17 = vpop.xlane.xlu0 %4740 }
0x21da   :  { %v4748_v18 = vadd.f32 1e-05, %v4746_v44  ;;  %v4745_v42 = vmul.f32 0.03125, %v4741_v17 }
0x21dc   :  { %8947 = vrsqrt.f32 %v4748_v18  ;;  %v4747_v45 = vadd.f32 1e-05, %v4745_v42 }
0x21de   :  { %8949 = vrsqrt.f32 %v4747_v45 }
0x21e9   :  { %v8948_v46 = vpop.eup %8947 }
0x21ea   :  { %v4752_v48 = vmul.f32 %v8948_v46, %v4736_v39 }
0x21eb   :  { %v8950_v49 = vpop.eup %8949 }
0x21ec   :  { %v4751_v50 = vmul.f32 %v8950_v49, %v4735_v15  ;;  %v4760_v51 = vmul.f32 %v7674_v47, %v4752_v48  ;;  %v7718_v48 = vld [vmem:[%s10545_s28 + $0x138] sm:$0xff] }
0x21ee   :  { %v4759_v53 = vmul.f32 %v7674_v47, %v4751_v50  ;;  %v9969_v54 = vadd.f32 %v7675_v52, %v4760_v51 }
0x21f0   :  { %v9967_v36 = vadd.f32 %v7675_v52, %v4759_v53 }
0x21f2   :  { %8654 = vmatprep.mubr.msk.f32.mxu0 %vm303_vm5, %v9967_v36  ;;  %8665 = vmatprep.mubr.msk.f32.mxu1 %vm303_vm5, %v9967_v36 }
0x21f3   :  { %8655 = vmatmul.mubr.msk.f32.vlgmr.msra.gmra.mxu0 %vm303_vm5, %v9969_v54  ;;  %8666 = vmatmul.mubr.msk.f32.vlgmr.msra.gmra.mxu1 %vm303_vm5, %v9969_v54 }
0x21f4   :  { %8669 = vmatpush3.msra.mxu0 %v7695_v40  ;;  %8676 = vmatprep.mubr.msk.f32.mxu0 %vm303_vm5, %v9967_v36 }
0x21f5   :  { %8670 = vmatprep.subr.mxu0 %v7694_v56 }
0x21f6   :  { %8671 = vmatpush3.msra.mxu0 %v7694_v56 }
0x21f7   :  { %8672 = vmatprep.subr.mxu0 %v7693_v57 }
0x21f8   :  { %8673 = vmatpush3.msra.mxu0 %v7693_v57  ;;  %v7717_v57 = vld [vmem:[%s10545_s28 + $0x130] sm:$0xff] }
0x21f9   :  { %8674 = vmatprep.subr.mxu0 %v7692_v9 }
0x21fa   :  { %8675 = vmatpush3.msra.mxu0 %v7692_v9  ;;  %v7716_v9 = vld [vmem:[%s10545_s28 + $0x128] sm:$0xff] }
0x21fb   :  { %8677 = vmatmul.mubr.msk.f32.vlgmr.msra.gmra.mxu0 %vm303_vm5, %v9969_v54 }
0x22b3   :  { %v8656_v59 = vpop.f32.mrf.mxu0  ;;  %v8667_v60 = vpop.f32.mrf.mxu1 }
0x22b4   :  { %v4948_v62 = vadd.f32 %v8667_v60, %v7689_v58  ;;  %v4860_v61 = vadd.f32 %v8656_v59, %v7681_v10 }
0x22b5   :  { %v4854_v11 = vpop.f32.mrf.mxu0  ;;  %v4942_v35 = vpop.f32.mrf.mxu1 }
0x22b6   :  { %v4855_v55 = vadd.f32 %v7681_v10, %v4854_v11  ;;  %v4943_v63 = vadd.f32 %v7689_v58, %v4942_v35  ;;  %8679 = vmatprep.subr.msk.mxu1 %vm94_vm0, %v4948_v62  ;;  %v7715_v58 = vld [vmem:[%s10545_s28 + $0x120] sm:$0xff]  ;;  %v7720_v10 = vld [vmem:[%s10507_s13 + $0x9] ss:$0 sm:$0xff] }
0x22b7   :  { %8680 = vmatpush3.xpose.msk.msra.mxu1 %vm94_vm0, %v4948_v62 }
0x22b8   :  { %8681 = vmatprep.subr.msk.mxu1 %vm94_vm0, %v4943_v63  ;;  %8683 = vmatprep.mubr.msk.f32.mxu1 %vm94_vm0, %v4855_v55 }
0x22bb   :  { %v8678_v6 = vpop.f32.mrf.mxu0  ;;  %8682 = vmatpush3.xpose.msk.msra.mxu1 %vm94_vm0, %v4943_v63 }
0x22bc   :  { %v5036_v0 = vadd.f32 %v8678_v6, %v7697_v30  ;;  %8693 = vmatprep.subr.mxu1 %v7710_v43 }
0x22bd   :  { %v5030_v1 = vpop.f32.mrf.mxu0 }
0x22be   :  { %v5031_v2 = vadd.f32 %v7697_v30, %v5030_v1  ;;  %8686 = vmatprep.subr.mxu0 %v5036_v0  ;;  %8684 = vmatmul.mubr.msk.f32.vlgmr.msra.gmra.mxu1 %vm94_vm0, %v4860_v61 }
0x22bf   :  { %8687 = vmatpush3.msra.mxu0 %v5036_v0  ;;  %8694 = vmatpush3.msra.mxu1 %v7710_v43 }
0x22c0   :  { %8688 = vmatprep.subr.mxu0 %v5031_v2  ;;  %8701 = vmatprep.mubr.msk.f32.mxu1 %vm303_vm5, %v9967_v36 }
0x22c1   :  { %8689 = vmatpush3.msra.mxu0 %v5031_v2  ;;  %8695 = vmatprep.subr.mxu1 %v7709_v4 }
0x22c2   :  { %8696 = vmatpush3.msra.mxu1 %v7709_v4  ;;  %8704 = vmatprep.subr.mxu0 %v7718_v48 }
0x22c3   :  { %8697 = vmatprep.subr.mxu1 %v7708_v5 }
0x22c4   :  { %8698 = vmatpush3.msra.mxu1 %v7708_v5 }
0x22c5   :  { %8699 = vmatprep.subr.mxu1 %v7707_v7 }
0x22c6   :  { %8700 = vmatpush3.msra.mxu1 %v7707_v7 }
0x22c7   :  { %8702 = vmatmul.mubr.msk.f32.vlgmr.msra.gmra.mxu1 %vm303_vm5, %v9969_v54  ;;  %8715 = vmatprep.subr.mxu1 %v7726_v8 }
0x22c8   :  { %8716 = vmatpush3.msra.mxu1 %v7726_v8  ;;  %8723 = vmatprep.mubr.msk.f32.mxu1 %vm303_vm5, %v9967_v36 }
0x22c9   :  { %8717 = vmatprep.subr.mxu1 %v7725_v12 }
0x22ca   :  { %8718 = vmatpush3.msra.mxu1 %v7725_v12 }
0x22cb   :  { %8719 = vmatprep.subr.mxu1 %v7724_v19 }
0x22cc   :  { %8720 = vmatpush3.msra.mxu1 %v7724_v19 }
0x22cd   :  { %8721 = vmatprep.subr.mxu1 %v7723_v20 }
0x22ce   :  { %8722 = vmatpush3.msra.mxu1 %v7723_v20 }
0x22cf   :  { %8724 = vmatmul.mubr.msk.f32.vlgmr.msra.gmra.mxu1 %vm303_vm5, %v9969_v54 }
0x237e   :  { %v8685_v21 = vpop.f32.mrf.mxu1 }
0x237f   :  { %v5127_v22 = vmul.f32 0.35355338, %v8685_v21 }
0x2380   :  { %v5117_v25 = vpop.f32.mrf.mxu1 }
0x2381   :  { %v5126_v39 = vmul.f32 0.35355338, %v5117_v25  ;;  %v5129_v41 = vadd.f32 %v9715_v23, %v5127_v22 }
0x2383   :  { %v5133_v15 = vsel %vm648_vm6, %v5129_v41, -inf  ;;  %v5128_v16 = vadd.f32 %v9722_v32, %v5126_v39 }
0x2384   :  { %5134 = vmax.xlane.f32.xlu1 %v5133_v15 }
0x2385   :  { %v5130_v26 = vsel %vm648_vm6, %v5128_v16, -inf }
0x2386   :  { %5131 = vmax.xlane.f32.xlu0 %v5130_v26 }
0x2387   :  { %v8703_v13 = vpop.f32.mrf.mxu1 }
0x2388   :  { %v5320_v28 = vadd.f32 %v8703_v13, %v7712_v14  ;;  %v7753_v13 = vld [vmem:[%s10545_s28 + $0x158] sm:$0xff] }
0x2389   :  { %v5314_v29 = vpop.f32.mrf.mxu1 }
0x238a   :  { %v5315_v59 = vadd.f32 %v7712_v14, %v5314_v29  ;;  %v7751_v29 = vld [vmem:[%s10545_s28 + $0x148] sm:$0xff] }
0x238f   :  { %v8725_v31 = vpop.f32.mrf.mxu1 }
0x2390   :  { %v5496_v33 = vadd.f32 %v8725_v31, %v7728_v24  ;;  %v7737_v31 = vld [vmem:[%s10505_s11 + $0x48] sm:$0xff] }
0x2391   :  { %v5490_v34 = vpop.f32.mrf.mxu1 }
0x2392   :  { %v5491_v37 = vadd.f32 %v7728_v24, %v5490_v34  ;;  %8733 = vmatprep.subr.mxu1 %v5496_v33  ;;  %v7750_v24 = vld [vmem:[%s10545_s28 + $0x140] sm:$0xff] }
0x2393   :  { %8734 = vmatpush3.msra.mxu1 %v5496_v33  ;;  %v7745_v33 = vld [vmem:[%s10542_s27 + $0x158] sm:$0xff] }
0x2394   :  { %8735 = vmatprep.subr.mxu1 %v5491_v37 }
0x2395   :  { %8736 = vmatpush3.msra.mxu1 %v5491_v37 }
0x240d   :  { %v5135_v38 = vpop.xlane.xlu1 %5134 }
0x240e   :  { %v5137_v40 = vsub.f32 %v5129_v41, %v5135_v38  ;;  %v7744_v38 = vld [vmem:[%s10542_s27 + $0x150] sm:$0xff] }
0x240f   :  { %v5132_v27 = vpop.xlane.xlu0 %5131 }
0x2410   :  { %v5140_v44 = vmul.f32 1.442695, %v5137_v40  ;;  %v5136_v17 = vsub.f32 %v5128_v16, %v5132_v27  ;;  %v7743_v40 = vld [vmem:[%s10542_s27 + $0x148] sm:$0xff] }
0x2412   :  { %8951 = vpow2.f32 %v5140_v44  ;;  %v5138_v18 = vmul.f32 1.442695, %v5136_v17  ;;  %v7742_v44 = vld [vmem:[%s10542_s27 + $0x140] sm:$0xff]  ;;  %v7761_v17 = vld [vmem:[%s10547_s7 + $0x158] sm:$0xff] }
0x2414   :  { %8953 = vpow2.f32 %v5138_v18 }
0x241f   :  { %v8952_v42 = vpop.eup %8951 }
0x2420   :  { %v5145_v45 = vsel %vm648_vm6, %v8952_v42, 0.0 }
0x2421   :  { %v8954_v46 = vpop.eup %8953  ;;  %5146 = vadd.xlane.f32.xlu1 %v5145_v45  ;;  %v7760_v45 = vld [vmem:[%s10547_s7 + $0x150] sm:$0xff] }
0x2422   :  { %v5142_v47 = vsel %vm648_vm6, %v8954_v46, 0.0 }
0x2423   :  { %5143 = vadd.xlane.f32.xlu0 %v5142_v47 }
0x24aa   :  { %v5147_v49 = vpop.xlane.xlu1 %5146 }
0x24ab   :  { %8955 = vrcp.f32 %v5147_v49 }
0x24ac   :  { %v5144_v50 = vpop.xlane.xlu0 %5143 }
0x24ad   :  { %8957 = vrcp.f32 %v5144_v50 }
0x24b8   :  { %v8956_v51 = vpop.eup %8955 }
0x24b9   :  { %v10056_v56 = vmul.f32 %v8956_v51, %v8952_v42  ;;  %v7755_v42 = vld [vmem:[%s10507_s13 + $0xa] ss:$0 sm:$0xff]  ;;  %v7758_v51 = vld [vmem:[%s10547_s7 + $0x140] sm:$0xff] }
0x24ba   :  { %v8958_v52 = vpop.eup %8957 }
0x24bb   :  { %v10054_v53 = vmul.f32 %v8958_v52, %v8954_v46 }
0x24bd   :  { %8690 = vmatprep.mubr.msk.f32.mxu0 %vm648_vm6, %v10054_v53 }
0x24be   :  { %8691 = vmatmul.mubr.msk.f32.vlgmr.msra.gmra.mxu0 %vm648_vm6, %v10056_v56 }
0x24bf   :  { %8705 = vmatpush3.msra.mxu0 %v7718_v48  ;;  %8712 = vmatprep.mubr.msk.f32.mxu0 %vm303_vm5, %v9967_v36  ;;  %v7759_v48 = vld [vmem:[%s10547_s7 + $0x148] sm:$0xff] }
0x24c0   :  { %8706 = vmatprep.subr.mxu0 %v7717_v57 }
0x24c1   :  { %8707 = vmatpush3.msra.mxu0 %v7717_v57 }
0x24c2   :  { %8708 = vmatprep.subr.mxu0 %v7716_v9 }
0x24c3   :  { %8709 = vmatpush3.msra.mxu0 %v7716_v9 }
0x24c4   :  { %8710 = vmatprep.subr.mxu0 %v7715_v58 }
0x24c5   :  { %8711 = vmatpush3.msra.mxu0 %v7715_v58  ;;  %v7747_v58 = vld [vmem:[%s10506_s12 + $0xa] ss:$0 sm:$0xff] }
0x24c6   :  { %8713 = vmatmul.mubr.msk.f32.vlgmr.msra.gmra.mxu0 %vm303_vm5, %v9969_v54 }
0x24c7   :  { %8730 = vmatprep.mubr.msk.f32.mxu0 %vm94_vm0, %v5315_v59 }
0x257e   :  { %v8692_v60 = vpop.f32.mrf.mxu0 }
0x2580   :  { %v5224_v62 = vpop.f32.mrf.mxu0 }
0x2586   :  { %v8714_v11 = vpop.f32.mrf.mxu0 }
0x2587   :  { %v5408_v35 = vadd.f32 %v8714_v11, %v7720_v10 }
0x2588   :  { %v5402_v55 = vpop.f32.mrf.mxu0 }
0x2589   :  { %v5403_v63 = vadd.f32 %v7720_v10, %v5402_v55  ;;  %8726 = vmatprep.subr.msk.mxu0 %vm94_vm0, %v5408_v35  ;;  %v7763_v10 = vld [vmem:[%s10508_s14 + $0xa] ss:$0 sm:$0xff] }
0x258a   :  { %8727 = vmatpush3.xpose.msk.msra.mxu0 %vm94_vm0, %v5408_v35 }
0x258b   :  { %8728 = vmatprep.subr.msk.mxu0 %vm94_vm0, %v5403_v63 }
0x258e   :  { %8729 = vmatpush3.xpose.msk.msra.mxu0 %vm94_vm0, %v5403_v63 }
0x258f   :  { %8740 = vmatprep.subr.mxu0 %v7737_v31 }
0x2591   :  { %8731 = vmatmul.mubr.msk.f32.vlgmr.msra.gmra.mxu0 %vm94_vm0, %v5320_v28  ;;  %v7752_v28 = vld [vmem:[%s10545_s28 + $0x150] sm:$0xff] }
0x2592   :  { %8741 = vmatpush3.msra.mxu0 %v7737_v31 }
0x2593   :  { %8750 = vmatprep.subr.mxu0 %v7745_v33 }
0x2651   :  { %v8732_v30 = vpop.f32.mrf.mxu0 }
0x2652   :  { %v5587_v43 = vmul.f32 0.35355338, %v8732_v30 }
0x2653   :  { %v5577_v6 = vpop.f32.mrf.mxu0 }
0x2654   :  { %v5586_v61 = vmul.f32 0.35355338, %v5577_v6  ;;  %v5589_v0 = vadd.f32 %v9715_v23, %v5587_v43 }
0x2656   :  { %v5593_v1 = vsel %vm648_vm6, %v5589_v0, -inf  ;;  %v5588_v2 = vadd.f32 %v9722_v32, %v5586_v61  ;;  %v7706_v32 = vld [vmem:[%s10505_s11 + $0x40] sm:$0xff] }
0x2657   :  { %5594 = vmax.xlane.f32.xlu1 %v5593_v1  ;;  %8745 = vmatprep.subr.mxu1 %v7706_v32 }
0x2658   :  { %v5590_v4 = vsel %vm648_vm6, %v5588_v2, -inf }
0x2659   :  { %5591 = vmax.xlane.f32.xlu0 %v5590_v4  ;;  %v10189_v4 = vld [vmem:[%s10548_s0] sm:$0xff] }
0x26e0   :  { %v5595_v5 = vpop.xlane.xlu1 %5594 }
0x26e1   :  { %v5597_v7 = vsub.f32 %v5589_v0, %v5595_v5  ;;  %v10182_v0 = vld [vmem:[%s10548_s0 + $0x8] sm:$0xff] }
0x26e2   :  { %v5592_v8 = vpop.xlane.xlu0 %5591 }
0x26e3   :  { %v5600_v12 = vmul.f32 1.442695, %v5597_v7  ;;  %v5596_v19 = vsub.f32 %v5588_v2, %v5592_v8 }
0x26e5   :  { %8959 = vpow2.f32 %v5600_v12  ;;  %v5598_v20 = vmul.f32 1.442695, %v5596_v19 }
0x26e7   :  { %8961 = vpow2.f32 %v5598_v20 }
0x26f2   :  { %v8960_v21 = vpop.eup %8959 }
0x26f3   :  { %v5605_v22 = vsel %vm648_vm6, %v8960_v21, 0.0 }
0x26f4   :  { %v8962_v23 = vpop.eup %8961  ;;  %5606 = vadd.xlane.f32.xlu1 %v5605_v22 }
0x26f5   :  { %v5602_v25 = vsel %vm648_vm6, %v8962_v23, 0.0 }
0x26f6   :  { %5603 = vadd.xlane.f32.xlu0 %v5602_v25 }
0x277d   :  { %v5607_v39 = vpop.xlane.xlu1 %5606 }
0x277e   :  { %8963 = vrcp.f32 %v5607_v39 }
0x277f   :  { %v5604_v41 = vpop.xlane.xlu0 %5603 }
0x2780   :  { %8965 = vrcp.f32 %v5604_v41  ;;  %v7778_v41 = vld [vmem:[%s10542_s27 + $0x178] sm:$0xff] }
0x278b   :  { %v8964_v15 = vpop.eup %8963 }
0x278c   :  { %v10095_v26 = vmul.f32 %v8964_v15, %v8960_v21 }
0x278d   :  { %v8966_v16 = vpop.eup %8965 }
0x278e   :  { %v10093_v14 = vmul.f32 %v8966_v16, %v8962_v23 }
0x2790   :  { %8737 = vmatprep.mubr.msk.f32.mxu1 %vm648_vm6, %v10093_v14  ;;  %v5857_v31 = vadd.f32 %v10093_v14, %v10054_v53  ;;  %v7776_v53 = vld [vmem:[%s10542_s27 + $0x168] sm:$0xff]  ;;  %v7794_v14 = vld [vmem:[%s10547_s7 + $0x178] sm:$0xff] }
0x2791   :  { %8738 = vmatmul.mubr.msk.f32.vlgmr.msra.gmra.mxu1 %vm648_vm6, %v10095_v26 }
0x2792   :  { %8747 = vmatprep.mubr.msk.f32.mxu1 %vm94_vm0, %v5224_v62  ;;  %8746 = vmatpush3.msra.mxu1 %v7706_v32 }
0x2793   :  { %8761 = vmatprep.subr.mxu1 %v7753_v13 }
0x2795   :  { %8748 = vmatmul.mubr.msk.f32.vlgmr.msra.gmra.mxu1 %vm94_vm0, %v8692_v60 }
0x2796   :  { %8762 = vmatpush3.msra.mxu1 %v7753_v13  ;;  %8769 = vmatprep.mubr.msk.f32.mxu1 %vm303_vm5, %v9967_v36 }
0x2797   :  { %8763 = vmatprep.subr.mxu1 %v7752_v28 }
0x2798   :  { %8764 = vmatpush3.msra.mxu1 %v7752_v28  ;;  %v5858_v28 = vadd.f32 %v10095_v26, %v10056_v56  ;;  %v7775_v56 = vld [vmem:[%s10542_s27 + $0x160] sm:$0xff]  ;;  %v7793_v26 = vld [vmem:[%s10547_s7 + $0x170] sm:$0xff] }
0x2799   :  { %8765 = vmatprep.subr.mxu1 %v7751_v29 }
0x279a   :  { %8766 = vmatpush3.msra.mxu1 %v7751_v29 }
0x279b   :  { %8767 = vmatprep.subr.mxu1 %v7750_v24 }
0x279c   :  { %8768 = vmatpush3.msra.mxu1 %v7750_v24 }
0x279d   :  { %8770 = vmatmul.mubr.msk.f32.vlgmr.msra.gmra.mxu1 %vm303_vm5, %v9969_v54 }
0x2851   :  { %v8739_v34 = vpop.f32.mrf.mxu1 }
0x2853   :  { %v5684_v37 = vpop.f32.mrf.mxu1 }
0x2854   :  { %8742 = vmatprep.mubr.msk.f32.mxu0 %vm94_vm0, %v5684_v37 }
0x2855   :  { %8743 = vmatmul.mubr.msk.f32.vlgmr.msra.gmra.mxu0 %vm94_vm0, %v8739_v34  ;;  %v10135_v27 = vpop.f32.mrf.mxu1 }
0x2856   :  { %8751 = vmatpush3.msra.mxu0 %v7745_v33  ;;  %8758 = vmatprep.mubr.msk.f32.mxu0 %vm303_vm5, %v9967_v36 }
0x2857   :  { %8752 = vmatprep.subr.mxu0 %v7744_v38  ;;  %v10143_v18 = vpop.f32.mrf.mxu1 }
0x2858   :  { %8753 = vmatpush3.msra.mxu0 %v7744_v38  ;;  %v7777_v38 = vld [vmem:[%s10542_s27 + $0x170] sm:$0xff] }
0x2859   :  { %8754 = vmatprep.subr.mxu0 %v7743_v40 }
0x285a   :  { %8755 = vmatpush3.msra.mxu0 %v7743_v40  ;;  %v7792_v40 = vld [vmem:[%s10547_s7 + $0x168] sm:$0xff] }
0x285b   :  { %8756 = vmatprep.subr.mxu0 %v7742_v44 }
0x285c   :  { %8757 = vmatpush3.msra.mxu0 %v7742_v44  ;;  %v7791_v44 = vld [vmem:[%s10547_s7 + $0x160] sm:$0xff] }
0x285d   :  { %8759 = vmatmul.mubr.msk.f32.vlgmr.msra.gmra.mxu0 %vm303_vm5, %v9969_v54  ;;  %v8771_v46 = vpop.f32.mrf.mxu1  ;;  %8772 = vmatprep.subr.mxu0 %v7761_v17 }
0x285e   :  { %v6032_v47 = vadd.f32 %v8771_v46, %v7755_v42  ;;  %8773 = vmatpush3.msra.mxu0 %v7761_v17  ;;  %8780 = vmatprep.mubr.msk.f32.mxu0 %vm303_vm5, %v9967_v36  ;;  %v7772_v17 = vld [vmem:[%s10505_s11 + $0x50] sm:$0xff] }
0x285f   :  { %v6026_v49 = vpop.f32.mrf.mxu1  ;;  %8774 = vmatprep.subr.mxu0 %v7760_v45 }
0x2860   :  { %v6027_v50 = vadd.f32 %v7755_v42, %v6026_v49  ;;  %8775 = vmatpush3.msra.mxu0 %v7760_v45  ;;  %8783 = vmatprep.subr.msk.mxu1 %vm94_vm0, %v6032_v47  ;;  %v7786_v42 = vld [vmem:[%s10545_s28 + $0x178] sm:$0xff]  ;;  %v7780_v49 = vld [vmem:[%s10506_s12 + $0xb] ss:$0 sm:$0xff] }
0x2861   :  { %8776 = vmatprep.subr.mxu0 %v7759_v48  ;;  %8784 = vmatpush3.xpose.msk.msra.mxu1 %vm94_vm0, %v6032_v47  ;;  %v7785_v47 = vld [vmem:[%s10545_s28 + $0x170] sm:$0xff] }
0x2862   :  { %8777 = vmatpush3.msra.mxu0 %v7759_v48  ;;  %8785 = vmatprep.subr.msk.mxu1 %vm94_vm0, %v6027_v50  ;;  %v7784_v48 = vld [vmem:[%s10545_s28 + $0x168] sm:$0xff] }
0x2863   :  { %8778 = vmatprep.subr.mxu0 %v7758_v51 }
0x2864   :  { %8779 = vmatpush3.msra.mxu0 %v7758_v51 }
0x2865   :  { %8781 = vmatmul.mubr.msk.f32.vlgmr.msra.gmra.mxu0 %vm303_vm5, %v9969_v54  ;;  %8786 = vmatpush3.xpose.msk.msra.mxu1 %vm94_vm0, %v6027_v50  ;;  %v7783_v50 = vld [vmem:[%s10545_s28 + $0x160] sm:$0xff] }
0x2866   :  { %8797 = vmatprep.subr.mxu1 %v7772_v17 }
0x2915   :  { %v10167_v52 = vpop.f32.mrf.mxu0 }
0x2917   :  { %v10169_v57 = vpop.f32.mrf.mxu0 }
0x291d   :  { %v8760_v9 = vpop.f32.mrf.mxu0 }
0x291e   :  { %v5944_v62 = vadd.f32 %v8760_v9, %v7747_v58 }
0x291f   :  { %v5938_v59 = vpop.f32.mrf.mxu0 }
0x2920   :  { %v5939_v60 = vadd.f32 %v7747_v58, %v5938_v59 }
0x2922   :  { %8787 = vmatprep.mubr.msk.f32.mxu1 %vm94_vm0, %v5939_v60  ;;  %v7796_v60 = vld [vmem:[%s10508_s14 + $0xb] ss:$0 sm:$0xff] }
0x2923   :  { %8788 = vmatmul.mubr.msk.f32.vlgmr.msra.gmra.mxu1 %vm94_vm0, %v5944_v62 }
0x2924   :  { %8798 = vmatpush3.msra.mxu1 %v7772_v17 }
0x2925   :  { %v8782_v11 = vpop.f32.mrf.mxu0  ;;  %8813 = vmatprep.subr.mxu1 %v7786_v42 }
0x2926   :  { %v6120_v35 = vadd.f32 %v8782_v11, %v7763_v10 }
0x2927   :  { %v6114_v55 = vpop.f32.mrf.mxu0 }
0x2928   :  { %v6115_v63 = vadd.f32 %v7763_v10, %v6114_v55  ;;  %8790 = vmatprep.subr.mxu0 %v6120_v35  ;;  %v5854_v55 = vadd.f32 %v10135_v27, %v10167_v52 }
0x2929   :  { %8791 = vmatpush3.msra.mxu0 %v6120_v35 }
0x292a   :  { %8792 = vmatprep.subr.mxu0 %v6115_v63 }
0x292b   :  { %8793 = vmatpush3.msra.mxu0 %v6115_v63 }
0x292c   :  { %8802 = vmatprep.subr.mxu0 %v7778_v41 }
0x29e3   :  { %v8789_v30 = vpop.f32.mrf.mxu1 }
0x29e4   :  { %v6211_v43 = vmul.f32 0.35355338, %v8789_v30  ;;  %v5849_v30 = vadd.f32 %v10143_v18, %v10169_v57 }
0x29e5   :  { %v6201_v6 = vpop.f32.mrf.mxu1 }
0x29e6   :  { %v6210_v61 = vmul.f32 0.35355338, %v6201_v6  ;;  %v6213_v1 = vadd.f32 %v10182_v0, %v6211_v43 }
0x29e8   :  { %v6217_v2 = vsel %vm648_vm6, %v6213_v1, -inf  ;;  %v6212_v5 = vadd.f32 %v10189_v4, %v6210_v61 }
0x29e9   :  { %6218 = vmax.xlane.f32.xlu1 %v6217_v2 }
0x29ea   :  { %v6214_v7 = vsel %vm648_vm6, %v6212_v5, -inf }
0x29eb   :  { %6215 = vmax.xlane.f32.xlu0 %v6214_v7 }
0x2a72   :  { %v6219_v8 = vpop.xlane.xlu1 %6218 }
0x2a73   :  { %v6221_v12 = vsub.f32 %v6213_v1, %v6219_v8  ;;  %v7788_v1 = vld [vmem:[%s10507_s13 + $0xb] ss:$0 sm:$0xff] }
0x2a74   :  { %v6216_v19 = vpop.xlane.xlu0 %6215 }
0x2a75   :  { %v6224_v20 = vmul.f32 1.442695, %v6221_v12  ;;  %v6220_v21 = vsub.f32 %v6212_v5, %v6216_v19 }
0x2a77   :  { %8967 = vpow2.f32 %v6224_v20  ;;  %v6222_v22 = vmul.f32 1.442695, %v6220_v21 }
0x2a79   :  { %8969 = vpow2.f32 %v6222_v22 }
0x2a84   :  { %v8968_v23 = vpop.eup %8967 }
0x2a85   :  { %v6229_v25 = vsel %vm648_vm6, %v8968_v23, 0.0 }
0x2a86   :  { %v8970_v32 = vpop.eup %8969  ;;  %6230 = vadd.xlane.f32.xlu1 %v6229_v25 }
0x2a87   :  { %v6226_v39 = vsel %vm648_vm6, %v8970_v32, 0.0 }
0x2a88   :  { %6227 = vadd.xlane.f32.xlu0 %v6226_v39 }
0x2b0f   :  { %v6231_v15 = vpop.xlane.xlu1 %6230 }
0x2b10   :  { %8971 = vrcp.f32 %v6231_v15 }
0x2b11   :  { %v6228_v16 = vpop.xlane.xlu0 %6227 }
0x2b12   :  { %8973 = vrcp.f32 %v6228_v16 }
0x2b1d   :  { %v8972_v13 = vpop.eup %8971 }
0x2b1e   :  { %v6235_v29 = vmul.f32 %v8972_v13, %v8968_v23 }
0x2b1f   :  { %v8974_v24 = vpop.eup %8973 }
0x2b20   :  { %v6234_v33 = vmul.f32 %v8974_v24, %v8970_v32  ;;  %v10202_v34 = vadd.f32 %v6235_v29, %v5858_v28 }
0x2b22   :  { %8794 = vmatprep.mubr.msk.f32.mxu0 %vm648_vm6, %v6234_v33  ;;  %v10205_v37 = vadd.f32 %v6234_v33, %v5857_v31 }
0x2b23   :  { %8795 = vmatmul.mubr.msk.f32.vlgmr.msra.gmra.mxu0 %vm648_vm6, %v6235_v29 }
0x2b24   :  { %8803 = vmatpush3.msra.mxu0 %v7778_v41  ;;  %8810 = vmatprep.mubr.msk.f32.mxu0 %vm303_vm5, %v9967_v36 }
0x2b25   :  { %8804 = vmatprep.subr.mxu0 %v7777_v38 }
0x2b26   :  { %8805 = vmatpush3.msra.mxu0 %v7777_v38 }
0x2b27   :  { %8806 = vmatprep.subr.mxu0 %v7776_v53 }
0x2b28   :  { %8807 = vmatpush3.msra.mxu0 %v7776_v53 }
0x2b29   :  { %8808 = vmatprep.subr.mxu0 %v7775_v56 }
0x2b2a   :  { %8809 = vmatpush3.msra.mxu0 %v7775_v56 }
0x2b2b   :  { %8811 = vmatmul.mubr.msk.f32.vlgmr.msra.gmra.mxu0 %vm303_vm5, %v9969_v54  ;;  %8824 = vmatprep.subr.mxu0 %v7794_v14 }
0x2b2c   :  { %8825 = vmatpush3.msra.mxu0 %v7794_v14  ;;  %8832 = vmatprep.mubr.msk.f32.mxu0 %vm303_vm5, %v9967_v36 }
0x2b2d   :  { %8826 = vmatprep.subr.mxu0 %v7793_v26 }
0x2b2e   :  { %8827 = vmatpush3.msra.mxu0 %v7793_v26  ;;  %v7805_v26 = vld [vmem:[%s10505_s11 + $0x58] sm:$0xff] }
0x2b2f   :  { %8828 = vmatprep.subr.mxu0 %v7792_v40 }
0x2b30   :  { %8829 = vmatpush3.msra.mxu0 %v7792_v40 }
0x2b31   :  { %8830 = vmatprep.subr.mxu0 %v7791_v44 }
0x2b32   :  { %8831 = vmatpush3.msra.mxu0 %v7791_v44 }
0x2b33   :  { %8833 = vmatmul.mubr.msk.f32.vlgmr.msra.gmra.mxu0 %vm303_vm5, %v9969_v54 }
0x2be3   :  { %v8796_v45 = vpop.f32.mrf.mxu0 }
0x2be5   :  { %v6308_v46 = vpop.f32.mrf.mxu0 }
0x2be6   :  { %8799 = vmatprep.mubr.msk.f32.mxu1 %vm94_vm0, %v6308_v46 }
0x2be7   :  { %8800 = vmatmul.mubr.msk.f32.vlgmr.msra.gmra.mxu1 %vm94_vm0, %v8796_v45 }
0x2be8   :  { %8814 = vmatpush3.msra.mxu1 %v7786_v42  ;;  %8821 = vmatprep.mubr.msk.f32.mxu1 %vm303_vm5, %v9967_v36  ;;  %v7809_v42 = vld [vmem:[%s10509_s15 + $0x2] ss:$0 sm:$0xff] }
0x2be9   :  { %8815 = vmatprep.subr.mxu1 %v7785_v47 }
0x2bea   :  { %8816 = vmatpush3.msra.mxu1 %v7785_v47 }
0x2beb   :  { %v8812_v51 = vpop.f32.mrf.mxu0  ;;  %8817 = vmatprep.subr.mxu1 %v7784_v48 }
0x2bec   :  { %v6489_v9 = vadd.f32 %v8812_v51, %v7780_v49  ;;  %8818 = vmatpush3.msra.mxu1 %v7784_v48 }
0x2bed   :  { %v6483_v58 = vpop.f32.mrf.mxu0  ;;  %8819 = vmatprep.subr.mxu1 %v7783_v50 }
0x2bee   :  { %v6484_v59 = vadd.f32 %v7780_v49, %v6483_v58  ;;  %8820 = vmatpush3.msra.mxu1 %v7783_v50 }
0x2bef   :  { %8822 = vmatmul.mubr.msk.f32.vlgmr.msra.gmra.mxu1 %vm303_vm5, %v9969_v54 }
0x2bf0   :  { %8839 = vmatprep.mubr.msk.f32.mxu1 %vm94_vm0, %v6484_v59 }
0x2bf3   :  { %v8834_v62 = vpop.f32.mrf.mxu0 }
0x2bf4   :  { %v6665_v10 = vadd.f32 %v8834_v62, %v7796_v60 }
0x2bf5   :  { %v6659_v11 = vpop.f32.mrf.mxu0 }
0x2bf6   :  { %v6660_v35 = vadd.f32 %v7796_v60, %v6659_v11  ;;  %8842 = vmatprep.subr.mxu0 %v6665_v10 }
0x2bf7   :  { %8843 = vmatpush3.msra.mxu0 %v6665_v10 }
0x2bf8   :  { %8844 = vmatprep.subr.mxu0 %v6660_v35 }
0x2bf9   :  { %8845 = vmatpush3.msra.mxu0 %v6660_v35 }
0x2ca7   :  { %v8801_v63 = vpop.f32.mrf.mxu1 }
0x2ca8   :  { %v6401_v43 = vadd.f32 %v8801_v63, %v5854_v55  ;;  %v7019_v55 = vld [vmem:[%s10512_s18 + $0x38] sm:$0xff]  ;;  %v7018_v63 = vld [vmem:[%s10512_s18 + $0x30] sm:$0xff] }
0x2ca9   :  { %v6391_v6 = vpop.f32.mrf.mxu1  ;;  %7050 = vmatprep.subr.mxu0 %v7019_v55  ;;  %v7106_v55 = vld [vmem:[%s10513_s19 + $0x18] sm:$0xff] }
0x2caa   :  { %v10269_v61 = vadd.f32 %v6391_v6, %v5849_v30  ;;  %v7017_v30 = vld [vmem:[%s10512_s18 + $0x28] sm:$0xff]  ;;  %v7015_v6 = vld [vmem:[%s10512_s18 + $0x18] sm:$0xff] }
0x2caf   :  { %v8823_v2 = vpop.f32.mrf.mxu1 }
0x2cb0   :  { %v6577_v5 = vadd.f32 %v8823_v2, %v7788_v1  ;;  %v7012_v2 = vld [vmem:[%s10512_s18] sm:$0xff] }
0x2cb1   :  { %v6571_v7 = vpop.f32.mrf.mxu1 }
0x2cb2   :  { %v6572_v8 = vadd.f32 %v7788_v1, %v6571_v7  ;;  %8835 = vmatprep.subr.msk.mxu1 %vm94_vm0, %v6577_v5  ;;  %v7013_v1 = vld [vmem:[%s10512_s18 + $0x8] sm:$0xff]  ;;  %v7126_v7 = vld [vmem:[%s10514_s20 + $0x78] sm:$0xff] }
0x2cb3   :  { %8836 = vmatpush3.xpose.msk.msra.mxu1 %vm94_vm0, %v6577_v5  ;;  %v7142_v5 = vld [vmem:[%s10514_s20 + $0xf8] sm:$0xff] }
0x2cb4   :  { %8837 = vmatprep.subr.msk.mxu1 %vm94_vm0, %v6572_v8 }
0x2cb7   :  { %8838 = vmatpush3.xpose.msk.msra.mxu1 %vm94_vm0, %v6572_v8  ;;  %v7141_v8 = vld [vmem:[%s10514_s20 + $0xf0] sm:$0xff] }
0x2cb8   :  { %8849 = vmatprep.subr.mxu1 %v7805_v26 }
0x2cba   :  { %8840 = vmatmul.mubr.msk.f32.vlgmr.msra.gmra.mxu1 %vm94_vm0, %v6489_v9 }
0x2cbb   :  { %8850 = vmatpush3.msra.mxu1 %v7805_v26 }
0x2cbc   :  { %8174 = vmatprep.subr.mxu1 %v7142_v5 }
0x2d7a   :  { %v8841_v27 = vpop.f32.mrf.mxu1 }
0x2d7b   :  { %v6756_v18 = vmul.f32 0.35355338, %v8841_v27  ;;  %v7125_v27 = vld [vmem:[%s10514_s20 + $0x70] sm:$0xff] }
0x2d7c   :  { %v6746_v52 = vpop.f32.mrf.mxu1 }
0x2d7d   :  { %v6755_v57 = vmul.f32 0.35355338, %v6746_v52  ;;  %v6758_v12 = vadd.f32 %v10182_v0, %v6756_v18  ;;  %v7140_v18 = vld [vmem:[%s10514_s20 + $0xe8] sm:$0xff] }
0x2d7e   :  { %v7124_v52 = vld [vmem:[%s10514_s20 + $0x68] sm:$0xff] }
0x2d7f   :  { %v6762_v19 = vsel %vm648_vm6, %v6758_v12, -inf  ;;  %v6757_v20 = vadd.f32 %v10189_v4, %v6755_v57  ;;  %v7139_v57 = vld [vmem:[%s10514_s20 + $0xe0] sm:$0xff] }
0x2d80   :  { %6763 = vmax.xlane.f32.xlu1 %v6762_v19  ;;  %v7138_v19 = vld [vmem:[%s10514_s20 + $0xd8] sm:$0xff] }
0x2d81   :  { %v6759_v21 = vsel %vm648_vm6, %v6757_v20, -inf }
0x2d82   :  { %6760 = vmax.xlane.f32.xlu0 %v6759_v21  ;;  %v7137_v21 = vld [vmem:[%s10514_s20 + $0xd0] sm:$0xff] }
0x2e09   :  { %v6764_v22 = vpop.xlane.xlu1 %6763 }
0x2e0a   :  { %v6766_v23 = vsub.f32 %v6758_v12, %v6764_v22  ;;  %v7123_v12 = vld [vmem:[%s10514_s20 + $0x60] sm:$0xff]  ;;  %v7121_v22 = vld [vmem:[%s10514_s20 + $0x50] sm:$0xff] }
0x2e0b   :  { %v6761_v25 = vpop.xlane.xlu0 %6760 }
0x2e0c   :  { %v6769_v32 = vmul.f32 1.442695, %v6766_v23  ;;  %v6765_v39 = vsub.f32 %v6757_v20, %v6761_v25  ;;  %v7122_v20 = vld [vmem:[%s10514_s20 + $0x58] sm:$0xff]  ;;  %v7136_v23 = vld [vmem:[%s10514_s20 + $0xc8] sm:$0xff] }
0x2e0d   :  { %v7120_v25 = vld [vmem:[%s10514_s20 + $0x48] sm:$0xff] }
0x2e0e   :  { %8975 = vpow2.f32 %v6769_v32  ;;  %v6767_v41 = vmul.f32 1.442695, %v6765_v39  ;;  %v7135_v32 = vld [vmem:[%s10514_s20 + $0xc0] sm:$0xff] }
0x2e0f   :  { %v7119_v39 = vld [vmem:[%s10514_s20 + $0x40] sm:$0xff] }
0x2e10   :  { %8977 = vpow2.f32 %v6767_v41  ;;  %v7134_v41 = vld [vmem:[%s10514_s20 + $0xb8] sm:$0xff] }
0x2e1b   :  { %v8976_v15 = vpop.eup %8975 }
0x2e1c   :  { %v6774_v16 = vsel %vm648_vm6, %v8976_v15, 0.0 }
0x2e1d   :  { %v8978_v0 = vpop.eup %8977  ;;  %6775 = vadd.xlane.f32.xlu1 %v6774_v16  ;;  %v7133_v16 = vld [vmem:[%s10514_s20 + $0xb0] sm:$0xff] }
0x2e1e   :  { %v6771_v13 = vsel %vm648_vm6, %v8978_v0, 0.0 }
0x2e1f   :  { %6772 = vadd.xlane.f32.xlu0 %v6771_v13  ;;  %v7132_v13 = vld [vmem:[%s10514_s20 + $0xa8] sm:$0xff] }
0x2ea6   :  { %v6776_v4 = vpop.xlane.xlu1 %6775 }
0x2ea7   :  { %8979 = vrcp.f32 %v6776_v4  ;;  %v7116_v4 = vld [vmem:[%s10514_s20 + $0x28] sm:$0xff] }
0x2ea8   :  { %v6773_v28 = vpop.xlane.xlu0 %6772 }
0x2ea9   :  { %8981 = vrcp.f32 %v6773_v28  ;;  %v7131_v28 = vld [vmem:[%s10514_s20 + $0xa0] sm:$0xff] }
0x2eb4   :  { %v8980_v29 = vpop.eup %8979 }
0x2eb5   :  { %v6780_v24 = vmul.f32 %v8980_v29, %v8976_v15  ;;  %v7118_v15 = vld [vmem:[%s10514_s20 + $0x38] sm:$0xff]  ;;  %v7115_v29 = vld [vmem:[%s10514_s20 + $0x20] sm:$0xff] }
0x2eb6   :  { %v8982_v31 = vpop.eup %8981 }
0x2eb7   :  { %v6779_v33 = vmul.f32 %v8982_v31, %v8978_v0  ;;  %v6948_v38 = vadd.f32 %v6780_v24, %v10202_v34  ;;  %v7117_v0 = vld [vmem:[%s10514_s20 + $0x30] sm:$0xff]  ;;  %v7114_v31 = vld [vmem:[%s10514_s20 + $0x18] sm:$0xff] }
0x2eb9   :  { %8846 = vmatprep.mubr.msk.f32.mxu0 %vm648_vm6, %v6779_v33  ;;  %v6947_v53 = vadd.f32 %v6779_v33, %v10205_v37  ;;  %v6950_v56 = vmul.f32 0.25, %v6948_v38 }
0x2eba   :  { %8847 = vmatmul.mubr.msk.f32.vlgmr.msra.gmra.mxu0 %vm648_vm6, %v6780_v24  ;;  %v7130_v24 = vld [vmem:[%s10514_s20 + $0x98] sm:$0xff] }
0x2ebb   :  { %v6949_v14 = vmul.f32 0.25, %v6947_v53  ;;  %6953 = vst.msk [vmem:[#allocation3 + $0x28] sm:$0xff] %vm648_vm6, %v6950_v56  ;;  %7090 = vmatprep.mubr.f32.mxu0 %v9017_v3  ;;  %7051 = vmatpush1.msra.mxu0 %v7018_v63  ;;  %v7105_v63 = vld [vmem:[%s10513_s19 + $0x10] sm:$0xff] }
0x2ebc   :  { %7052 = vmatprep.subr.mxu0 %v7017_v30 }
0x2ebd   :  { %6952 = vst.msk [vmem:[#allocation3 + $0x20] sm:$0xff] %vm648_vm6, %v6949_v14 }
0x2f7a   :  { %v8848_v34 = vpop.f32.mrf.mxu0 }
0x2f7c   :  { %v6853_v40 = vpop.f32.mrf.mxu0 }
0x2f7d   :  { %8851 = vmatprep.mubr.msk.f32.mxu1 %vm94_vm0, %v6853_v40 }
0x2f7e   :  { %8852 = vmatmul.mubr.msk.f32.vlgmr.msra.gmra.mxu1 %vm94_vm0, %v8848_v34 }
0x2f7f   :  { %8175 = vmatpush3.msra.mxu1 %v7126_v7 }
0x2f80   :  { %8176 = vmatprep.subr.mxu1 %v7141_v8 }
0x2f81   :  { %8177 = vmatpush3.msra.mxu1 %v7125_v27  ;;  %v7218_v27 = vld [vmem:[%s10515_s21] sm:$0x3] }
0x2f82   :  { %8178 = vmatprep.subr.mxu1 %v7140_v18  ;;  %v7303_v18 = vld [vmem:[%s10517_s23 + $0x18] sm:$0xff] }
0x2f83   :  { %8179 = vmatpush3.msra.mxu1 %v7124_v52  ;;  %v7302_v52 = vld [vmem:[%s10517_s23 + $0x10] sm:$0xff] }
0x2f84   :  { %8180 = vmatprep.subr.mxu1 %v7139_v57  ;;  %v7301_v57 = vld [vmem:[%s10517_s23 + $0x8] sm:$0xff] }
0x2f85   :  { %8181 = vmatpush3.msra.mxu1 %v7123_v12  ;;  %v7300_v12 = vld [vmem:[%s10517_s23] sm:$0xff] }
0x2f86   :  { %8182 = vmatprep.subr.mxu1 %v7138_v19  ;;  %v7816_v19 = vld [vmem:[%s10516_s22] ss:$0 sm:$0xff] }
0x2f87   :  { %8183 = vmatpush3.msra.mxu1 %v7122_v20 }
0x2f88   :  { %8184 = vmatprep.subr.mxu1 %v7137_v21 }
0x2f89   :  { %8185 = vmatpush3.msra.mxu1 %v7121_v22 }
0x2f8a   :  { %8186 = vmatprep.subr.mxu1 %v7136_v23 }
0x2f8b   :  { %8187 = vmatpush3.msra.mxu1 %v7120_v25 }
0x2f8c   :  { %8188 = vmatprep.subr.mxu1 %v7135_v32 }
0x2f8d   :  { %8189 = vmatpush3.msra.mxu1 %v7119_v39 }
0x2f8e   :  { %8190 = vmatprep.subr.mxu1 %v7134_v41 }
0x2f8f   :  { %8191 = vmatpush3.msra.mxu1 %v7118_v15 }
0x2f90   :  { %8192 = vmatprep.subr.mxu1 %v7133_v16 }
0x2f91   :  { %8193 = vmatpush3.msra.mxu1 %v7117_v0 }
0x2f92   :  { %8194 = vmatprep.subr.mxu1 %v7132_v13 }
0x2f93   :  { %8195 = vmatpush3.msra.mxu1 %v7116_v4 }
0x2f94   :  { %8196 = vmatprep.subr.mxu1 %v7131_v28 }
0x2f95   :  { %8197 = vmatpush3.msra.mxu1 %v7115_v29 }
0x2f96   :  { %8198 = vmatprep.subr.mxu1 %v7130_v24 }
0x2f97   :  { %8199 = vmatpush3.msra.mxu1 %v7114_v31 }
0x303e   :  { %v8853_v37 = vpop.f32.mrf.mxu1 }
0x303f   :  { %v6946_v44 = vadd.f32 %v8853_v37, %v6401_v43  ;;  %v7016_v43 = vld [vmem:[%s10512_s18 + $0x20] sm:$0xff] }
0x3040   :  { %v6936_v17 = vpop.f32.mrf.mxu1  ;;  %7053 = vmatpush1.msra.mxu0 %v7016_v43 }
0x3041   :  { %v6955_v45 = vadd.f32 %v6946_v44, %v9969_v54  ;;  %v6945_v46 = vadd.f32 %v6936_v17, %v10269_v61  ;;  %v7014_v61 = vld [vmem:[%s10512_s18 + $0x10] sm:$0xff]  ;;  %7054 = vmatprep.subr.mxu0 %v7015_v6  ;;  %v7812_v17 = vld [vmem:[%s10510_s16 + $0x2] ss:$0 sm:$0xff] }
0x3042   :  { %7055 = vmatpush1.msra.mxu0 %v7014_v61 }
0x3043   :  { %v6954_v47 = vadd.f32 %v6945_v46, %v9967_v36  ;;  %v6965_v48 = vadd.f32 %v7809_v42, %v6955_v45  ;;  %7056 = vmatprep.subr.mxu0 %v7013_v1  ;;  %v7813_v45 = vld [vmem:[%s10511_s17 + $0x2] ss:$0 sm:$0xff] }
0x3044   :  { %7057 = vmatpush1.msra.mxu0 %v7012_v2 }
0x3045   :  { %v6973_v49 = vsel %vm303_vm5, %v6965_v48, 0.0  ;;  %v6964_v50 = vadd.f32 %v7809_v42, %v6954_v47  ;;  %8854 = vmatprep.subr.mxu0 %v9017_v3 }
0x3046   :  { %6974 = vadd.xlane.f32.xlu1 %v6973_v49  ;;  %v7129_v49 = vld [vmem:[%s10514_s20 + $0x90] sm:$0xff] }
0x3047   :  { %v6970_v51 = vsel %vm303_vm5, %v6964_v50, 0.0  ;;  %8200 = vmatprep.subr.mxu1 %v7129_v49 }
0x3048   :  { %6971 = vadd.xlane.f32.xlu0 %v6970_v51  ;;  %v7128_v51 = vld [vmem:[%s10514_s20 + $0x88] sm:$0xff] }
0x30cf   :  { %v6975_v9 = vpop.xlane.xlu1 %6974 }
0x30d0   :  { %v6977_v58 = vmul.f32 0.03125, %v6975_v9  ;;  %v7112_v9 = vld [vmem:[%s10514_s20 + $0x8] sm:$0xff] }
0x30d1   :  { %v6972_v59 = vpop.xlane.xlu0 %6971 }
0x30d2   :  { %v10305_v60 = vsub.f32 %v6965_v48, %v6977_v58  ;;  %v6976_v62 = vmul.f32 0.03125, %v6972_v59  ;;  %v7127_v58 = vld [vmem:[%s10514_s20 + $0x80] sm:$0xff] }
0x30d3   :  { %v7111_v59 = vld [vmem:[%s10514_s20] sm:$0xff] }
0x30d4   :  { %v10307_v10 = vsub.f32 %v6964_v50, %v6976_v62  ;;  %v6981_v54 = vmul.f32 %v10305_v60, %v10305_v60  ;;  %v7113_v50 = vld [vmem:[%s10514_s20 + $0x10] sm:$0xff]  ;;  %v7104_v62 = vld [vmem:[%s10513_s19 + $0x8] sm:$0xff] }
0x30d5   :  { %8201 = vmatpush3.msra.mxu1 %v7113_v50 }
0x30d6   :  { %v6985_v36 = vsel %vm303_vm5, %v6981_v54, 0.0  ;;  %v6980_v11 = vmul.f32 %v10307_v10, %v10307_v10  ;;  %8202 = vmatprep.subr.mxu1 %v7128_v51 }
0x30d7   :  { %6986 = vadd.xlane.f32.xlu1 %v6985_v36  ;;  %8203 = vmatpush3.msra.mxu1 %v7112_v9 }
0x30d8   :  { %v6982_v35 = vsel %vm303_vm5, %v6980_v11, 0.0  ;;  %8204 = vmatprep.subr.mxu1 %v7127_v58 }
0x30d9   :  { %6983 = vadd.xlane.f32.xlu0 %v6982_v35  ;;  %8205 = vmatpush3.msra.mxu1 %v7111_v59 }
0x3160   :  { %v6987_v33 = vpop.xlane.xlu1 %6986 }
0x3161   :  { %v6989_v38 = vmul.f32 0.03125, %v6987_v33 }
0x3162   :  { %v6984_v53 = vpop.xlane.xlu0 %6983 }
0x3163   :  { %v6991_v56 = vadd.f32 1e-05, %v6989_v38  ;;  %v6988_v14 = vmul.f32 0.03125, %v6984_v53 }
0x3165   :  { %8983 = vrsqrt.f32 %v6991_v56  ;;  %v6990_v26 = vadd.f32 1e-05, %v6988_v14 }
0x3167   :  { %8985 = vrsqrt.f32 %v6990_v26 }
0x3172   :  { %v8984_v34 = vpop.eup %8983 }
0x3173   :  { %v6995_v44 = vmul.f32 %v8984_v34, %v10305_v60 }
0x3174   :  { %v8986_v40 = vpop.eup %8985 }
0x3175   :  { %v6994_v37 = vmul.f32 %v8986_v40, %v10307_v10  ;;  %v7003_v47 = vmul.f32 %v7812_v17, %v6995_v44  ;;  %v7103_v10 = vld [vmem:[%s10513_s19] sm:$0xff] }
0x3177   :  { %v7002_v42 = vmul.f32 %v7812_v17, %v6994_v37  ;;  %v7011_v48 = vadd.f32 %v7813_v45, %v7003_v47 }
0x3179   :  { %v7010_v46 = vadd.f32 %v7813_v45, %v7002_v42 }
0x317b   :  { %7814 = vmatmul.mubr.msk.f32.vlgmr.msra.gmra.mxu0 %vm303_vm5, %v7010_v46 }
0x317c   :  { %7096 = vmatprep.mubr.f32.mxu0 %v9017_v3 }
0x317f   :  { %7815 = vmatmul.mubr.msk.f32.gmra.mxu0 %vm303_vm5, %v7011_v48 }
0x3180   :  { %8858 = vmatprep.mubr.msk.f32.mxu0 %vm9018_vm1, %v9017_v3 }
0x323b   :  { %v7092_v60 = vpop.f32.mrf.mxu0 }
0x323c   :  { %v7107_v11 = vmul.f32 %v7103_v10, %v7092_v60 }
0x323d   :  { %v7094_v54 = vpop.f32.mrf.mxu0 }
0x323e   :  { %v7108_v36 = vmul.f32 %v7104_v62, %v7094_v54 }
0x323f   :  { %v7098_v35 = vpop.f32.mrf.mxu0 }
0x3240   :  { %7207 = vmatprep.mubr.f32.mxu1 %v7108_v36  ;;  %v7109_v6 = vmul.f32 %v7105_v63, %v7098_v35 }
0x3241   :  { %v7100_v30 = vpop.f32.mrf.mxu0  ;;  %7208 = vmatmul.mubr.f32.vlgmr.msra.gmra.mxu1 %v7107_v11 }
0x3242   :  { %v7110_v43 = vmul.f32 %v7106_v55, %v7100_v30 }
0x3244   :  { %7212 = vmatprep.mubr.f32.mxu1 %v7110_v43 }
0x3245   :  { %7213 = vmatmul.mubr.f32.gmra.mxu1 %v7109_v6 }
0x3301   :  { %v8206_v61 = vpop.f32.mrf.mxu1 }
0x3303   :  { %v8207_v1 = vpop.f32.mrf.mxu1 }
0x3304   :  { %v8208_v8 = vadd.f32 %v8207_v1, %v8206_v61 }
0x3305   :  { %v8209_v2 = vpop.f32.mrf.mxu1 }
0x3307   :  { %v8210_v5 = vpop.f32.mrf.mxu1 }
0x3308   :  { %v8211_v7 = vadd.f32 %v8210_v5, %v8209_v2 }
0x330a   :  { %8855 = vmatpush3.msra.mxu0 %v8211_v7 }
0x330b   :  { %8856 = vmatprep.subr.mxu0 %v9017_v3 }
0x330c   :  { %8857 = vmatpush3.msra.mxu0 %v8208_v8 }
0x330d   :  { %8859 = vmatmul.mubr.msk.f32.vlgmr.msra.gmra.mxu0 %vm648_vm6, %v7218_v27  ;;  %8861 = vmatprep.subr.mxu0 %v9017_v3 }
0x330e   :  { %8862 = vmatpush3.msra.mxu0 %v7303_v18  ;;  %8869 = vmatprep.mubr.msk.f32.mxu0 %vm9018_vm1, %v9017_v3 }
0x330f   :  { %8863 = vmatprep.subr.mxu0 %v9017_v3 }
0x3310   :  { %8864 = vmatpush3.msra.mxu0 %v7302_v52 }
0x3311   :  { %8865 = vmatprep.subr.mxu0 %v9017_v3 }
0x3312   :  { %8866 = vmatpush3.msra.mxu0 %v7301_v57 }
0x3313   :  { %8867 = vmatprep.subr.mxu0 %v9017_v3 }
0x3314   :  { %8868 = vmatpush3.msra.mxu0 %v7300_v12 }
0x33cd   :  { %v7295_v20 = vpop.f32.mrf.mxu0 }
0x33ce   :  { %v7296_v21 = vadd.f32 %v7816_v19, %v7295_v20 }
0x33cf   :  { %v8860_v22 = vpop.f32.mrf.mxu0 }
0x33d0   :  { %v7299_v23 = vmax.f32 %v7296_v21, 0.0 }
0x33d2   :  { %8870 = vmatmul.mubr.msk.f32.vlgmr.msra.gmra.mxu0 %vm303_vm5, %v7299_v23 }
0x33d3   :  { %9006 = shalt.err (!%p9003_p4)
}
0x33d4   :  { %s9020_s23 = smov 128   ;;  %s9021_s27 = smov 8   ;;  %v7818_v3 = vld [vmem:[#allocation2] ss:$0 sm:$0xff]  ;;  %vm7390_vm7 = vcmask 1024  }
0x33d5   :  { %7405 = dma.vmem_to_hbm [thread:$0]  %s7400_s29, 768, %s10520_s26, [#allocation4], %s9020_s23, %s9020_s23, %s9021_s27  }
0x3492   :  { %v7380_v25 = vpop.f32.mrf.mxu0 }
0x3493   :  { %v7381_v32 = vadd.f32 %v7818_v3, %v7380_v25 }
0x3494   :  { %v8871_v39 = vpop.f32.mrf.mxu0 }
0x3495   :  { %v7820_v41 = vmul.f32 -1.442695, %v7381_v32 }
0x3497   :  { %8987 = vpow2.f32 %v7820_v41 }
0x34a4   :  { %v8988_v15 = vpop.eup %8987 }
0x34a5   :  { %v7387_v16 = vadd.f32 1.0, %v8988_v15 }
0x34a7   :  { %8989 = vrcp.f32 %v7387_v16 }
0x34b4   :  { %v8990_v0 = vpop.eup %8989 }
0x34b5   :  { %7391 = vst.msk [vmem:[%s10519_s25] sm:$0x3] %vm7390_vm7, %v8990_v0 }
0x34b6   :  { %9015 = dma.done.wait [#allocation4], 768  }
0x34b7   :  { %9016 = vsyncadd [#allocation4], 4294966528 }
0x34b8   :  { %7411 = vsyncpa [#allocation4], 1 }

</bundles_post_ra>
